<compile_context>
chip_gen: v6e
topology: v6e:2x2x1
jax: 0.10.0
libtpu: 0.0.40
codegen_flags: <defaults>
</compile_context>

<pallas_src>
import functools

import jax
import jax.numpy as jnp
from jax.experimental import pallas as pl
from jax.experimental.pallas import tpu as pltpu


def _round_up(x, m):
    return ((x + m - 1) // m) * m


# ----------------------------------------------------------------------------
# Tiled fused matmul (+bias, +residual, +ReLU) kernel
# ----------------------------------------------------------------------------
def _mm_kernel(a_ref, w_ref, b_ref, o_ref, acc_ref, *, activation):
    @pl.when(pl.program_id(2) == 0)
    def _():
        acc_ref[...] = jnp.zeros_like(acc_ref)

    acc_ref[...] += jnp.dot(a_ref[...], w_ref[...],
                            preferred_element_type=jnp.float32)

    @pl.when(pl.program_id(2) == pl.num_programs(2) - 1)
    def _():
        out = acc_ref[...] + b_ref[...]
        if activation == "relu":
            out = jnp.maximum(out, 0.0)
        o_ref[...] = out


def _mm_res_kernel(a_ref, w_ref, b_ref, r_ref, o_ref, acc_ref, *, activation):
    @pl.when(pl.program_id(2) == 0)
    def _():
        acc_ref[...] = jnp.zeros_like(acc_ref)

    acc_ref[...] += jnp.dot(a_ref[...], w_ref[...],
                            preferred_element_type=jnp.float32)

    @pl.when(pl.program_id(2) == pl.num_programs(2) - 1)
    def _():
        out = acc_ref[...] + b_ref[...] + r_ref[...]
        if activation == "relu":
            out = jnp.maximum(out, 0.0)
        o_ref[...] = out


def matmul_bias_act(a, w, b, residual=None, activation="none"):
    """Tiled, pipelined (im2col-)matmul + bias (+residual) (+ReLU).

    M padded to multiple of 8, N/K padded to multiples of 128 (lane-dense
    outputs, aligned MXU tiles).  MXU operands in bf16, f32 accumulation and
    epilogue.  Grid axes: (M, N) parallel (megacore), K arbitrary (reduction).
    """
    M, K = a.shape
    N = w.shape[1]

    # tile sizes (multiples of 8 / 128; sized well under VMEM limits)
    if M >= 512:
        tm = 256
    elif M >= 128:
        tm = 128
    else:
        tm = _round_up(M, 8)
    Mp = _round_up(M, tm)

    tn = 128
    Np = _round_up(N, tn)

    Kp = _round_up(K, 128)
    if Kp <= 512:
        tk = Kp
    elif Kp % 512 == 0:
        tk = 512
    elif Kp % 256 == 0:
        tk = 256
    else:
        tk = 128

    ap = jnp.pad(a.astype(jnp.float32), ((0, Mp - M), (0, Kp - K))).astype(jnp.bfloat16)
    wp = jnp.pad(w.astype(jnp.float32), ((0, Kp - K), (0, Np - N))).astype(jnp.bfloat16)
    bp = jnp.pad(b.reshape(1, N).astype(jnp.float32), ((0, 0), (0, Np - N)))

    grid = (Mp // tm, Np // tn, Kp // tk)
    in_specs = [
        pl.BlockSpec((tm, tk), lambda i, j, k: (i, k)),
        pl.BlockSpec((tk, tn), lambda i, j, k: (k, j)),
        pl.BlockSpec((1, tn), lambda i, j, k: (0, j)),
    ]
    args = [ap, wp, bp]
    if residual is None:
        kern = functools.partial(_mm_kernel, activation=activation)
    else:
        rp = jnp.pad(residual.astype(jnp.float32), ((0, Mp - M), (0, Np - N)))
        in_specs.append(pl.BlockSpec((tm, tn), lambda i, j, k: (i, j)))
        args.append(rp)
        kern = functools.partial(_mm_res_kernel, activation=activation)

    out = pl.pallas_call(
        kern,
        out_shape=jax.ShapeDtypeStruct((Mp, Np), jnp.float32),
        grid_spec=pltpu.PrefetchScalarGridSpec(
            num_scalar_prefetch=0,
            grid=grid,
            in_specs=in_specs,
            out_specs=pl.BlockSpec((tm, tn), lambda i, j, k: (i, j)),
            scratch_shapes=[pltpu.VMEM((tm, tn), jnp.float32)],
        ),
        compiler_params=pltpu.CompilerParams(
            dimension_semantics=("parallel", "parallel", "arbitrary")),
    )(*args)
    return out[:M, :N]


# ----------------------------------------------------------------------------
# AvgPool2d(3,3,stride=2,pad=1), count_include_pad=True  (VPU kernel)
# ----------------------------------------------------------------------------
def _avgpool3x3_kernel(x_ref, o_ref):
    x = x_ref[0]                        # (H+2, W+2, C)
    H = o_ref.shape[1]
    W = o_ref.shape[2]
    acc = jnp.zeros((H, W, x.shape[-1]), jnp.float32)
    for i in range(3):
        for j in range(3):
            acc = acc + x[i:i + H, j:j + W, :]
    o_ref[0] = acc * (1.0 / 9.0)


def avg_pool_3x3_s2_p1(x):
    # x: (N, H, W, C) -> (N, Ho, Wo, C); full-res 3x3 box mean on the VPU,
    # then a cheap stride-2 subsample in the wrapper.
    N, H, W, C = x.shape
    xp = jnp.pad(x, ((0, 0), (1, 1), (1, 1), (0, 0)))
    full = pl.pallas_call(
        _avgpool3x3_kernel,
        out_shape=jax.ShapeDtypeStruct((N, H, W, C), jnp.float32),
        grid_spec=pltpu.PrefetchScalarGridSpec(
            num_scalar_prefetch=0,
            grid=(N,),
            in_specs=[pl.BlockSpec((1, H + 2, W + 2, C),
                                   lambda n: (n, 0, 0, 0))],
            out_specs=pl.BlockSpec((1, H, W, C), lambda n: (n, 0, 0, 0)),
        ),
        compiler_params=pltpu.CompilerParams(dimension_semantics=("parallel",)),
    )(xp)
    return full[:, ::2, ::2, :]


# ----------------------------------------------------------------------------
# Fused GRU recurrence kernel: grid over time, weights/state VMEM-resident
# ----------------------------------------------------------------------------
def _gru_seq_kernel(xg_ref, whh_ref, bhh_ref, y_ref, h_ref):
    # PyTorch GRU cell (per time step t of the grid):
    #   r = sigmoid(xr + Whr h + bhr) ; z = sigmoid(xz + Whz h + bhz)
    #   n = tanh(xn + r * (Whn h + bhn)) ; h' = (1-z) n + z h
    # whh/bhh are the [r|z|n]-concatenated hidden weights (one fused dot).
    @pl.when(pl.program_id(0) == 0)
    def _():
        h_ref[...] = jnp.zeros_like(h_ref)

    h = h_ref[...]                                    # (Bp, H)
    H = h_ref.shape[1]
    hg = jnp.dot(h, whh_ref[...],
                 preferred_element_type=jnp.float32) + bhh_ref[...]
    xg = xg_ref[0]                                    # (Bp, 3H)
    r = jax.nn.sigmoid(xg[:, :H] + hg[:, :H])
    z = jax.nn.sigmoid(xg[:, H:2 * H] + hg[:, H:2 * H])
    n = jnp.tanh(xg[:, 2 * H:] + r * hg[:, 2 * H:])
    h_new = (1.0 - z) * n + z * h
    h_ref[...] = h_new
    y_ref[0] = h_new


def gru_direction(x, p):
    # x: (T, B, I) -> (T, B, H); one pallas_call for the whole sequence.
    T, B, I = x.shape
    H = p["whh"].shape[0]

    # Input projection for all time steps at once (tiled matmul kernel).
    xg = matmul_bias_act(x.reshape(T * B, I), p["wih"], p["bih"])
    xg = xg.reshape(T, B, 3 * H)

    Bp = _round_up(max(B, 8), 8)            # fill the 8-sublane dimension
    if Bp != B:
        xg = jnp.pad(xg, ((0, 0), (0, Bp - B), (0, 0)))

    y = pl.pallas_call(
        _gru_seq_kernel,
        out_shape=jax.ShapeDtypeStruct((T, Bp, H), jnp.float32),
        grid_spec=pltpu.PrefetchScalarGridSpec(
            num_scalar_prefetch=0,
            grid=(T,),
            in_specs=[
                pl.BlockSpec((1, Bp, 3 * H), lambda t: (t, 0, 0)),   # gates_t
                pl.BlockSpec((H, 3 * H), lambda t: (0, 0)),          # resident
                pl.BlockSpec((1, 3 * H), lambda t: (0, 0)),          # resident
            ],
            out_specs=pl.BlockSpec((1, Bp, H), lambda t: (t, 0, 0)),
            scratch_shapes=[pltpu.VMEM((Bp, H), jnp.float32)],       # h state
        ),
        compiler_params=pltpu.CompilerParams(
            dimension_semantics=("arbitrary",)),
    )(xg, p["whh"], p["bhh"].reshape(1, 3 * H))
    return y[:, :B, :]


def gru_forward(x, layers):
    # x: (B, T, F) batch_first -> (B, T, 2H)
    h = jnp.transpose(x, (1, 0, 2))
    for layer in layers:
        yf = gru_direction(h, layer["fwd"])
        yb = gru_direction(h[::-1], layer["bwd"])[::-1]
        h = jnp.concatenate([yf, yb], axis=-1)
        # inter-layer dropout(0.2) -> identity (eval mode)
    return jnp.transpose(h, (1, 0, 2))


# ----------------------------------------------------------------------------
# im2col glue (plain JAX; static unrolled slicing)
# TODO(synk): replace with in-kernel tap-accumulate convolution to avoid the
#             HBM materialization of expanded columns.
# ----------------------------------------------------------------------------
def im2col_2d(x, kh, kw, stride, pad):
    # x: (N, H, W, C) -> cols (N*Ho*Wo, kh*kw*C), column order (kh, kw, C)
    N, H, W, C = x.shape
    xp = jnp.pad(x, ((0, 0), (pad, pad), (pad, pad), (0, 0)))
    Ho = (H + 2 * pad - kh) // stride + 1
    Wo = (W + 2 * pad - kw) // stride + 1
    cols = []
    for i in range(kh):
        for j in range(kw):
            cols.append(xp[:, i:i + stride * Ho:stride, j:j + stride * Wo:stride, :])
    col = jnp.concatenate(cols, axis=-1)
    return col.reshape(N * Ho * Wo, kh * kw * C), (N, Ho, Wo)


def im2col_3d(x, kt, kh, kw, st, sh, sw, pt, ph, pw):
    # x: (N, T, H, W, C) -> cols (N*To*Ho*Wo, kt*kh*kw*C), order (kt, kh, kw, C)
    N, T, H, W, C = x.shape
    xp = jnp.pad(x, ((0, 0), (pt, pt), (ph, ph), (pw, pw), (0, 0)))
    To = (T + 2 * pt - kt) // st + 1
    Ho = (H + 2 * ph - kh) // sh + 1
    Wo = (W + 2 * pw - kw) // sw + 1
    cols = []
    for a in range(kt):
        for i in range(kh):
            for j in range(kw):
                cols.append(xp[:, a:a + st * To:st,
                               i:i + sh * Ho:sh,
                               j:j + sw * Wo:sw, :])
    col = jnp.concatenate(cols, axis=-1)
    return col.reshape(N * To * Ho * Wo, kt * kh * kw * C), (N, To, Ho, Wo)


# ----------------------------------------------------------------------------
# Model pieces
# ----------------------------------------------------------------------------
def basic_block(x, p, stride):
    """ResNet basic block: conv3x3->ReLU->conv3x3 (+shortcut) -> ReLU.
    Returns (out, intermediate) like SBasicBlock."""
    n0, H, W, Cin = x.shape
    c1, _ = im2col_2d(x, 3, 3, stride, 1)
    cout = p["w1"].shape[1]
    Ho = (H + 2 - 3) // stride + 1
    Wo = (W + 2 - 3) // stride + 1
    h1 = matmul_bias_act(c1, p["w1"], p["b1"], activation="relu")
    h1 = h1.reshape(n0, Ho, Wo, cout)

    c2, _ = im2col_2d(h1, 3, 3, 1, 1)
    if p["wd"] is None:
        shortcut = x.reshape(n0 * Ho * Wo, Cin)
    else:
        cs, _ = im2col_2d(x, 1, 1, stride, 0)
        shortcut = matmul_bias_act(cs, p["wd"], p["bd"])
    out = matmul_bias_act(c2, p["w2"], p["b2"],
                          residual=shortcut, activation="relu")
    return out.reshape(n0, Ho, Wo, cout), h1


def scnn_forward(x, params):
    # x: (B, Cin1, T, H, W)  -- PyTorch NCDHW
    B, C, T, H, W = x.shape
    xc = jnp.transpose(x, (0, 2, 3, 4, 1))  # (B, T, H, W, C)

    # layer1: 3D conv k(5,7,7) s(1,2,2) p(2,3,3) + activation
    c3, (_, To, Ho, Wo) = im2col_3d(xc, 5, 7, 7, 1, 2, 2, 2, 3, 3)
    Cin2 = params["w1"].shape[1]
    out1 = matmul_bias_act(c3, params["w1"], params["b1"], activation="relu")
    out1 = out1.reshape(B, To, Ho, Wo, Cin2)
    out1_2d = out1.reshape(B * To, Ho, Wo, Cin2)

    # avgpool 3x3 s2 p1 (count_include_pad) as a VPU reduction kernel
    out1pool = avg_pool_3x3_s2_p1(out1_2d)

    out2_1, out2_11 = basic_block(out1pool, params["l2_1"], 1)
    out2_2, out2_21 = basic_block(out2_1, params["l2_2"], 1)
    out3_1, out3_11 = basic_block(out2_2, params["l3_1"], 2)
    out3_2, out3_21 = basic_block(out3_1, params["l3_2"], 1)
    out4_1, out4_11 = basic_block(out3_2, params["l4_1"], 2)
    out4_2, out4_21 = basic_block(out4_1, params["l4_2"], 1)
    out5_1, out5_11 = basic_block(out4_2, params["l5_1"], 2)
    out5_2, out5_21 = basic_block(out5_1, params["l5_2"], 1)

    # adaptive avg pool (1,1) + flatten(start_dim=2) -> (B, T, Cin5)
    Cin5 = out5_2.shape[-1]
    out5_2pool = jnp.mean(out5_2, axis=(1, 2)).reshape(B, To, Cin5)
    # dropout(0.5) -> identity (eval mode)

    # 3-layer bidirectional GRU backend (ann path of the module)
    out8 = gru_forward(out5_2pool, params["gru"])
    out7 = out8
    out6 = out8
    # dropout(0.5) -> identity (eval mode)

    Bt, Tt, F = out8.shape
    out = matmul_bias_act(out8.reshape(Bt * Tt, F),
                          params["w_fc"], params["b_fc"]).reshape(Bt, Tt, -1)

    # TODO(synk): fuse these statistics into the producing kernels
    #             (sum|a| / sum a^2 side-outputs) to avoid re-reading activations.
    acts = [out1, out1pool, out2_1, out2_11, out2_2, out2_21,
            out3_1, out3_11, out3_2, out3_21, out4_1, out4_11,
            out4_2, out4_21, out5_1, out5_11, out5_2, out5_21,
            out5_2pool, out6, out7, out8]
    spike_act = tuple(jnp.mean(jnp.abs(a)) for a in acts)

    loss_terms = [out1, out2_1, out2_11, out2_2, out2_21,
                  out3_1, out3_11, out3_2, out3_21,
                  out4_1, out4_11, out4_2, out4_21,
                  out5_1, out5_11, out5_2, out5_21,
                  out6, out7, out8]
    loss_act = 0.5 * sum(jnp.mean(a ** 2) for a in loss_terms)
    return out, loss_act, spike_act


# ----------------------------------------------------------------------------
# Deterministic parameter init (synthetic; scaled-down shapes)
# ----------------------------------------------------------------------------
def _init(key, shape, scale=0.05):
    return scale * jax.random.normal(key, shape, dtype=jnp.float32)


def init_block(key, cin, cout, stride):
    k1, k2, k3, k4, k5 = jax.random.split(key, 5)
    p = {
        "w1": _init(k1, (9 * cin, cout)),
        "b1": _init(k2, (cout,)),
        "w2": _init(k3, (9 * cout, cout)),
        "b2": _init(k4, (cout,)),
    }
    if stride != 1 or cin != cout:
        p["wd"] = _init(k5, (cin, cout))
        p["bd"] = jnp.zeros((cout,), jnp.float32)
    else:
        p["wd"] = None
        p["bd"] = None
    return p


def init_gru_dir(key, in_dim, hidden):
    ks = jax.random.split(key, 4)
    return {
        "wih": _init(ks[0], (in_dim, 3 * hidden)),        # [r|z|n] columns
        "bih": _init(ks[1], (3 * hidden,)),
        "whh": _init(ks[2], (hidden, 3 * hidden)),        # fused Whr|Whz|Whn
        "bhh": _init(ks[3], (3 * hidden,)),               # fused bhr|bhz|bhn
    }


def init_params(key, cin1=2, cin2=8, hidden=32, num_classes=10):
    cin3, cin4, cin5 = 2 * cin2, 4 * cin2, 8 * cin2
    keys = jax.random.split(key, 16)
    params = {
        "w1": _init(keys[0], (5 * 7 * 7 * cin1, cin2)),
        "b1": _init(keys[1], (cin2,)),
        "l2_1": init_block(keys[2], cin2, cin2, 1),
        "l2_2": init_block(keys[3], cin2, cin2, 1),
        "l3_1": init_block(keys[4], cin2, cin3, 2),
        "l3_2": init_block(keys[5], cin3, cin3, 1),
        "l4_1": init_block(keys[6], cin3, cin4, 2),
        "l4_2": init_block(keys[7], cin4, cin4, 1),
        "l5_1": init_block(keys[8], cin4, cin5, 2),
        "l5_2": init_block(keys[9], cin5, cin5, 1),
        "w_fc": _init(keys[10], (2 * hidden, num_classes)),
        "b_fc": _init(keys[11], (num_classes,)),
    }
    gru_layers = []
    in_dim = cin5
    for li in range(3):
        kf, kb = jax.random.split(keys[12 + li], 2)
        gru_layers.append({
            "fwd": init_gru_dir(kf, in_dim, hidden),
            "bwd": init_gru_dir(kb, in_dim, hidden),
        })
        in_dim = 2 * hidden
    params["gru"] = gru_layers
    return params


# ----------------------------------------------------------------------------
if __name__ == "__main__":
    key = jax.random.PRNGKey(0)
    kx, kp = jax.random.split(key)

    # Small, module-consistent shapes: B=1, Cin1=2, T=6, spatial 16x16.
    B, CIN1, T, HS, WS = 1, 2, 6, 16, 16
    x = jax.random.normal(kx, (B, CIN1, T, HS, WS), dtype=jnp.float32)
    params = init_params(kp, cin1=CIN1, cin2=8, hidden=32, num_classes=10)

    fwd = jax.jit(scnn_forward)
    out, loss_act, spike_act = fwd(x, params)
    jax.block_until_ready(out)
    jax.block_until_ready(loss_act)
    jax.block_until_ready(spike_act)

    assert out.shape == (B, T, 10)
    print("KERNEL_OK")
</pallas_src>

<mosaic_0001>
module attributes {stable_mosaic.version = 11 : i64} {
  func.func @_mm_kernel(%arg0: i32, %arg1: i32, %arg2: i32, %arg3: memref<128x512xbf16, #tpu.memory_space<vmem>>, %arg4: memref<512x128xbf16, #tpu.memory_space<vmem>>, %arg5: memref<1x128xf32, #tpu.memory_space<vmem>>, %arg6: memref<128x128xf32, #tpu.memory_space<vmem>>, %arg7: memref<128x128xf32, #tpu.memory_space<vmem>>) attributes {dimension_semantics = [#tpu.dimension_semantics<parallel>, #tpu.dimension_semantics<parallel>, #tpu.dimension_semantics<arbitrary>], iteration_bounds = array<i64: 3, 1, 1>, scalar_prefetch = 0 : i64, scratch_operands = 1 : i64, tpu.core_type = #tpu.core_type<tc>, window_params = [{transform_indices = @transform_0, window_bounds = array<i64: 128, 512>}, {transform_indices = @transform_1, window_bounds = array<i64: 512, 128>}, {transform_indices = @transform_2, window_bounds = array<i64: 1, 128>}, {transform_indices = @transform_3, window_bounds = array<i64: 128, 128>}]} {
    %c0_i32 = arith.constant 0 : i32
    %0 = arith.cmpi eq, %arg2, %c0_i32 : i32
    %1 = arith.extui %0 : i1 to i32
    %c0_i32_0 = arith.constant 0 : i32
    %2 = arith.cmpi ne, %1, %c0_i32_0 : i32
    scf.if %2 {
      %cst_10 = arith.constant 0.000000e+00 : f32
      %12 = vector.broadcast %cst_10 : f32 to vector<128x128xf32>
      %c0_11 = arith.constant 0 : index
      %c0_12 = arith.constant 0 : index
      %13 = vector.load %arg7[%c0_11, %c0_12] : memref<128x128xf32, #tpu.memory_space<vmem>>, vector<128x128xf32>
      tpu.vector_store %arg7[%c0_11, %c0_12], %12 {strides = array<i32>} : memref<128x128xf32, #tpu.memory_space<vmem>>, vector<128x128xf32>,
    } else {
    }
    %c0 = arith.constant 0 : index
    %c0_1 = arith.constant 0 : index
    %3 = vector.load %arg7[%c0, %c0_1] : memref<128x128xf32, #tpu.memory_space<vmem>>, vector<128x128xf32>
    %c0_2 = arith.constant 0 : index
    %c0_3 = arith.constant 0 : index
    %4 = vector.load %arg3[%c0_2, %c0_3] : memref<128x512xbf16, #tpu.memory_space<vmem>>, vector<128x512xbf16>
    %c0_4 = arith.constant 0 : index
    %c0_5 = arith.constant 0 : index
    %5 = vector.load %arg4[%c0_4, %c0_5] : memref<512x128xbf16, #tpu.memory_space<vmem>>, vector<512x128xbf16>
    %cst = arith.constant dense<0.000000e+00> : vector<128x128xf32>
    %6 = tpu.matmul %4, %5, %cst {dimension_numbers = #tpu.dot_dimension_numbers<[1], [0], [0], [1], [0, 0, 1, 1], [], []>} : vector<128x512xbf16>, vector<512x128xbf16>, vector<128x128xf32> -> vector<128x128xf32>
    %7 = arith.addf %3, %6 : vector<128x128xf32>
    %c0_6 = arith.constant 0 : index
    %c0_7 = arith.constant 0 : index
    %8 = vector.load %arg7[%c0_6, %c0_7] : memref<128x128xf32, #tpu.memory_space<vmem>>, vector<128x128xf32>
    tpu.vector_store %arg7[%c0_6, %c0_7], %7 {strides = array<i32>} : memref<128x128xf32, #tpu.memory_space<vmem>>, vector<128x128xf32>,
    %c0_i32_8 = arith.constant 0 : i32
    %9 = arith.cmpi eq, %arg2, %c0_i32_8 : i32
    %10 = arith.extui %9 : i1 to i32
    %c0_i32_9 = arith.constant 0 : i32
    %11 = arith.cmpi ne, %10, %c0_i32_9 : i32
    scf.if %11 {
      %c0_10 = arith.constant 0 : index
      %c0_11 = arith.constant 0 : index
      %12 = vector.load %arg7[%c0_10, %c0_11] : memref<128x128xf32, #tpu.memory_space<vmem>>, vector<128x128xf32>
      %c0_12 = arith.constant 0 : index
      %c0_13 = arith.constant 0 : index
      %13 = vector.load %arg5[%c0_12, %c0_13] : memref<1x128xf32, #tpu.memory_space<vmem>>, vector<1x128xf32>
      %14 = vector.broadcast %13 : vector<1x128xf32> to vector<128x128xf32>
      %15 = arith.addf %12, %14 : vector<128x128xf32>
      %cst_14 = arith.constant 0.000000e+00 : f32
      %16 = vector.broadcast %cst_14 : f32 to vector<128x128xf32>
      %17 = arith.maximumf %15, %16 : vector<128x128xf32>
      %c0_15 = arith.constant 0 : index
      %c0_16 = arith.constant 0 : index
      %18 = vector.load %arg6[%c0_15, %c0_16] : memref<128x128xf32, #tpu.memory_space<vmem>>, vector<128x128xf32>
      tpu.vector_store %arg6[%c0_15, %c0_16], %17 {strides = array<i32>} : memref<128x128xf32, #tpu.memory_space<vmem>>, vector<128x128xf32>,
    } else {
    }
    return
  }
  func.func @transform_0(%arg0: i32, %arg1: i32, %arg2: i32) -> (i32, i32) {
    %c0_i32 = arith.constant 0 : i32
    return %arg0, %arg2 : i32, i32
  }
  func.func @transform_1(%arg0: i32, %arg1: i32, %arg2: i32) -> (i32, i32) {
    %c0_i32 = arith.constant 0 : i32
    return %arg2, %arg1 : i32, i32
  }
  func.func @transform_2(%arg0: i32, %arg1: i32, %arg2: i32) -> (i32, i32) {
    %c0_i32 = arith.constant 0 : i32
    %c0_i32_0 = arith.constant 0 : i32
    return %c0_i32, %arg1 : i32, i32
  }
  func.func @transform_3(%arg0: i32, %arg1: i32, %arg2: i32) -> (i32, i32) {
    %c0_i32 = arith.constant 0 : i32
    return %arg0, %arg1 : i32, i32
  }
}

module attributes {stable_mosaic.version = 11 : i64} {
  func.func @_avgpool3x3_kernel(%arg0: i32, %arg1: memref<1x10x10x8xf32, #tpu.memory_space<vmem>>, %arg2: memref<1x8x8x8xf32, #tpu.memory_space<vmem>>) attributes {dimension_semantics = [#tpu.dimension_semantics<parallel>], iteration_bounds = array<i64: 6>, scalar_prefetch = 0 : i64, scratch_operands = 0 : i64, tpu.core_type = #tpu.core_type<tc>, window_params = [{transform_indices = @transform_0, window_bounds = array<i64: 1, 10, 10, 8>}, {transform_indices = @transform_1, window_bounds = array<i64: 1, 8, 8, 8>}]} {
    %c0 = arith.constant 0 : index
    %c0_0 = arith.constant 0 : index
    %c0_1 = arith.constant 0 : index
    %c0_2 = arith.constant 0 : index
    %0 = vector.load %arg1[%c0, %c0_0, %c0_1, %c0_2] : memref<1x10x10x8xf32, #tpu.memory_space<vmem>>, vector<1x10x10x8xf32>
    %1 = vector.shape_cast %0 : vector<1x10x10x8xf32> to vector<10x10x8xf32>
    %cst = arith.constant 0.000000e+00 : f32
    %2 = vector.broadcast %cst : f32 to vector<8x8x8xf32>
    %3 = vector.extract_strided_slice %1 {offsets = [0, 0, 0], sizes = [8, 8, 8], strides = [1, 1, 1]} : vector<10x10x8xf32> to vector<8x8x8xf32>
    %4 = arith.addf %2, %3 : vector<8x8x8xf32>
    %5 = vector.extract_strided_slice %1 {offsets = [0, 1, 0], sizes = [8, 8, 8], strides = [1, 1, 1]} : vector<10x10x8xf32> to vector<8x8x8xf32>
    %6 = arith.addf %4, %5 : vector<8x8x8xf32>
    %7 = vector.extract_strided_slice %1 {offsets = [0, 2, 0], sizes = [8, 8, 8], strides = [1, 1, 1]} : vector<10x10x8xf32> to vector<8x8x8xf32>
    %8 = arith.addf %6, %7 : vector<8x8x8xf32>
    %9 = vector.extract_strided_slice %1 {offsets = [1, 0, 0], sizes = [8, 8, 8], strides = [1, 1, 1]} : vector<10x10x8xf32> to vector<8x8x8xf32>
    %10 = arith.addf %8, %9 : vector<8x8x8xf32>
    %11 = vector.extract_strided_slice %1 {offsets = [1, 1, 0], sizes = [8, 8, 8], strides = [1, 1, 1]} : vector<10x10x8xf32> to vector<8x8x8xf32>
    %12 = arith.addf %10, %11 : vector<8x8x8xf32>
    %13 = vector.extract_strided_slice %1 {offsets = [1, 2, 0], sizes = [8, 8, 8], strides = [1, 1, 1]} : vector<10x10x8xf32> to vector<8x8x8xf32>
    %14 = arith.addf %12, %13 : vector<8x8x8xf32>
    %15 = vector.extract_strided_slice %1 {offsets = [2, 0, 0], sizes = [8, 8, 8], strides = [1, 1, 1]} : vector<10x10x8xf32> to vector<8x8x8xf32>
    %16 = arith.addf %14, %15 : vector<8x8x8xf32>
    %17 = vector.extract_strided_slice %1 {offsets = [2, 1, 0], sizes = [8, 8, 8], strides = [1, 1, 1]} : vector<10x10x8xf32> to vector<8x8x8xf32>
    %18 = arith.addf %16, %17 : vector<8x8x8xf32>
    %19 = vector.extract_strided_slice %1 {offsets = [2, 2, 0], sizes = [8, 8, 8], strides = [1, 1, 1]} : vector<10x10x8xf32> to vector<8x8x8xf32>
    %20 = arith.addf %18, %19 : vector<8x8x8xf32>
    %cst_3 = arith.constant 0.111111112 : f32
    %21 = vector.broadcast %cst_3 : f32 to vector<8x8x8xf32>
    %22 = arith.mulf %20, %21 : vector<8x8x8xf32>
    %c0_4 = arith.constant 0 : index
    %c0_5 = arith.constant 0 : index
    %c0_6 = arith.constant 0 : index
    %c0_7 = arith.constant 0 : index
    %23 = vector.load %arg2[%c0_4, %c0_5, %c0_6, %c0_7] : memref<1x8x8x8xf32, #tpu.memory_space<vmem>>, vector<1x8x8x8xf32>
    %24 = vector.shape_cast %23 : vector<1x8x8x8xf32> to vector<8x8x8xf32>
    %25 = vector.shape_cast %22 : vector<8x8x8xf32> to vector<1x8x8x8xf32>
    tpu.vector_store %arg2[%c0_4, %c0_5, %c0_6, %c0_7], %25 {strides = array<i32>} : memref<1x8x8x8xf32, #tpu.memory_space<vmem>>, vector<1x8x8x8xf32>,
    return
  }
  func.func @transform_0(%arg0: i32) -> (i32, i32, i32, i32) {
    %c0_i32 = arith.constant 0 : i32
    %c0_i32_0 = arith.constant 0 : i32
    %c0_i32_1 = arith.constant 0 : i32
    %c0_i32_2 = arith.constant 0 : i32
    return %arg0, %c0_i32, %c0_i32_0, %c0_i32_1 : i32, i32, i32, i32
  }
  func.func @transform_1(%arg0: i32) -> (i32, i32, i32, i32) {
    %c0_i32 = arith.constant 0 : i32
    %c0_i32_0 = arith.constant 0 : i32
    %c0_i32_1 = arith.constant 0 : i32
    %c0_i32_2 = arith.constant 0 : i32
    return %arg0, %c0_i32, %c0_i32_0, %c0_i32_1 : i32, i32, i32, i32
  }
}

module attributes {stable_mosaic.version = 11 : i64} {
  func.func @_mm_kernel(%arg0: i32, %arg1: i32, %arg2: i32, %arg3: memref<96x128xbf16, #tpu.memory_space<vmem>>, %arg4: memref<128x128xbf16, #tpu.memory_space<vmem>>, %arg5: memref<1x128xf32, #tpu.memory_space<vmem>>, %arg6: memref<96x128xf32, #tpu.memory_space<vmem>>, %arg7: memref<96x128xf32, #tpu.memory_space<vmem>>) attributes {dimension_semantics = [#tpu.dimension_semantics<parallel>, #tpu.dimension_semantics<parallel>, #tpu.dimension_semantics<arbitrary>], iteration_bounds = array<i64: 1, 1, 1>, scalar_prefetch = 0 : i64, scratch_operands = 1 : i64, tpu.core_type = #tpu.core_type<tc>, window_params = [{transform_indices = @transform_0, window_bounds = array<i64: 96, 128>}, {transform_indices = @transform_1, window_bounds = array<i64: 128, 128>}, {transform_indices = @transform_2, window_bounds = array<i64: 1, 128>}, {transform_indices = @transform_3, window_bounds = array<i64: 96, 128>}]} {
    %c0_i32 = arith.constant 0 : i32
    %0 = arith.cmpi eq, %arg2, %c0_i32 : i32
    %1 = arith.extui %0 : i1 to i32
    %c0_i32_0 = arith.constant 0 : i32
    %2 = arith.cmpi ne, %1, %c0_i32_0 : i32
    scf.if %2 {
      %cst_10 = arith.constant 0.000000e+00 : f32
      %12 = vector.broadcast %cst_10 : f32 to vector<96x128xf32>
      %c0_11 = arith.constant 0 : index
      %c0_12 = arith.constant 0 : index
      %13 = vector.load %arg7[%c0_11, %c0_12] : memref<96x128xf32, #tpu.memory_space<vmem>>, vector<96x128xf32>
      tpu.vector_store %arg7[%c0_11, %c0_12], %12 {strides = array<i32>} : memref<96x128xf32, #tpu.memory_space<vmem>>, vector<96x128xf32>,
    } else {
    }
    %c0 = arith.constant 0 : index
    %c0_1 = arith.constant 0 : index
    %3 = vector.load %arg7[%c0, %c0_1] : memref<96x128xf32, #tpu.memory_space<vmem>>, vector<96x128xf32>
    %c0_2 = arith.constant 0 : index
    %c0_3 = arith.constant 0 : index
    %4 = vector.load %arg3[%c0_2, %c0_3] : memref<96x128xbf16, #tpu.memory_space<vmem>>, vector<96x128xbf16>
    %c0_4 = arith.constant 0 : index
    %c0_5 = arith.constant 0 : index
    %5 = vector.load %arg4[%c0_4, %c0_5] : memref<128x128xbf16, #tpu.memory_space<vmem>>, vector<128x128xbf16>
    %cst = arith.constant dense<0.000000e+00> : vector<96x128xf32>
    %6 = tpu.matmul %4, %5, %cst {dimension_numbers = #tpu.dot_dimension_numbers<[1], [0], [0], [1], [0, 0, 1, 1], [], []>} : vector<96x128xbf16>, vector<128x128xbf16>, vector<96x128xf32> -> vector<96x128xf32>
    %7 = arith.addf %3, %6 : vector<96x128xf32>
    %c0_6 = arith.constant 0 : index
    %c0_7 = arith.constant 0 : index
    %8 = vector.load %arg7[%c0_6, %c0_7] : memref<96x128xf32, #tpu.memory_space<vmem>>, vector<96x128xf32>
    tpu.vector_store %arg7[%c0_6, %c0_7], %7 {strides = array<i32>} : memref<96x128xf32, #tpu.memory_space<vmem>>, vector<96x128xf32>,
    %c0_i32_8 = arith.constant 0 : i32
    %9 = arith.cmpi eq, %arg2, %c0_i32_8 : i32
    %10 = arith.extui %9 : i1 to i32
    %c0_i32_9 = arith.constant 0 : i32
    %11 = arith.cmpi ne, %10, %c0_i32_9 : i32
    scf.if %11 {
      %c0_10 = arith.constant 0 : index
      %c0_11 = arith.constant 0 : index
      %12 = vector.load %arg7[%c0_10, %c0_11] : memref<96x128xf32, #tpu.memory_space<vmem>>, vector<96x128xf32>
      %c0_12 = arith.constant 0 : index
      %c0_13 = arith.constant 0 : index
      %13 = vector.load %arg5[%c0_12, %c0_13] : memref<1x128xf32, #tpu.memory_space<vmem>>, vector<1x128xf32>
      %14 = vector.broadcast %13 : vector<1x128xf32> to vector<96x128xf32>
      %15 = arith.addf %12, %14 : vector<96x128xf32>
      %cst_14 = arith.constant 0.000000e+00 : f32
      %16 = vector.broadcast %cst_14 : f32 to vector<96x128xf32>
      %17 = arith.maximumf %15, %16 : vector<96x128xf32>
      %c0_15 = arith.constant 0 : index
      %c0_16 = arith.constant 0 : index
      %18 = vector.load %arg6[%c0_15, %c0_16] : memref<96x128xf32, #tpu.memory_space<vmem>>, vector<96x128xf32>
      tpu.vector_store %arg6[%c0_15, %c0_16], %17 {strides = array<i32>} : memref<96x128xf32, #tpu.memory_space<vmem>>, vector<96x128xf32>,
    } else {
    }
    return
  }
  func.func @transform_0(%arg0: i32, %arg1: i32, %arg2: i32) -> (i32, i32) {
    %c0_i32 = arith.constant 0 : i32
    return %arg0, %arg2 : i32, i32
  }
  func.func @transform_1(%arg0: i32, %arg1: i32, %arg2: i32) -> (i32, i32) {
    %c0_i32 = arith.constant 0 : i32
    return %arg2, %arg1 : i32, i32
  }
  func.func @transform_2(%arg0: i32, %arg1: i32, %arg2: i32) -> (i32, i32) {
    %c0_i32 = arith.constant 0 : i32
    %c0_i32_0 = arith.constant 0 : i32
    return %c0_i32, %arg1 : i32, i32
  }
  func.func @transform_3(%arg0: i32, %arg1: i32, %arg2: i32) -> (i32, i32) {
    %c0_i32 = arith.constant 0 : i32
    return %arg0, %arg1 : i32, i32
  }
}

module attributes {stable_mosaic.version = 11 : i64} {
  func.func @_mm_res_kernel(%arg0: i32, %arg1: i32, %arg2: i32, %arg3: memref<96x128xbf16, #tpu.memory_space<vmem>>, %arg4: memref<128x128xbf16, #tpu.memory_space<vmem>>, %arg5: memref<1x128xf32, #tpu.memory_space<vmem>>, %arg6: memref<96x128xf32, #tpu.memory_space<vmem>>, %arg7: memref<96x128xf32, #tpu.memory_space<vmem>>, %arg8: memref<96x128xf32, #tpu.memory_space<vmem>>) attributes {dimension_semantics = [#tpu.dimension_semantics<parallel>, #tpu.dimension_semantics<parallel>, #tpu.dimension_semantics<arbitrary>], iteration_bounds = array<i64: 1, 1, 1>, scalar_prefetch = 0 : i64, scratch_operands = 1 : i64, tpu.core_type = #tpu.core_type<tc>, window_params = [{transform_indices = @transform_0, window_bounds = array<i64: 96, 128>}, {transform_indices = @transform_1, window_bounds = array<i64: 128, 128>}, {transform_indices = @transform_2, window_bounds = array<i64: 1, 128>}, {transform_indices = @transform_3, window_bounds = array<i64: 96, 128>}, {transform_indices = @transform_4, window_bounds = array<i64: 96, 128>}]} {
    %c0_i32 = arith.constant 0 : i32
    %0 = arith.cmpi eq, %arg2, %c0_i32 : i32
    %1 = arith.extui %0 : i1 to i32
    %c0_i32_0 = arith.constant 0 : i32
    %2 = arith.cmpi ne, %1, %c0_i32_0 : i32
    scf.if %2 {
      %cst_10 = arith.constant 0.000000e+00 : f32
      %12 = vector.broadcast %cst_10 : f32 to vector<96x128xf32>
      %c0_11 = arith.constant 0 : index
      %c0_12 = arith.constant 0 : index
      %13 = vector.load %arg8[%c0_11, %c0_12] : memref<96x128xf32, #tpu.memory_space<vmem>>, vector<96x128xf32>
      tpu.vector_store %arg8[%c0_11, %c0_12], %12 {strides = array<i32>} : memref<96x128xf32, #tpu.memory_space<vmem>>, vector<96x128xf32>,
    } else {
    }
    %c0 = arith.constant 0 : index
    %c0_1 = arith.constant 0 : index
    %3 = vector.load %arg8[%c0, %c0_1] : memref<96x128xf32, #tpu.memory_space<vmem>>, vector<96x128xf32>
    %c0_2 = arith.constant 0 : index
    %c0_3 = arith.constant 0 : index
    %4 = vector.load %arg3[%c0_2, %c0_3] : memref<96x128xbf16, #tpu.memory_space<vmem>>, vector<96x128xbf16>
    %c0_4 = arith.constant 0 : index
    %c0_5 = arith.constant 0 : index
    %5 = vector.load %arg4[%c0_4, %c0_5] : memref<128x128xbf16, #tpu.memory_space<vmem>>, vector<128x128xbf16>
    %cst = arith.constant dense<0.000000e+00> : vector<96x128xf32>
    %6 = tpu.matmul %4, %5, %cst {dimension_numbers = #tpu.dot_dimension_numbers<[1], [0], [0], [1], [0, 0, 1, 1], [], []>} : vector<96x128xbf16>, vector<128x128xbf16>, vector<96x128xf32> -> vector<96x128xf32>
    %7 = arith.addf %3, %6 : vector<96x128xf32>
    %c0_6 = arith.constant 0 : index
    %c0_7 = arith.constant 0 : index
    %8 = vector.load %arg8[%c0_6, %c0_7] : memref<96x128xf32, #tpu.memory_space<vmem>>, vector<96x128xf32>
    tpu.vector_store %arg8[%c0_6, %c0_7], %7 {strides = array<i32>} : memref<96x128xf32, #tpu.memory_space<vmem>>, vector<96x128xf32>,
    %c0_i32_8 = arith.constant 0 : i32
    %9 = arith.cmpi eq, %arg2, %c0_i32_8 : i32
    %10 = arith.extui %9 : i1 to i32
    %c0_i32_9 = arith.constant 0 : i32
    %11 = arith.cmpi ne, %10, %c0_i32_9 : i32
    scf.if %11 {
      %c0_10 = arith.constant 0 : index
      %c0_11 = arith.constant 0 : index
      %12 = vector.load %arg8[%c0_10, %c0_11] : memref<96x128xf32, #tpu.memory_space<vmem>>, vector<96x128xf32>
      %c0_12 = arith.constant 0 : index
      %c0_13 = arith.constant 0 : index
      %13 = vector.load %arg5[%c0_12, %c0_13] : memref<1x128xf32, #tpu.memory_space<vmem>>, vector<1x128xf32>
      %14 = vector.broadcast %13 : vector<1x128xf32> to vector<96x128xf32>
      %15 = arith.addf %12, %14 : vector<96x128xf32>
      %c0_14 = arith.constant 0 : index
      %c0_15 = arith.constant 0 : index
      %16 = vector.load %arg6[%c0_14, %c0_15] : memref<96x128xf32, #tpu.memory_space<vmem>>, vector<96x128xf32>
      %17 = arith.addf %15, %16 : vector<96x128xf32>
      %cst_16 = arith.constant 0.000000e+00 : f32
      %18 = vector.broadcast %cst_16 : f32 to vector<96x128xf32>
      %19 = arith.maximumf %17, %18 : vector<96x128xf32>
      %c0_17 = arith.constant 0 : index
      %c0_18 = arith.constant 0 : index
      %20 = vector.load %arg7[%c0_17, %c0_18] : memref<96x128xf32, #tpu.memory_space<vmem>>, vector<96x128xf32>
      tpu.vector_store %arg7[%c0_17, %c0_18], %19 {strides = array<i32>} : memref<96x128xf32, #tpu.memory_space<vmem>>, vector<96x128xf32>,
    } else {
    }
    return
  }
  func.func @transform_0(%arg0: i32, %arg1: i32, %arg2: i32) -> (i32, i32) {
    %c0_i32 = arith.constant 0 : i32
    return %arg0, %arg2 : i32, i32
  }
  func.func @transform_1(%arg0: i32, %arg1: i32, %arg2: i32) -> (i32, i32) {
    %c0_i32 = arith.constant 0 : i32
    return %arg2, %arg1 : i32, i32
  }
  func.func @transform_2(%arg0: i32, %arg1: i32, %arg2: i32) -> (i32, i32) {
    %c0_i32 = arith.constant 0 : i32
    %c0_i32_0 = arith.constant 0 : i32
    return %c0_i32, %arg1 : i32, i32
  }
  func.func @transform_3(%arg0: i32, %arg1: i32, %arg2: i32) -> (i32, i32) {
    %c0_i32 = arith.constant 0 : i32
    return %arg0, %arg1 : i32, i32
  }
  func.func @transform_4(%arg0: i32, %arg1: i32, %arg2: i32) -> (i32, i32) {
    %c0_i32 = arith.constant 0 : i32
    return %arg0, %arg1 : i32, i32
  }
}

module attributes {stable_mosaic.version = 11 : i64} {
  func.func @_mm_kernel(%arg0: i32, %arg1: i32, %arg2: i32, %arg3: memref<24x128xbf16, #tpu.memory_space<vmem>>, %arg4: memref<128x128xbf16, #tpu.memory_space<vmem>>, %arg5: memref<1x128xf32, #tpu.memory_space<vmem>>, %arg6: memref<24x128xf32, #tpu.memory_space<vmem>>, %arg7: memref<24x128xf32, #tpu.memory_space<vmem>>) attributes {dimension_semantics = [#tpu.dimension_semantics<parallel>, #tpu.dimension_semantics<parallel>, #tpu.dimension_semantics<arbitrary>], iteration_bounds = array<i64: 1, 1, 1>, scalar_prefetch = 0 : i64, scratch_operands = 1 : i64, tpu.core_type = #tpu.core_type<tc>, window_params = [{transform_indices = @transform_0, window_bounds = array<i64: 24, 128>}, {transform_indices = @transform_1, window_bounds = array<i64: 128, 128>}, {transform_indices = @transform_2, window_bounds = array<i64: 1, 128>}, {transform_indices = @transform_3, window_bounds = array<i64: 24, 128>}]} {
    %c0_i32 = arith.constant 0 : i32
    %0 = arith.cmpi eq, %arg2, %c0_i32 : i32
    %1 = arith.extui %0 : i1 to i32
    %c0_i32_0 = arith.constant 0 : i32
    %2 = arith.cmpi ne, %1, %c0_i32_0 : i32
    scf.if %2 {
      %cst_10 = arith.constant 0.000000e+00 : f32
      %12 = vector.broadcast %cst_10 : f32 to vector<24x128xf32>
      %c0_11 = arith.constant 0 : index
      %c0_12 = arith.constant 0 : index
      %13 = vector.load %arg7[%c0_11, %c0_12] : memref<24x128xf32, #tpu.memory_space<vmem>>, vector<24x128xf32>
      tpu.vector_store %arg7[%c0_11, %c0_12], %12 {strides = array<i32>} : memref<24x128xf32, #tpu.memory_space<vmem>>, vector<24x128xf32>,
    } else {
    }
    %c0 = arith.constant 0 : index
    %c0_1 = arith.constant 0 : index
    %3 = vector.load %arg7[%c0, %c0_1] : memref<24x128xf32, #tpu.memory_space<vmem>>, vector<24x128xf32>
    %c0_2 = arith.constant 0 : index
    %c0_3 = arith.constant 0 : index
    %4 = vector.load %arg3[%c0_2, %c0_3] : memref<24x128xbf16, #tpu.memory_space<vmem>>, vector<24x128xbf16>
    %c0_4 = arith.constant 0 : index
    %c0_5 = arith.constant 0 : index
    %5 = vector.load %arg4[%c0_4, %c0_5] : memref<128x128xbf16, #tpu.memory_space<vmem>>, vector<128x128xbf16>
    %cst = arith.constant dense<0.000000e+00> : vector<24x128xf32>
    %6 = tpu.matmul %4, %5, %cst {dimension_numbers = #tpu.dot_dimension_numbers<[1], [0], [0], [1], [0, 0, 1, 1], [], []>} : vector<24x128xbf16>, vector<128x128xbf16>, vector<24x128xf32> -> vector<24x128xf32>
    %7 = arith.addf %3, %6 : vector<24x128xf32>
    %c0_6 = arith.constant 0 : index
    %c0_7 = arith.constant 0 : index
    %8 = vector.load %arg7[%c0_6, %c0_7] : memref<24x128xf32, #tpu.memory_space<vmem>>, vector<24x128xf32>
    tpu.vector_store %arg7[%c0_6, %c0_7], %7 {strides = array<i32>} : memref<24x128xf32, #tpu.memory_space<vmem>>, vector<24x128xf32>,
    %c0_i32_8 = arith.constant 0 : i32
    %9 = arith.cmpi eq, %arg2, %c0_i32_8 : i32
    %10 = arith.extui %9 : i1 to i32
    %c0_i32_9 = arith.constant 0 : i32
    %11 = arith.cmpi ne, %10, %c0_i32_9 : i32
    scf.if %11 {
      %c0_10 = arith.constant 0 : index
      %c0_11 = arith.constant 0 : index
      %12 = vector.load %arg7[%c0_10, %c0_11] : memref<24x128xf32, #tpu.memory_space<vmem>>, vector<24x128xf32>
      %c0_12 = arith.constant 0 : index
      %c0_13 = arith.constant 0 : index
      %13 = vector.load %arg5[%c0_12, %c0_13] : memref<1x128xf32, #tpu.memory_space<vmem>>, vector<1x128xf32>
      %14 = vector.broadcast %13 : vector<1x128xf32> to vector<24x128xf32>
      %15 = arith.addf %12, %14 : vector<24x128xf32>
      %cst_14 = arith.constant 0.000000e+00 : f32
      %16 = vector.broadcast %cst_14 : f32 to vector<24x128xf32>
      %17 = arith.maximumf %15, %16 : vector<24x128xf32>
      %c0_15 = arith.constant 0 : index
      %c0_16 = arith.constant 0 : index
      %18 = vector.load %arg6[%c0_15, %c0_16] : memref<24x128xf32, #tpu.memory_space<vmem>>, vector<24x128xf32>
      tpu.vector_store %arg6[%c0_15, %c0_16], %17 {strides = array<i32>} : memref<24x128xf32, #tpu.memory_space<vmem>>, vector<24x128xf32>,
    } else {
    }
    return
  }
  func.func @transform_0(%arg0: i32, %arg1: i32, %arg2: i32) -> (i32, i32) {
    %c0_i32 = arith.constant 0 : i32
    return %arg0, %arg2 : i32, i32
  }
  func.func @transform_1(%arg0: i32, %arg1: i32, %arg2: i32) -> (i32, i32) {
    %c0_i32 = arith.constant 0 : i32
    return %arg2, %arg1 : i32, i32
  }
  func.func @transform_2(%arg0: i32, %arg1: i32, %arg2: i32) -> (i32, i32) {
    %c0_i32 = arith.constant 0 : i32
    %c0_i32_0 = arith.constant 0 : i32
    return %c0_i32, %arg1 : i32, i32
  }
  func.func @transform_3(%arg0: i32, %arg1: i32, %arg2: i32) -> (i32, i32) {
    %c0_i32 = arith.constant 0 : i32
    return %arg0, %arg1 : i32, i32
  }
}

module attributes {stable_mosaic.version = 11 : i64} {
  func.func @_mm_kernel(%arg0: i32, %arg1: i32, %arg2: i32, %arg3: memref<24x128xbf16, #tpu.memory_space<vmem>>, %arg4: memref<128x128xbf16, #tpu.memory_space<vmem>>, %arg5: memref<1x128xf32, #tpu.memory_space<vmem>>, %arg6: memref<24x128xf32, #tpu.memory_space<vmem>>, %arg7: memref<24x128xf32, #tpu.memory_space<vmem>>) attributes {dimension_semantics = [#tpu.dimension_semantics<parallel>, #tpu.dimension_semantics<parallel>, #tpu.dimension_semantics<arbitrary>], iteration_bounds = array<i64: 1, 1, 1>, scalar_prefetch = 0 : i64, scratch_operands = 1 : i64, tpu.core_type = #tpu.core_type<tc>, window_params = [{transform_indices = @transform_0, window_bounds = array<i64: 24, 128>}, {transform_indices = @transform_1, window_bounds = array<i64: 128, 128>}, {transform_indices = @transform_2, window_bounds = array<i64: 1, 128>}, {transform_indices = @transform_3, window_bounds = array<i64: 24, 128>}]} {
    %c0_i32 = arith.constant 0 : i32
    %0 = arith.cmpi eq, %arg2, %c0_i32 : i32
    %1 = arith.extui %0 : i1 to i32
    %c0_i32_0 = arith.constant 0 : i32
    %2 = arith.cmpi ne, %1, %c0_i32_0 : i32
    scf.if %2 {
      %cst_10 = arith.constant 0.000000e+00 : f32
      %12 = vector.broadcast %cst_10 : f32 to vector<24x128xf32>
      %c0_11 = arith.constant 0 : index
      %c0_12 = arith.constant 0 : index
      %13 = vector.load %arg7[%c0_11, %c0_12] : memref<24x128xf32, #tpu.memory_space<vmem>>, vector<24x128xf32>
      tpu.vector_store %arg7[%c0_11, %c0_12], %12 {strides = array<i32>} : memref<24x128xf32, #tpu.memory_space<vmem>>, vector<24x128xf32>,
    } else {
    }
    %c0 = arith.constant 0 : index
    %c0_1 = arith.constant 0 : index
    %3 = vector.load %arg7[%c0, %c0_1] : memref<24x128xf32, #tpu.memory_space<vmem>>, vector<24x128xf32>
    %c0_2 = arith.constant 0 : index
    %c0_3 = arith.constant 0 : index
    %4 = vector.load %arg3[%c0_2, %c0_3] : memref<24x128xbf16, #tpu.memory_space<vmem>>, vector<24x128xbf16>
    %c0_4 = arith.constant 0 : index
    %c0_5 = arith.constant 0 : index
    %5 = vector.load %arg4[%c0_4, %c0_5] : memref<128x128xbf16, #tpu.memory_space<vmem>>, vector<128x128xbf16>
    %cst = arith.constant dense<0.000000e+00> : vector<24x128xf32>
    %6 = tpu.matmul %4, %5, %cst {dimension_numbers = #tpu.dot_dimension_numbers<[1], [0], [0], [1], [0, 0, 1, 1], [], []>} : vector<24x128xbf16>, vector<128x128xbf16>, vector<24x128xf32> -> vector<24x128xf32>
    %7 = arith.addf %3, %6 : vector<24x128xf32>
    %c0_6 = arith.constant 0 : index
    %c0_7 = arith.constant 0 : index
    %8 = vector.load %arg7[%c0_6, %c0_7] : memref<24x128xf32, #tpu.memory_space<vmem>>, vector<24x128xf32>
    tpu.vector_store %arg7[%c0_6, %c0_7], %7 {strides = array<i32>} : memref<24x128xf32, #tpu.memory_space<vmem>>, vector<24x128xf32>,
    %c0_i32_8 = arith.constant 0 : i32
    %9 = arith.cmpi eq, %arg2, %c0_i32_8 : i32
    %10 = arith.extui %9 : i1 to i32
    %c0_i32_9 = arith.constant 0 : i32
    %11 = arith.cmpi ne, %10, %c0_i32_9 : i32
    scf.if %11 {
      %c0_10 = arith.constant 0 : index
      %c0_11 = arith.constant 0 : index
      %12 = vector.load %arg7[%c0_10, %c0_11] : memref<24x128xf32, #tpu.memory_space<vmem>>, vector<24x128xf32>
      %c0_12 = arith.constant 0 : index
      %c0_13 = arith.constant 0 : index
      %13 = vector.load %arg5[%c0_12, %c0_13] : memref<1x128xf32, #tpu.memory_space<vmem>>, vector<1x128xf32>
      %14 = vector.broadcast %13 : vector<1x128xf32> to vector<24x128xf32>
      %15 = arith.addf %12, %14 : vector<24x128xf32>
      %c0_14 = arith.constant 0 : index
      %c0_15 = arith.constant 0 : index
      %16 = vector.load %arg6[%c0_14, %c0_15] : memref<24x128xf32, #tpu.memory_space<vmem>>, vector<24x128xf32>
      tpu.vector_store %arg6[%c0_14, %c0_15], %15 {strides = array<i32>} : memref<24x128xf32, #tpu.memory_space<vmem>>, vector<24x128xf32>,
    } else {
    }
    return
  }
  func.func @transform_0(%arg0: i32, %arg1: i32, %arg2: i32) -> (i32, i32) {
    %c0_i32 = arith.constant 0 : i32
    return %arg0, %arg2 : i32, i32
  }
  func.func @transform_1(%arg0: i32, %arg1: i32, %arg2: i32) -> (i32, i32) {
    %c0_i32 = arith.constant 0 : i32
    return %arg2, %arg1 : i32, i32
  }
  func.func @transform_2(%arg0: i32, %arg1: i32, %arg2: i32) -> (i32, i32) {
    %c0_i32 = arith.constant 0 : i32
    %c0_i32_0 = arith.constant 0 : i32
    return %c0_i32, %arg1 : i32, i32
  }
  func.func @transform_3(%arg0: i32, %arg1: i32, %arg2: i32) -> (i32, i32) {
    %c0_i32 = arith.constant 0 : i32
    return %arg0, %arg1 : i32, i32
  }
}

module attributes {stable_mosaic.version = 11 : i64} {
  func.func @_mm_res_kernel(%arg0: i32, %arg1: i32, %arg2: i32, %arg3: memref<24x256xbf16, #tpu.memory_space<vmem>>, %arg4: memref<256x128xbf16, #tpu.memory_space<vmem>>, %arg5: memref<1x128xf32, #tpu.memory_space<vmem>>, %arg6: memref<24x128xf32, #tpu.memory_space<vmem>>, %arg7: memref<24x128xf32, #tpu.memory_space<vmem>>, %arg8: memref<24x128xf32, #tpu.memory_space<vmem>>) attributes {dimension_semantics = [#tpu.dimension_semantics<parallel>, #tpu.dimension_semantics<parallel>, #tpu.dimension_semantics<arbitrary>], iteration_bounds = array<i64: 1, 1, 1>, scalar_prefetch = 0 : i64, scratch_operands = 1 : i64, tpu.core_type = #tpu.core_type<tc>, window_params = [{transform_indices = @transform_0, window_bounds = array<i64: 24, 256>}, {transform_indices = @transform_1, window_bounds = array<i64: 256, 128>}, {transform_indices = @transform_2, window_bounds = array<i64: 1, 128>}, {transform_indices = @transform_3, window_bounds = array<i64: 24, 128>}, {transform_indices = @transform_4, window_bounds = array<i64: 24, 128>}]} {
    %c0_i32 = arith.constant 0 : i32
    %0 = arith.cmpi eq, %arg2, %c0_i32 : i32
    %1 = arith.extui %0 : i1 to i32
    %c0_i32_0 = arith.constant 0 : i32
    %2 = arith.cmpi ne, %1, %c0_i32_0 : i32
    scf.if %2 {
      %cst_10 = arith.constant 0.000000e+00 : f32
      %12 = vector.broadcast %cst_10 : f32 to vector<24x128xf32>
      %c0_11 = arith.constant 0 : index
      %c0_12 = arith.constant 0 : index
      %13 = vector.load %arg8[%c0_11, %c0_12] : memref<24x128xf32, #tpu.memory_space<vmem>>, vector<24x128xf32>
      tpu.vector_store %arg8[%c0_11, %c0_12], %12 {strides = array<i32>} : memref<24x128xf32, #tpu.memory_space<vmem>>, vector<24x128xf32>,
    } else {
    }
    %c0 = arith.constant 0 : index
    %c0_1 = arith.constant 0 : index
    %3 = vector.load %arg8[%c0, %c0_1] : memref<24x128xf32, #tpu.memory_space<vmem>>, vector<24x128xf32>
    %c0_2 = arith.constant 0 : index
    %c0_3 = arith.constant 0 : index
    %4 = vector.load %arg3[%c0_2, %c0_3] : memref<24x256xbf16, #tpu.memory_space<vmem>>, vector<24x256xbf16>
    %c0_4 = arith.constant 0 : index
    %c0_5 = arith.constant 0 : index
    %5 = vector.load %arg4[%c0_4, %c0_5] : memref<256x128xbf16, #tpu.memory_space<vmem>>, vector<256x128xbf16>
    %cst = arith.constant dense<0.000000e+00> : vector<24x128xf32>
    %6 = tpu.matmul %4, %5, %cst {dimension_numbers = #tpu.dot_dimension_numbers<[1], [0], [0], [1], [0, 0, 1, 1], [], []>} : vector<24x256xbf16>, vector<256x128xbf16>, vector<24x128xf32> -> vector<24x128xf32>
    %7 = arith.addf %3, %6 : vector<24x128xf32>
    %c0_6 = arith.constant 0 : index
    %c0_7 = arith.constant 0 : index
    %8 = vector.load %arg8[%c0_6, %c0_7] : memref<24x128xf32, #tpu.memory_space<vmem>>, vector<24x128xf32>
    tpu.vector_store %arg8[%c0_6, %c0_7], %7 {strides = array<i32>} : memref<24x128xf32, #tpu.memory_space<vmem>>, vector<24x128xf32>,
    %c0_i32_8 = arith.constant 0 : i32
    %9 = arith.cmpi eq, %arg2, %c0_i32_8 : i32
    %10 = arith.extui %9 : i1 to i32
    %c0_i32_9 = arith.constant 0 : i32
    %11 = arith.cmpi ne, %10, %c0_i32_9 : i32
    scf.if %11 {
      %c0_10 = arith.constant 0 : index
      %c0_11 = arith.constant 0 : index
      %12 = vector.load %arg8[%c0_10, %c0_11] : memref<24x128xf32, #tpu.memory_space<vmem>>, vector<24x128xf32>
      %c0_12 = arith.constant 0 : index
      %c0_13 = arith.constant 0 : index
      %13 = vector.load %arg5[%c0_12, %c0_13] : memref<1x128xf32, #tpu.memory_space<vmem>>, vector<1x128xf32>
      %14 = vector.broadcast %13 : vector<1x128xf32> to vector<24x128xf32>
      %15 = arith.addf %12, %14 : vector<24x128xf32>
      %c0_14 = arith.constant 0 : index
      %c0_15 = arith.constant 0 : index
      %16 = vector.load %arg6[%c0_14, %c0_15] : memref<24x128xf32, #tpu.memory_space<vmem>>, vector<24x128xf32>
      %17 = arith.addf %15, %16 : vector<24x128xf32>
      %cst_16 = arith.constant 0.000000e+00 : f32
      %18 = vector.broadcast %cst_16 : f32 to vector<24x128xf32>
      %19 = arith.maximumf %17, %18 : vector<24x128xf32>
      %c0_17 = arith.constant 0 : index
      %c0_18 = arith.constant 0 : index
      %20 = vector.load %arg7[%c0_17, %c0_18] : memref<24x128xf32, #tpu.memory_space<vmem>>, vector<24x128xf32>
      tpu.vector_store %arg7[%c0_17, %c0_18], %19 {strides = array<i32>} : memref<24x128xf32, #tpu.memory_space<vmem>>, vector<24x128xf32>,
    } else {
    }
    return
  }
  func.func @transform_0(%arg0: i32, %arg1: i32, %arg2: i32) -> (i32, i32) {
    %c0_i32 = arith.constant 0 : i32
    return %arg0, %arg2 : i32, i32
  }
  func.func @transform_1(%arg0: i32, %arg1: i32, %arg2: i32) -> (i32, i32) {
    %c0_i32 = arith.constant 0 : i32
    return %arg2, %arg1 : i32, i32
  }
  func.func @transform_2(%arg0: i32, %arg1: i32, %arg2: i32) -> (i32, i32) {
    %c0_i32 = arith.constant 0 : i32
    %c0_i32_0 = arith.constant 0 : i32
    return %c0_i32, %arg1 : i32, i32
  }
  func.func @transform_3(%arg0: i32, %arg1: i32, %arg2: i32) -> (i32, i32) {
    %c0_i32 = arith.constant 0 : i32
    return %arg0, %arg1 : i32, i32
  }
  func.func @transform_4(%arg0: i32, %arg1: i32, %arg2: i32) -> (i32, i32) {
    %c0_i32 = arith.constant 0 : i32
    return %arg0, %arg1 : i32, i32
  }
}

module attributes {stable_mosaic.version = 11 : i64} {
  func.func @_mm_kernel(%arg0: i32, %arg1: i32, %arg2: i32, %arg3: memref<24x256xbf16, #tpu.memory_space<vmem>>, %arg4: memref<256x128xbf16, #tpu.memory_space<vmem>>, %arg5: memref<1x128xf32, #tpu.memory_space<vmem>>, %arg6: memref<24x128xf32, #tpu.memory_space<vmem>>, %arg7: memref<24x128xf32, #tpu.memory_space<vmem>>) attributes {dimension_semantics = [#tpu.dimension_semantics<parallel>, #tpu.dimension_semantics<parallel>, #tpu.dimension_semantics<arbitrary>], iteration_bounds = array<i64: 1, 1, 1>, scalar_prefetch = 0 : i64, scratch_operands = 1 : i64, tpu.core_type = #tpu.core_type<tc>, window_params = [{transform_indices = @transform_0, window_bounds = array<i64: 24, 256>}, {transform_indices = @transform_1, window_bounds = array<i64: 256, 128>}, {transform_indices = @transform_2, window_bounds = array<i64: 1, 128>}, {transform_indices = @transform_3, window_bounds = array<i64: 24, 128>}]} {
    %c0_i32 = arith.constant 0 : i32
    %0 = arith.cmpi eq, %arg2, %c0_i32 : i32
    %1 = arith.extui %0 : i1 to i32
    %c0_i32_0 = arith.constant 0 : i32
    %2 = arith.cmpi ne, %1, %c0_i32_0 : i32
    scf.if %2 {
      %cst_10 = arith.constant 0.000000e+00 : f32
      %12 = vector.broadcast %cst_10 : f32 to vector<24x128xf32>
      %c0_11 = arith.constant 0 : index
      %c0_12 = arith.constant 0 : index
      %13 = vector.load %arg7[%c0_11, %c0_12] : memref<24x128xf32, #tpu.memory_space<vmem>>, vector<24x128xf32>
      tpu.vector_store %arg7[%c0_11, %c0_12], %12 {strides = array<i32>} : memref<24x128xf32, #tpu.memory_space<vmem>>, vector<24x128xf32>,
    } else {
    }
    %c0 = arith.constant 0 : index
    %c0_1 = arith.constant 0 : index
    %3 = vector.load %arg7[%c0, %c0_1] : memref<24x128xf32, #tpu.memory_space<vmem>>, vector<24x128xf32>
    %c0_2 = arith.constant 0 : index
    %c0_3 = arith.constant 0 : index
    %4 = vector.load %arg3[%c0_2, %c0_3] : memref<24x256xbf16, #tpu.memory_space<vmem>>, vector<24x256xbf16>
    %c0_4 = arith.constant 0 : index
    %c0_5 = arith.constant 0 : index
    %5 = vector.load %arg4[%c0_4, %c0_5] : memref<256x128xbf16, #tpu.memory_space<vmem>>, vector<256x128xbf16>
    %cst = arith.constant dense<0.000000e+00> : vector<24x128xf32>
    %6 = tpu.matmul %4, %5, %cst {dimension_numbers = #tpu.dot_dimension_numbers<[1], [0], [0], [1], [0, 0, 1, 1], [], []>} : vector<24x256xbf16>, vector<256x128xbf16>, vector<24x128xf32> -> vector<24x128xf32>
    %7 = arith.addf %3, %6 : vector<24x128xf32>
    %c0_6 = arith.constant 0 : index
    %c0_7 = arith.constant 0 : index
    %8 = vector.load %arg7[%c0_6, %c0_7] : memref<24x128xf32, #tpu.memory_space<vmem>>, vector<24x128xf32>
    tpu.vector_store %arg7[%c0_6, %c0_7], %7 {strides = array<i32>} : memref<24x128xf32, #tpu.memory_space<vmem>>, vector<24x128xf32>,
    %c0_i32_8 = arith.constant 0 : i32
    %9 = arith.cmpi eq, %arg2, %c0_i32_8 : i32
    %10 = arith.extui %9 : i1 to i32
    %c0_i32_9 = arith.constant 0 : i32
    %11 = arith.cmpi ne, %10, %c0_i32_9 : i32
    scf.if %11 {
      %c0_10 = arith.constant 0 : index
      %c0_11 = arith.constant 0 : index
      %12 = vector.load %arg7[%c0_10, %c0_11] : memref<24x128xf32, #tpu.memory_space<vmem>>, vector<24x128xf32>
      %c0_12 = arith.constant 0 : index
      %c0_13 = arith.constant 0 : index
      %13 = vector.load %arg5[%c0_12, %c0_13] : memref<1x128xf32, #tpu.memory_space<vmem>>, vector<1x128xf32>
      %14 = vector.broadcast %13 : vector<1x128xf32> to vector<24x128xf32>
      %15 = arith.addf %12, %14 : vector<24x128xf32>
      %cst_14 = arith.constant 0.000000e+00 : f32
      %16 = vector.broadcast %cst_14 : f32 to vector<24x128xf32>
      %17 = arith.maximumf %15, %16 : vector<24x128xf32>
      %c0_15 = arith.constant 0 : index
      %c0_16 = arith.constant 0 : index
      %18 = vector.load %arg6[%c0_15, %c0_16] : memref<24x128xf32, #tpu.memory_space<vmem>>, vector<24x128xf32>
      tpu.vector_store %arg6[%c0_15, %c0_16], %17 {strides = array<i32>} : memref<24x128xf32, #tpu.memory_space<vmem>>, vector<24x128xf32>,
    } else {
    }
    return
  }
  func.func @transform_0(%arg0: i32, %arg1: i32, %arg2: i32) -> (i32, i32) {
    %c0_i32 = arith.constant 0 : i32
    return %arg0, %arg2 : i32, i32
  }
  func.func @transform_1(%arg0: i32, %arg1: i32, %arg2: i32) -> (i32, i32) {
    %c0_i32 = arith.constant 0 : i32
    return %arg2, %arg1 : i32, i32
  }
  func.func @transform_2(%arg0: i32, %arg1: i32, %arg2: i32) -> (i32, i32) {
    %c0_i32 = arith.constant 0 : i32
    %c0_i32_0 = arith.constant 0 : i32
    return %c0_i32, %arg1 : i32, i32
  }
  func.func @transform_3(%arg0: i32, %arg1: i32, %arg2: i32) -> (i32, i32) {
    %c0_i32 = arith.constant 0 : i32
    return %arg0, %arg1 : i32, i32
  }
}

module attributes {stable_mosaic.version = 11 : i64} {
  func.func @_mm_kernel(%arg0: i32, %arg1: i32, %arg2: i32, %arg3: memref<8x256xbf16, #tpu.memory_space<vmem>>, %arg4: memref<256x128xbf16, #tpu.memory_space<vmem>>, %arg5: memref<1x128xf32, #tpu.memory_space<vmem>>, %arg6: memref<8x128xf32, #tpu.memory_space<vmem>>, %arg7: memref<8x128xf32, #tpu.memory_space<vmem>>) attributes {dimension_semantics = [#tpu.dimension_semantics<parallel>, #tpu.dimension_semantics<parallel>, #tpu.dimension_semantics<arbitrary>], iteration_bounds = array<i64: 1, 1, 1>, scalar_prefetch = 0 : i64, scratch_operands = 1 : i64, tpu.core_type = #tpu.core_type<tc>, window_params = [{transform_indices = @transform_0, window_bounds = array<i64: 8, 256>}, {transform_indices = @transform_1, window_bounds = array<i64: 256, 128>}, {transform_indices = @transform_2, window_bounds = array<i64: 1, 128>}, {transform_indices = @transform_3, window_bounds = array<i64: 8, 128>}]} {
    %c0_i32 = arith.constant 0 : i32
    %0 = arith.cmpi eq, %arg2, %c0_i32 : i32
    %1 = arith.extui %0 : i1 to i32
    %c0_i32_0 = arith.constant 0 : i32
    %2 = arith.cmpi ne, %1, %c0_i32_0 : i32
    scf.if %2 {
      %cst_10 = arith.constant 0.000000e+00 : f32
      %12 = vector.broadcast %cst_10 : f32 to vector<8x128xf32>
      %c0_11 = arith.constant 0 : index
      %c0_12 = arith.constant 0 : index
      %13 = vector.load %arg7[%c0_11, %c0_12] : memref<8x128xf32, #tpu.memory_space<vmem>>, vector<8x128xf32>
      tpu.vector_store %arg7[%c0_11, %c0_12], %12 {strides = array<i32>} : memref<8x128xf32, #tpu.memory_space<vmem>>, vector<8x128xf32>,
    } else {
    }
    %c0 = arith.constant 0 : index
    %c0_1 = arith.constant 0 : index
    %3 = vector.load %arg7[%c0, %c0_1] : memref<8x128xf32, #tpu.memory_space<vmem>>, vector<8x128xf32>
    %c0_2 = arith.constant 0 : index
    %c0_3 = arith.constant 0 : index
    %4 = vector.load %arg3[%c0_2, %c0_3] : memref<8x256xbf16, #tpu.memory_space<vmem>>, vector<8x256xbf16>
    %c0_4 = arith.constant 0 : index
    %c0_5 = arith.constant 0 : index
    %5 = vector.load %arg4[%c0_4, %c0_5] : memref<256x128xbf16, #tpu.memory_space<vmem>>, vector<256x128xbf16>
    %cst = arith.constant dense<0.000000e+00> : vector<8x128xf32>
    %6 = tpu.matmul %4, %5, %cst {dimension_numbers = #tpu.dot_dimension_numbers<[1], [0], [0], [1], [0, 0, 1, 1], [], []>} : vector<8x256xbf16>, vector<256x128xbf16>, vector<8x128xf32> -> vector<8x128xf32>
    %7 = arith.addf %3, %6 : vector<8x128xf32>
    %c0_6 = arith.constant 0 : index
    %c0_7 = arith.constant 0 : index
    %8 = vector.load %arg7[%c0_6, %c0_7] : memref<8x128xf32, #tpu.memory_space<vmem>>, vector<8x128xf32>
    tpu.vector_store %arg7[%c0_6, %c0_7], %7 {strides = array<i32>} : memref<8x128xf32, #tpu.memory_space<vmem>>, vector<8x128xf32>,
    %c0_i32_8 = arith.constant 0 : i32
    %9 = arith.cmpi eq, %arg2, %c0_i32_8 : i32
    %10 = arith.extui %9 : i1 to i32
    %c0_i32_9 = arith.constant 0 : i32
    %11 = arith.cmpi ne, %10, %c0_i32_9 : i32
    scf.if %11 {
      %c0_10 = arith.constant 0 : index
      %c0_11 = arith.constant 0 : index
      %12 = vector.load %arg7[%c0_10, %c0_11] : memref<8x128xf32, #tpu.memory_space<vmem>>, vector<8x128xf32>
      %c0_12 = arith.constant 0 : index
      %c0_13 = arith.constant 0 : index
      %13 = vector.load %arg5[%c0_12, %c0_13] : memref<1x128xf32, #tpu.memory_space<vmem>>, vector<1x128xf32>
      %14 = vector.broadcast %13 : vector<1x128xf32> to vector<8x128xf32>
      %15 = arith.addf %12, %14 : vector<8x128xf32>
      %cst_14 = arith.constant 0.000000e+00 : f32
      %16 = vector.broadcast %cst_14 : f32 to vector<8x128xf32>
      %17 = arith.maximumf %15, %16 : vector<8x128xf32>
      %c0_15 = arith.constant 0 : index
      %c0_16 = arith.constant 0 : index
      %18 = vector.load %arg6[%c0_15, %c0_16] : memref<8x128xf32, #tpu.memory_space<vmem>>, vector<8x128xf32>
      tpu.vector_store %arg6[%c0_15, %c0_16], %17 {strides = array<i32>} : memref<8x128xf32, #tpu.memory_space<vmem>>, vector<8x128xf32>,
    } else {
    }
    return
  }
  func.func @transform_0(%arg0: i32, %arg1: i32, %arg2: i32) -> (i32, i32) {
    %c0_i32 = arith.constant 0 : i32
    return %arg0, %arg2 : i32, i32
  }
  func.func @transform_1(%arg0: i32, %arg1: i32, %arg2: i32) -> (i32, i32) {
    %c0_i32 = arith.constant 0 : i32
    return %arg2, %arg1 : i32, i32
  }
  func.func @transform_2(%arg0: i32, %arg1: i32, %arg2: i32) -> (i32, i32) {
    %c0_i32 = arith.constant 0 : i32
    %c0_i32_0 = arith.constant 0 : i32
    return %c0_i32, %arg1 : i32, i32
  }
  func.func @transform_3(%arg0: i32, %arg1: i32, %arg2: i32) -> (i32, i32) {
    %c0_i32 = arith.constant 0 : i32
    return %arg0, %arg1 : i32, i32
  }
}

module attributes {stable_mosaic.version = 11 : i64} {
  func.func @_mm_kernel(%arg0: i32, %arg1: i32, %arg2: i32, %arg3: memref<8x128xbf16, #tpu.memory_space<vmem>>, %arg4: memref<128x128xbf16, #tpu.memory_space<vmem>>, %arg5: memref<1x128xf32, #tpu.memory_space<vmem>>, %arg6: memref<8x128xf32, #tpu.memory_space<vmem>>, %arg7: memref<8x128xf32, #tpu.memory_space<vmem>>) attributes {dimension_semantics = [#tpu.dimension_semantics<parallel>, #tpu.dimension_semantics<parallel>, #tpu.dimension_semantics<arbitrary>], iteration_bounds = array<i64: 1, 1, 1>, scalar_prefetch = 0 : i64, scratch_operands = 1 : i64, tpu.core_type = #tpu.core_type<tc>, window_params = [{transform_indices = @transform_0, window_bounds = array<i64: 8, 128>}, {transform_indices = @transform_1, window_bounds = array<i64: 128, 128>}, {transform_indices = @transform_2, window_bounds = array<i64: 1, 128>}, {transform_indices = @transform_3, window_bounds = array<i64: 8, 128>}]} {
    %c0_i32 = arith.constant 0 : i32
    %0 = arith.cmpi eq, %arg2, %c0_i32 : i32
    %1 = arith.extui %0 : i1 to i32
    %c0_i32_0 = arith.constant 0 : i32
    %2 = arith.cmpi ne, %1, %c0_i32_0 : i32
    scf.if %2 {
      %cst_10 = arith.constant 0.000000e+00 : f32
      %12 = vector.broadcast %cst_10 : f32 to vector<8x128xf32>
      %c0_11 = arith.constant 0 : index
      %c0_12 = arith.constant 0 : index
      %13 = vector.load %arg7[%c0_11, %c0_12] : memref<8x128xf32, #tpu.memory_space<vmem>>, vector<8x128xf32>
      tpu.vector_store %arg7[%c0_11, %c0_12], %12 {strides = array<i32>} : memref<8x128xf32, #tpu.memory_space<vmem>>, vector<8x128xf32>,
    } else {
    }
    %c0 = arith.constant 0 : index
    %c0_1 = arith.constant 0 : index
    %3 = vector.load %arg7[%c0, %c0_1] : memref<8x128xf32, #tpu.memory_space<vmem>>, vector<8x128xf32>
    %c0_2 = arith.constant 0 : index
    %c0_3 = arith.constant 0 : index
    %4 = vector.load %arg3[%c0_2, %c0_3] : memref<8x128xbf16, #tpu.memory_space<vmem>>, vector<8x128xbf16>
    %c0_4 = arith.constant 0 : index
    %c0_5 = arith.constant 0 : index
    %5 = vector.load %arg4[%c0_4, %c0_5] : memref<128x128xbf16, #tpu.memory_space<vmem>>, vector<128x128xbf16>
    %cst = arith.constant dense<0.000000e+00> : vector<8x128xf32>
    %6 = tpu.matmul %4, %5, %cst {dimension_numbers = #tpu.dot_dimension_numbers<[1], [0], [0], [1], [0, 0, 1, 1], [], []>} : vector<8x128xbf16>, vector<128x128xbf16>, vector<8x128xf32> -> vector<8x128xf32>
    %7 = arith.addf %3, %6 : vector<8x128xf32>
    %c0_6 = arith.constant 0 : index
    %c0_7 = arith.constant 0 : index
    %8 = vector.load %arg7[%c0_6, %c0_7] : memref<8x128xf32, #tpu.memory_space<vmem>>, vector<8x128xf32>
    tpu.vector_store %arg7[%c0_6, %c0_7], %7 {strides = array<i32>} : memref<8x128xf32, #tpu.memory_space<vmem>>, vector<8x128xf32>,
    %c0_i32_8 = arith.constant 0 : i32
    %9 = arith.cmpi eq, %arg2, %c0_i32_8 : i32
    %10 = arith.extui %9 : i1 to i32
    %c0_i32_9 = arith.constant 0 : i32
    %11 = arith.cmpi ne, %10, %c0_i32_9 : i32
    scf.if %11 {
      %c0_10 = arith.constant 0 : index
      %c0_11 = arith.constant 0 : index
      %12 = vector.load %arg7[%c0_10, %c0_11] : memref<8x128xf32, #tpu.memory_space<vmem>>, vector<8x128xf32>
      %c0_12 = arith.constant 0 : index
      %c0_13 = arith.constant 0 : index
      %13 = vector.load %arg5[%c0_12, %c0_13] : memref<1x128xf32, #tpu.memory_space<vmem>>, vector<1x128xf32>
      %14 = vector.broadcast %13 : vector<1x128xf32> to vector<8x128xf32>
      %15 = arith.addf %12, %14 : vector<8x128xf32>
      %c0_14 = arith.constant 0 : index
      %c0_15 = arith.constant 0 : index
      %16 = vector.load %arg6[%c0_14, %c0_15] : memref<8x128xf32, #tpu.memory_space<vmem>>, vector<8x128xf32>
      tpu.vector_store %arg6[%c0_14, %c0_15], %15 {strides = array<i32>} : memref<8x128xf32, #tpu.memory_space<vmem>>, vector<8x128xf32>,
    } else {
    }
    return
  }
  func.func @transform_0(%arg0: i32, %arg1: i32, %arg2: i32) -> (i32, i32) {
    %c0_i32 = arith.constant 0 : i32
    return %arg0, %arg2 : i32, i32
  }
  func.func @transform_1(%arg0: i32, %arg1: i32, %arg2: i32) -> (i32, i32) {
    %c0_i32 = arith.constant 0 : i32
    return %arg2, %arg1 : i32, i32
  }
  func.func @transform_2(%arg0: i32, %arg1: i32, %arg2: i32) -> (i32, i32) {
    %c0_i32 = arith.constant 0 : i32
    %c0_i32_0 = arith.constant 0 : i32
    return %c0_i32, %arg1 : i32, i32
  }
  func.func @transform_3(%arg0: i32, %arg1: i32, %arg2: i32) -> (i32, i32) {
    %c0_i32 = arith.constant 0 : i32
    return %arg0, %arg1 : i32, i32
  }
}

module attributes {stable_mosaic.version = 11 : i64} {
  func.func @_mm_res_kernel(%arg0: i32, %arg1: i32, %arg2: i32, %arg3: memref<8x384xbf16, #tpu.memory_space<vmem>>, %arg4: memref<384x128xbf16, #tpu.memory_space<vmem>>, %arg5: memref<1x128xf32, #tpu.memory_space<vmem>>, %arg6: memref<8x128xf32, #tpu.memory_space<vmem>>, %arg7: memref<8x128xf32, #tpu.memory_space<vmem>>, %arg8: memref<8x128xf32, #tpu.memory_space<vmem>>) attributes {dimension_semantics = [#tpu.dimension_semantics<parallel>, #tpu.dimension_semantics<parallel>, #tpu.dimension_semantics<arbitrary>], iteration_bounds = array<i64: 1, 1, 1>, scalar_prefetch = 0 : i64, scratch_operands = 1 : i64, tpu.core_type = #tpu.core_type<tc>, window_params = [{transform_indices = @transform_0, window_bounds = array<i64: 8, 384>}, {transform_indices = @transform_1, window_bounds = array<i64: 384, 128>}, {transform_indices = @transform_2, window_bounds = array<i64: 1, 128>}, {transform_indices = @transform_3, window_bounds = array<i64: 8, 128>}, {transform_indices = @transform_4, window_bounds = array<i64: 8, 128>}]} {
    %c0_i32 = arith.constant 0 : i32
    %0 = arith.cmpi eq, %arg2, %c0_i32 : i32
    %1 = arith.extui %0 : i1 to i32
    %c0_i32_0 = arith.constant 0 : i32
    %2 = arith.cmpi ne, %1, %c0_i32_0 : i32
    scf.if %2 {
      %cst_10 = arith.constant 0.000000e+00 : f32
      %12 = vector.broadcast %cst_10 : f32 to vector<8x128xf32>
      %c0_11 = arith.constant 0 : index
      %c0_12 = arith.constant 0 : index
      %13 = vector.load %arg8[%c0_11, %c0_12] : memref<8x128xf32, #tpu.memory_space<vmem>>, vector<8x128xf32>
      tpu.vector_store %arg8[%c0_11, %c0_12], %12 {strides = array<i32>} : memref<8x128xf32, #tpu.memory_space<vmem>>, vector<8x128xf32>,
    } else {
    }
    %c0 = arith.constant 0 : index
    %c0_1 = arith.constant 0 : index
    %3 = vector.load %arg8[%c0, %c0_1] : memref<8x128xf32, #tpu.memory_space<vmem>>, vector<8x128xf32>
    %c0_2 = arith.constant 0 : index
    %c0_3 = arith.constant 0 : index
    %4 = vector.load %arg3[%c0_2, %c0_3] : memref<8x384xbf16, #tpu.memory_space<vmem>>, vector<8x384xbf16>
    %c0_4 = arith.constant 0 : index
    %c0_5 = arith.constant 0 : index
    %5 = vector.load %arg4[%c0_4, %c0_5] : memref<384x128xbf16, #tpu.memory_space<vmem>>, vector<384x128xbf16>
    %cst = arith.constant dense<0.000000e+00> : vector<8x128xf32>
    %6 = tpu.matmul %4, %5, %cst {dimension_numbers = #tpu.dot_dimension_numbers<[1], [0], [0], [1], [0, 0, 1, 1], [], []>} : vector<8x384xbf16>, vector<384x128xbf16>, vector<8x128xf32> -> vector<8x128xf32>
    %7 = arith.addf %3, %6 : vector<8x128xf32>
    %c0_6 = arith.constant 0 : index
    %c0_7 = arith.constant 0 : index
    %8 = vector.load %arg8[%c0_6, %c0_7] : memref<8x128xf32, #tpu.memory_space<vmem>>, vector<8x128xf32>
    tpu.vector_store %arg8[%c0_6, %c0_7], %7 {strides = array<i32>} : memref<8x128xf32, #tpu.memory_space<vmem>>, vector<8x128xf32>,
    %c0_i32_8 = arith.constant 0 : i32
    %9 = arith.cmpi eq, %arg2, %c0_i32_8 : i32
    %10 = arith.extui %9 : i1 to i32
    %c0_i32_9 = arith.constant 0 : i32
    %11 = arith.cmpi ne, %10, %c0_i32_9 : i32
    scf.if %11 {
      %c0_10 = arith.constant 0 : index
      %c0_11 = arith.constant 0 : index
      %12 = vector.load %arg8[%c0_10, %c0_11] : memref<8x128xf32, #tpu.memory_space<vmem>>, vector<8x128xf32>
      %c0_12 = arith.constant 0 : index
      %c0_13 = arith.constant 0 : index
      %13 = vector.load %arg5[%c0_12, %c0_13] : memref<1x128xf32, #tpu.memory_space<vmem>>, vector<1x128xf32>
      %14 = vector.broadcast %13 : vector<1x128xf32> to vector<8x128xf32>
      %15 = arith.addf %12, %14 : vector<8x128xf32>
      %c0_14 = arith.constant 0 : index
      %c0_15 = arith.constant 0 : index
      %16 = vector.load %arg6[%c0_14, %c0_15] : memref<8x128xf32, #tpu.memory_space<vmem>>, vector<8x128xf32>
      %17 = arith.addf %15, %16 : vector<8x128xf32>
      %cst_16 = arith.constant 0.000000e+00 : f32
      %18 = vector.broadcast %cst_16 : f32 to vector<8x128xf32>
      %19 = arith.maximumf %17, %18 : vector<8x128xf32>
      %c0_17 = arith.constant 0 : index
      %c0_18 = arith.constant 0 : index
      %20 = vector.load %arg7[%c0_17, %c0_18] : memref<8x128xf32, #tpu.memory_space<vmem>>, vector<8x128xf32>
      tpu.vector_store %arg7[%c0_17, %c0_18], %19 {strides = array<i32>} : memref<8x128xf32, #tpu.memory_space<vmem>>, vector<8x128xf32>,
    } else {
    }
    return
  }
  func.func @transform_0(%arg0: i32, %arg1: i32, %arg2: i32) -> (i32, i32) {
    %c0_i32 = arith.constant 0 : i32
    return %arg0, %arg2 : i32, i32
  }
  func.func @transform_1(%arg0: i32, %arg1: i32, %arg2: i32) -> (i32, i32) {
    %c0_i32 = arith.constant 0 : i32
    return %arg2, %arg1 : i32, i32
  }
  func.func @transform_2(%arg0: i32, %arg1: i32, %arg2: i32) -> (i32, i32) {
    %c0_i32 = arith.constant 0 : i32
    %c0_i32_0 = arith.constant 0 : i32
    return %c0_i32, %arg1 : i32, i32
  }
  func.func @transform_3(%arg0: i32, %arg1: i32, %arg2: i32) -> (i32, i32) {
    %c0_i32 = arith.constant 0 : i32
    return %arg0, %arg1 : i32, i32
  }
  func.func @transform_4(%arg0: i32, %arg1: i32, %arg2: i32) -> (i32, i32) {
    %c0_i32 = arith.constant 0 : i32
    return %arg0, %arg1 : i32, i32
  }
}

module attributes {stable_mosaic.version = 11 : i64} {
  func.func @_mm_kernel(%arg0: i32, %arg1: i32, %arg2: i32, %arg3: memref<8x384xbf16, #tpu.memory_space<vmem>>, %arg4: memref<384x128xbf16, #tpu.memory_space<vmem>>, %arg5: memref<1x128xf32, #tpu.memory_space<vmem>>, %arg6: memref<8x128xf32, #tpu.memory_space<vmem>>, %arg7: memref<8x128xf32, #tpu.memory_space<vmem>>) attributes {dimension_semantics = [#tpu.dimension_semantics<parallel>, #tpu.dimension_semantics<parallel>, #tpu.dimension_semantics<arbitrary>], iteration_bounds = array<i64: 1, 1, 1>, scalar_prefetch = 0 : i64, scratch_operands = 1 : i64, tpu.core_type = #tpu.core_type<tc>, window_params = [{transform_indices = @transform_0, window_bounds = array<i64: 8, 384>}, {transform_indices = @transform_1, window_bounds = array<i64: 384, 128>}, {transform_indices = @transform_2, window_bounds = array<i64: 1, 128>}, {transform_indices = @transform_3, window_bounds = array<i64: 8, 128>}]} {
    %c0_i32 = arith.constant 0 : i32
    %0 = arith.cmpi eq, %arg2, %c0_i32 : i32
    %1 = arith.extui %0 : i1 to i32
    %c0_i32_0 = arith.constant 0 : i32
    %2 = arith.cmpi ne, %1, %c0_i32_0 : i32
    scf.if %2 {
      %cst_10 = arith.constant 0.000000e+00 : f32
      %12 = vector.broadcast %cst_10 : f32 to vector<8x128xf32>
      %c0_11 = arith.constant 0 : index
      %c0_12 = arith.constant 0 : index
      %13 = vector.load %arg7[%c0_11, %c0_12] : memref<8x128xf32, #tpu.memory_space<vmem>>, vector<8x128xf32>
      tpu.vector_store %arg7[%c0_11, %c0_12], %12 {strides = array<i32>} : memref<8x128xf32, #tpu.memory_space<vmem>>, vector<8x128xf32>,
    } else {
    }
    %c0 = arith.constant 0 : index
    %c0_1 = arith.constant 0 : index
    %3 = vector.load %arg7[%c0, %c0_1] : memref<8x128xf32, #tpu.memory_space<vmem>>, vector<8x128xf32>
    %c0_2 = arith.constant 0 : index
    %c0_3 = arith.constant 0 : index
    %4 = vector.load %arg3[%c0_2, %c0_3] : memref<8x384xbf16, #tpu.memory_space<vmem>>, vector<8x384xbf16>
    %c0_4 = arith.constant 0 : index
    %c0_5 = arith.constant 0 : index
    %5 = vector.load %arg4[%c0_4, %c0_5] : memref<384x128xbf16, #tpu.memory_space<vmem>>, vector<384x128xbf16>
    %cst = arith.constant dense<0.000000e+00> : vector<8x128xf32>
    %6 = tpu.matmul %4, %5, %cst {dimension_numbers = #tpu.dot_dimension_numbers<[1], [0], [0], [1], [0, 0, 1, 1], [], []>} : vector<8x384xbf16>, vector<384x128xbf16>, vector<8x128xf32> -> vector<8x128xf32>
    %7 = arith.addf %3, %6 : vector<8x128xf32>
    %c0_6 = arith.constant 0 : index
    %c0_7 = arith.constant 0 : index
    %8 = vector.load %arg7[%c0_6, %c0_7] : memref<8x128xf32, #tpu.memory_space<vmem>>, vector<8x128xf32>
    tpu.vector_store %arg7[%c0_6, %c0_7], %7 {strides = array<i32>} : memref<8x128xf32, #tpu.memory_space<vmem>>, vector<8x128xf32>,
    %c0_i32_8 = arith.constant 0 : i32
    %9 = arith.cmpi eq, %arg2, %c0_i32_8 : i32
    %10 = arith.extui %9 : i1 to i32
    %c0_i32_9 = arith.constant 0 : i32
    %11 = arith.cmpi ne, %10, %c0_i32_9 : i32
    scf.if %11 {
      %c0_10 = arith.constant 0 : index
      %c0_11 = arith.constant 0 : index
      %12 = vector.load %arg7[%c0_10, %c0_11] : memref<8x128xf32, #tpu.memory_space<vmem>>, vector<8x128xf32>
      %c0_12 = arith.constant 0 : index
      %c0_13 = arith.constant 0 : index
      %13 = vector.load %arg5[%c0_12, %c0_13] : memref<1x128xf32, #tpu.memory_space<vmem>>, vector<1x128xf32>
      %14 = vector.broadcast %13 : vector<1x128xf32> to vector<8x128xf32>
      %15 = arith.addf %12, %14 : vector<8x128xf32>
      %cst_14 = arith.constant 0.000000e+00 : f32
      %16 = vector.broadcast %cst_14 : f32 to vector<8x128xf32>
      %17 = arith.maximumf %15, %16 : vector<8x128xf32>
      %c0_15 = arith.constant 0 : index
      %c0_16 = arith.constant 0 : index
      %18 = vector.load %arg6[%c0_15, %c0_16] : memref<8x128xf32, #tpu.memory_space<vmem>>, vector<8x128xf32>
      tpu.vector_store %arg6[%c0_15, %c0_16], %17 {strides = array<i32>} : memref<8x128xf32, #tpu.memory_space<vmem>>, vector<8x128xf32>,
    } else {
    }
    return
  }
  func.func @transform_0(%arg0: i32, %arg1: i32, %arg2: i32) -> (i32, i32) {
    %c0_i32 = arith.constant 0 : i32
    return %arg0, %arg2 : i32, i32
  }
  func.func @transform_1(%arg0: i32, %arg1: i32, %arg2: i32) -> (i32, i32) {
    %c0_i32 = arith.constant 0 : i32
    return %arg2, %arg1 : i32, i32
  }
  func.func @transform_2(%arg0: i32, %arg1: i32, %arg2: i32) -> (i32, i32) {
    %c0_i32 = arith.constant 0 : i32
    %c0_i32_0 = arith.constant 0 : i32
    return %c0_i32, %arg1 : i32, i32
  }
  func.func @transform_3(%arg0: i32, %arg1: i32, %arg2: i32) -> (i32, i32) {
    %c0_i32 = arith.constant 0 : i32
    return %arg0, %arg1 : i32, i32
  }
}

module attributes {stable_mosaic.version = 11 : i64} {
  func.func @_mm_res_kernel(%arg0: i32, %arg1: i32, %arg2: i32, %arg3: memref<8x128xbf16, #tpu.memory_space<vmem>>, %arg4: memref<128x128xbf16, #tpu.memory_space<vmem>>, %arg5: memref<1x128xf32, #tpu.memory_space<vmem>>, %arg6: memref<8x128xf32, #tpu.memory_space<vmem>>, %arg7: memref<8x128xf32, #tpu.memory_space<vmem>>, %arg8: memref<8x128xf32, #tpu.memory_space<vmem>>) attributes {dimension_semantics = [#tpu.dimension_semantics<parallel>, #tpu.dimension_semantics<parallel>, #tpu.dimension_semantics<arbitrary>], iteration_bounds = array<i64: 1, 1, 5>, scalar_prefetch = 0 : i64, scratch_operands = 1 : i64, tpu.core_type = #tpu.core_type<tc>, window_params = [{transform_indices = @transform_0, window_bounds = array<i64: 8, 128>}, {transform_indices = @transform_1, window_bounds = array<i64: 128, 128>}, {transform_indices = @transform_2, window_bounds = array<i64: 1, 128>}, {transform_indices = @transform_3, window_bounds = array<i64: 8, 128>}, {transform_indices = @transform_4, window_bounds = array<i64: 8, 128>}]} {
    %c0_i32 = arith.constant 0 : i32
    %0 = arith.cmpi eq, %arg2, %c0_i32 : i32
    %1 = arith.extui %0 : i1 to i32
    %c0_i32_0 = arith.constant 0 : i32
    %2 = arith.cmpi ne, %1, %c0_i32_0 : i32
    scf.if %2 {
      %cst_9 = arith.constant 0.000000e+00 : f32
      %12 = vector.broadcast %cst_9 : f32 to vector<8x128xf32>
      %c0_10 = arith.constant 0 : index
      %c0_11 = arith.constant 0 : index
      %13 = vector.load %arg8[%c0_10, %c0_11] : memref<8x128xf32, #tpu.memory_space<vmem>>, vector<8x128xf32>
      tpu.vector_store %arg8[%c0_10, %c0_11], %12 {strides = array<i32>} : memref<8x128xf32, #tpu.memory_space<vmem>>, vector<8x128xf32>,
    } else {
    }
    %c0 = arith.constant 0 : index
    %c0_1 = arith.constant 0 : index
    %3 = vector.load %arg8[%c0, %c0_1] : memref<8x128xf32, #tpu.memory_space<vmem>>, vector<8x128xf32>
    %c0_2 = arith.constant 0 : index
    %c0_3 = arith.constant 0 : index
    %4 = vector.load %arg3[%c0_2, %c0_3] : memref<8x128xbf16, #tpu.memory_space<vmem>>, vector<8x128xbf16>
    %c0_4 = arith.constant 0 : index
    %c0_5 = arith.constant 0 : index
    %5 = vector.load %arg4[%c0_4, %c0_5] : memref<128x128xbf16, #tpu.memory_space<vmem>>, vector<128x128xbf16>
    %cst = arith.constant dense<0.000000e+00> : vector<8x128xf32>
    %6 = tpu.matmul %4, %5, %cst {dimension_numbers = #tpu.dot_dimension_numbers<[1], [0], [0], [1], [0, 0, 1, 1], [], []>} : vector<8x128xbf16>, vector<128x128xbf16>, vector<8x128xf32> -> vector<8x128xf32>
    %7 = arith.addf %3, %6 : vector<8x128xf32>
    %c0_6 = arith.constant 0 : index
    %c0_7 = arith.constant 0 : index
    %8 = vector.load %arg8[%c0_6, %c0_7] : memref<8x128xf32, #tpu.memory_space<vmem>>, vector<8x128xf32>
    tpu.vector_store %arg8[%c0_6, %c0_7], %7 {strides = array<i32>} : memref<8x128xf32, #tpu.memory_space<vmem>>, vector<8x128xf32>,
    %c4_i32 = arith.constant 4 : i32
    %9 = arith.cmpi eq, %arg2, %c4_i32 : i32
    %10 = arith.extui %9 : i1 to i32
    %c0_i32_8 = arith.constant 0 : i32
    %11 = arith.cmpi ne, %10, %c0_i32_8 : i32
    scf.if %11 {
      %c0_9 = arith.constant 0 : index
      %c0_10 = arith.constant 0 : index
      %12 = vector.load %arg8[%c0_9, %c0_10] : memref<8x128xf32, #tpu.memory_space<vmem>>, vector<8x128xf32>
      %c0_11 = arith.constant 0 : index
      %c0_12 = arith.constant 0 : index
      %13 = vector.load %arg5[%c0_11, %c0_12] : memref<1x128xf32, #tpu.memory_space<vmem>>, vector<1x128xf32>
      %14 = vector.broadcast %13 : vector<1x128xf32> to vector<8x128xf32>
      %15 = arith.addf %12, %14 : vector<8x128xf32>
      %c0_13 = arith.constant 0 : index
      %c0_14 = arith.constant 0 : index
      %16 = vector.load %arg6[%c0_13, %c0_14] : memref<8x128xf32, #tpu.memory_space<vmem>>, vector<8x128xf32>
      %17 = arith.addf %15, %16 : vector<8x128xf32>
      %cst_15 = arith.constant 0.000000e+00 : f32
      %18 = vector.broadcast %cst_15 : f32 to vector<8x128xf32>
      %19 = arith.maximumf %17, %18 : vector<8x128xf32>
      %c0_16 = arith.constant 0 : index
      %c0_17 = arith.constant 0 : index
      %20 = vector.load %arg7[%c0_16, %c0_17] : memref<8x128xf32, #tpu.memory_space<vmem>>, vector<8x128xf32>
      tpu.vector_store %arg7[%c0_16, %c0_17], %19 {strides = array<i32>} : memref<8x128xf32, #tpu.memory_space<vmem>>, vector<8x128xf32>,
    } else {
    }
    return
  }
  func.func @transform_0(%arg0: i32, %arg1: i32, %arg2: i32) -> (i32, i32) {
    %c0_i32 = arith.constant 0 : i32
    return %arg0, %arg2 : i32, i32
  }
  func.func @transform_1(%arg0: i32, %arg1: i32, %arg2: i32) -> (i32, i32) {
    %c0_i32 = arith.constant 0 : i32
    return %arg2, %arg1 : i32, i32
  }
  func.func @transform_2(%arg0: i32, %arg1: i32, %arg2: i32) -> (i32, i32) {
    %c0_i32 = arith.constant 0 : i32
    %c0_i32_0 = arith.constant 0 : i32
    return %c0_i32, %arg1 : i32, i32
  }
  func.func @transform_3(%arg0: i32, %arg1: i32, %arg2: i32) -> (i32, i32) {
    %c0_i32 = arith.constant 0 : i32
    return %arg0, %arg1 : i32, i32
  }
  func.func @transform_4(%arg0: i32, %arg1: i32, %arg2: i32) -> (i32, i32) {
    %c0_i32 = arith.constant 0 : i32
    return %arg0, %arg1 : i32, i32
  }
}

module attributes {stable_mosaic.version = 11 : i64} {
  func.func @_mm_kernel(%arg0: i32, %arg1: i32, %arg2: i32, %arg3: memref<8x128xbf16, #tpu.memory_space<vmem>>, %arg4: memref<128x128xbf16, #tpu.memory_space<vmem>>, %arg5: memref<1x128xf32, #tpu.memory_space<vmem>>, %arg6: memref<8x128xf32, #tpu.memory_space<vmem>>, %arg7: memref<8x128xf32, #tpu.memory_space<vmem>>) attributes {dimension_semantics = [#tpu.dimension_semantics<parallel>, #tpu.dimension_semantics<parallel>, #tpu.dimension_semantics<arbitrary>], iteration_bounds = array<i64: 1, 1, 5>, scalar_prefetch = 0 : i64, scratch_operands = 1 : i64, tpu.core_type = #tpu.core_type<tc>, window_params = [{transform_indices = @transform_0, window_bounds = array<i64: 8, 128>}, {transform_indices = @transform_1, window_bounds = array<i64: 128, 128>}, {transform_indices = @transform_2, window_bounds = array<i64: 1, 128>}, {transform_indices = @transform_3, window_bounds = array<i64: 8, 128>}]} {
    %c0_i32 = arith.constant 0 : i32
    %0 = arith.cmpi eq, %arg2, %c0_i32 : i32
    %1 = arith.extui %0 : i1 to i32
    %c0_i32_0 = arith.constant 0 : i32
    %2 = arith.cmpi ne, %1, %c0_i32_0 : i32
    scf.if %2 {
      %cst_9 = arith.constant 0.000000e+00 : f32
      %12 = vector.broadcast %cst_9 : f32 to vector<8x128xf32>
      %c0_10 = arith.constant 0 : index
      %c0_11 = arith.constant 0 : index
      %13 = vector.load %arg7[%c0_10, %c0_11] : memref<8x128xf32, #tpu.memory_space<vmem>>, vector<8x128xf32>
      tpu.vector_store %arg7[%c0_10, %c0_11], %12 {strides = array<i32>} : memref<8x128xf32, #tpu.memory_space<vmem>>, vector<8x128xf32>,
    } else {
    }
    %c0 = arith.constant 0 : index
    %c0_1 = arith.constant 0 : index
    %3 = vector.load %arg7[%c0, %c0_1] : memref<8x128xf32, #tpu.memory_space<vmem>>, vector<8x128xf32>
    %c0_2 = arith.constant 0 : index
    %c0_3 = arith.constant 0 : index
    %4 = vector.load %arg3[%c0_2, %c0_3] : memref<8x128xbf16, #tpu.memory_space<vmem>>, vector<8x128xbf16>
    %c0_4 = arith.constant 0 : index
    %c0_5 = arith.constant 0 : index
    %5 = vector.load %arg4[%c0_4, %c0_5] : memref<128x128xbf16, #tpu.memory_space<vmem>>, vector<128x128xbf16>
    %cst = arith.constant dense<0.000000e+00> : vector<8x128xf32>
    %6 = tpu.matmul %4, %5, %cst {dimension_numbers = #tpu.dot_dimension_numbers<[1], [0], [0], [1], [0, 0, 1, 1], [], []>} : vector<8x128xbf16>, vector<128x128xbf16>, vector<8x128xf32> -> vector<8x128xf32>
    %7 = arith.addf %3, %6 : vector<8x128xf32>
    %c0_6 = arith.constant 0 : index
    %c0_7 = arith.constant 0 : index
    %8 = vector.load %arg7[%c0_6, %c0_7] : memref<8x128xf32, #tpu.memory_space<vmem>>, vector<8x128xf32>
    tpu.vector_store %arg7[%c0_6, %c0_7], %7 {strides = array<i32>} : memref<8x128xf32, #tpu.memory_space<vmem>>, vector<8x128xf32>,
    %c4_i32 = arith.constant 4 : i32
    %9 = arith.cmpi eq, %arg2, %c4_i32 : i32
    %10 = arith.extui %9 : i1 to i32
    %c0_i32_8 = arith.constant 0 : i32
    %11 = arith.cmpi ne, %10, %c0_i32_8 : i32
    scf.if %11 {
      %c0_9 = arith.constant 0 : index
      %c0_10 = arith.constant 0 : index
      %12 = vector.load %arg7[%c0_9, %c0_10] : memref<8x128xf32, #tpu.memory_space<vmem>>, vector<8x128xf32>
      %c0_11 = arith.constant 0 : index
      %c0_12 = arith.constant 0 : index
      %13 = vector.load %arg5[%c0_11, %c0_12] : memref<1x128xf32, #tpu.memory_space<vmem>>, vector<1x128xf32>
      %14 = vector.broadcast %13 : vector<1x128xf32> to vector<8x128xf32>
      %15 = arith.addf %12, %14 : vector<8x128xf32>
      %cst_13 = arith.constant 0.000000e+00 : f32
      %16 = vector.broadcast %cst_13 : f32 to vector<8x128xf32>
      %17 = arith.maximumf %15, %16 : vector<8x128xf32>
      %c0_14 = arith.constant 0 : index
      %c0_15 = arith.constant 0 : index
      %18 = vector.load %arg6[%c0_14, %c0_15] : memref<8x128xf32, #tpu.memory_space<vmem>>, vector<8x128xf32>
      tpu.vector_store %arg6[%c0_14, %c0_15], %17 {strides = array<i32>} : memref<8x128xf32, #tpu.memory_space<vmem>>, vector<8x128xf32>,
    } else {
    }
    return
  }
  func.func @transform_0(%arg0: i32, %arg1: i32, %arg2: i32) -> (i32, i32) {
    %c0_i32 = arith.constant 0 : i32
    return %arg0, %arg2 : i32, i32
  }
  func.func @transform_1(%arg0: i32, %arg1: i32, %arg2: i32) -> (i32, i32) {
    %c0_i32 = arith.constant 0 : i32
    return %arg2, %arg1 : i32, i32
  }
  func.func @transform_2(%arg0: i32, %arg1: i32, %arg2: i32) -> (i32, i32) {
    %c0_i32 = arith.constant 0 : i32
    %c0_i32_0 = arith.constant 0 : i32
    return %c0_i32, %arg1 : i32, i32
  }
  func.func @transform_3(%arg0: i32, %arg1: i32, %arg2: i32) -> (i32, i32) {
    %c0_i32 = arith.constant 0 : i32
    return %arg0, %arg1 : i32, i32
  }
}

module attributes {stable_mosaic.version = 11 : i64} {
  func.func @_gru_seq_kernel(%arg0: i32, %arg1: memref<1x8x96xf32, #tpu.memory_space<vmem>>, %arg2: memref<32x96xf32, #tpu.memory_space<vmem>>, %arg3: memref<1x96xf32, #tpu.memory_space<vmem>>, %arg4: memref<1x8x32xf32, #tpu.memory_space<vmem>>, %arg5: memref<8x32xf32, #tpu.memory_space<vmem>>) attributes {dimension_semantics = [#tpu.dimension_semantics<arbitrary>], iteration_bounds = array<i64: 6>, scalar_prefetch = 0 : i64, scratch_operands = 1 : i64, tpu.core_type = #tpu.core_type<tc>, window_params = [{transform_indices = @transform_0, window_bounds = array<i64: 1, 8, 96>}, {pipeline_mode = #tpu.pipeline_mode<synchronous>, transform_indices = @transform_1, window_bounds = array<i64: 32, 96>}, {pipeline_mode = #tpu.pipeline_mode<synchronous>, transform_indices = @transform_2, window_bounds = array<i64: 1, 96>}, {transform_indices = @transform_3, window_bounds = array<i64: 1, 8, 32>}]} {
    %c0_i32 = arith.constant 0 : i32
    %0 = arith.cmpi eq, %arg0, %c0_i32 : i32
    %1 = arith.extui %0 : i1 to i32
    %c0_i32_0 = arith.constant 0 : i32
    %2 = arith.cmpi ne, %1, %c0_i32_0 : i32
    scf.if %2 {
      %cst_17 = arith.constant 0.000000e+00 : f32
      %41 = vector.broadcast %cst_17 : f32 to vector<8x32xf32>
      %c0_18 = arith.constant 0 : index
      %c0_19 = arith.constant 0 : index
      %42 = vector.load %arg5[%c0_18, %c0_19] : memref<8x32xf32, #tpu.memory_space<vmem>>, vector<8x32xf32>
      tpu.vector_store %arg5[%c0_18, %c0_19], %41 {strides = array<i32>} : memref<8x32xf32, #tpu.memory_space<vmem>>, vector<8x32xf32>,
    } else {
    }
    %c0 = arith.constant 0 : index
    %c0_1 = arith.constant 0 : index
    %3 = vector.load %arg5[%c0, %c0_1] : memref<8x32xf32, #tpu.memory_space<vmem>>, vector<8x32xf32>
    %c0_2 = arith.constant 0 : index
    %c0_3 = arith.constant 0 : index
    %4 = vector.load %arg2[%c0_2, %c0_3] : memref<32x96xf32, #tpu.memory_space<vmem>>, vector<32x96xf32>
    %cst = arith.constant dense<0.000000e+00> : vector<8x96xf32>
    %5 = tpu.matmul %3, %4, %cst {dimension_numbers = #tpu.dot_dimension_numbers<[1], [0], [0], [1], [0, 0, 1, 1], [], []>} : vector<8x32xf32>, vector<32x96xf32>, vector<8x96xf32> -> vector<8x96xf32>
    %c0_4 = arith.constant 0 : index
    %c0_5 = arith.constant 0 : index
    %6 = vector.load %arg3[%c0_4, %c0_5] : memref<1x96xf32, #tpu.memory_space<vmem>>, vector<1x96xf32>
    %7 = vector.broadcast %6 : vector<1x96xf32> to vector<8x96xf32>
    %8 = arith.addf %5, %7 : vector<8x96xf32>
    %c0_6 = arith.constant 0 : index
    %c0_7 = arith.constant 0 : index
    %c0_8 = arith.constant 0 : index
    %9 = vector.load %arg1[%c0_6, %c0_7, %c0_8] : memref<1x8x96xf32, #tpu.memory_space<vmem>>, vector<1x8x96xf32>
    %10 = vector.shape_cast %9 : vector<1x8x96xf32> to vector<8x96xf32>
    %11 = vector.extract_strided_slice %10 {offsets = [0, 0], sizes = [8, 32], strides = [1, 1]} : vector<8x96xf32> to vector<8x32xf32>
    %12 = vector.extract_strided_slice %8 {offsets = [0, 0], sizes = [8, 32], strides = [1, 1]} : vector<8x96xf32> to vector<8x32xf32>
    %13 = arith.addf %11, %12 : vector<8x32xf32>
    %14 = arith.negf %13 : vector<8x32xf32>
    %15 = math.exp %14 : vector<8x32xf32>
    %cst_9 = arith.constant 1.000000e+00 : f32
    %16 = vector.broadcast %cst_9 : f32 to vector<8x32xf32>
    %17 = arith.addf %16, %15 : vector<8x32xf32>
    %18 = arith.divf %16, %17 : vector<8x32xf32>
    %19 = vector.extract_strided_slice %10 {offsets = [0, 32], sizes = [8, 32], strides = [1, 1]} : vector<8x96xf32> to vector<8x32xf32>
    %20 = vector.extract_strided_slice %8 {offsets = [0, 32], sizes = [8, 32], strides = [1, 1]} : vector<8x96xf32> to vector<8x32xf32>
    %21 = arith.addf %19, %20 : vector<8x32xf32>
    %22 = arith.negf %21 : vector<8x32xf32>
    %23 = math.exp %22 : vector<8x32xf32>
    %cst_10 = arith.constant 1.000000e+00 : f32
    %24 = vector.broadcast %cst_10 : f32 to vector<8x32xf32>
    %25 = arith.addf %24, %23 : vector<8x32xf32>
    %26 = arith.divf %24, %25 : vector<8x32xf32>
    %27 = vector.extract_strided_slice %10 {offsets = [0, 64], sizes = [8, 32], strides = [1, 1]} : vector<8x96xf32> to vector<8x32xf32>
    %28 = vector.extract_strided_slice %8 {offsets = [0, 64], sizes = [8, 32], strides = [1, 1]} : vector<8x96xf32> to vector<8x32xf32>
    %29 = arith.mulf %18, %28 : vector<8x32xf32>
    %30 = arith.addf %27, %29 : vector<8x32xf32>
    %31 = math.tanh %30 : vector<8x32xf32>
    %cst_11 = arith.constant 1.000000e+00 : f32
    %32 = vector.broadcast %cst_11 : f32 to vector<8x32xf32>
    %33 = arith.subf %32, %26 : vector<8x32xf32>
    %34 = arith.mulf %33, %31 : vector<8x32xf32>
    %35 = arith.mulf %26, %3 : vector<8x32xf32>
    %36 = arith.addf %34, %35 : vector<8x32xf32>
    %c0_12 = arith.constant 0 : index
    %c0_13 = arith.constant 0 : index
    %37 = vector.load %arg5[%c0_12, %c0_13] : memref<8x32xf32, #tpu.memory_space<vmem>>, vector<8x32xf32>
    tpu.vector_store %arg5[%c0_12, %c0_13], %36 {strides = array<i32>} : memref<8x32xf32, #tpu.memory_space<vmem>>, vector<8x32xf32>,
    %c0_14 = arith.constant 0 : index
    %c0_15 = arith.constant 0 : index
    %c0_16 = arith.constant 0 : index
    %38 = vector.load %arg4[%c0_14, %c0_15, %c0_16] : memref<1x8x32xf32, #tpu.memory_space<vmem>>, vector<1x8x32xf32>
    %39 = vector.shape_cast %38 : vector<1x8x32xf32> to vector<8x32xf32>
    %40 = vector.shape_cast %36 : vector<8x32xf32> to vector<1x8x32xf32>
    tpu.vector_store %arg4[%c0_14, %c0_15, %c0_16], %40 {strides = array<i32>} : memref<1x8x32xf32, #tpu.memory_space<vmem>>, vector<1x8x32xf32>,
    return
  }
  func.func @transform_0(%arg0: i32) -> (i32, i32, i32) {
    %c0_i32 = arith.constant 0 : i32
    %c0_i32_0 = arith.constant 0 : i32
    %c0_i32_1 = arith.constant 0 : i32
    return %arg0, %c0_i32, %c0_i32_0 : i32, i32, i32
  }
  func.func @transform_1(%arg0: i32) -> (i32, i32) {
    %c0_i32 = arith.constant 0 : i32
    %c0_i32_0 = arith.constant 0 : i32
    %c0_i32_1 = arith.constant 0 : i32
    return %c0_i32, %c0_i32_0 : i32, i32
  }
  func.func @transform_2(%arg0: i32) -> (i32, i32) {
    %c0_i32 = arith.constant 0 : i32
    %c0_i32_0 = arith.constant 0 : i32
    %c0_i32_1 = arith.constant 0 : i32
    return %c0_i32, %c0_i32_0 : i32, i32
  }
  func.func @transform_3(%arg0: i32) -> (i32, i32, i32) {
    %c0_i32 = arith.constant 0 : i32
    %c0_i32_0 = arith.constant 0 : i32
    %c0_i32_1 = arith.constant 0 : i32
    return %arg0, %c0_i32, %c0_i32_0 : i32, i32, i32
  }
}

</mosaic_0001>

<bundles_post_ra>
// kernel: scnn_forward.35
= control target key start
LH: loop header
LB: loop body
LE: loop exit
PB: predicated region body
PF: predicated region fallthrough
CT: control target
= control target key end

     0   :  { %s421_s6 = smov 0   ;;  %s509_s0 = inlined_call_operand.vmem [shape: f32[6,10,10,8], index: 0, kind: input, shape index: {}]   ;;  %s510_s1 = inlined_call_operand.vmem [shape: f32[6,8,8,8], index: 1, kind: output, shape index: {}]  }
   0x1 LB: > { %s383_s7 = sadd.s32 4294967295, %s409_s6   ;;  %p387_p0 = scmp.ge.s32.totalorder %s409_s6, 1  ;;  %s409_s6 = sphi %s421_s6, %s11_s6  }
   0x2   : > { %p87_p1 = scmp.lt.s32.totalorder %s409_s6, 7 }
   0x4   : > { %p88_p2 = pnand %p387_p0, %p87_p1 }
   0x5   : > { %p107_p3 = scmp.lt.s32.totalorder (!%p88_p2), %s383_s7, 5 }
   0x6   : > { %91 = sbr.rel (%p88_p2) target bundleno = 60 (0x3c), region = 24 }
   0xb   : > { %s512_s7 = smov (!%p107_p3, %s383_s7), 5  ;;  %vm161_vm0 = vcmask 1046528   ;;  %vm202_vm1 = vcmask 1045504   ;;  %vm319_vm2 = vcmask 64512  }
   0xc   : > { %s394_s8 = smul.u32 160, %s512_s7  ;;  %s393_s12 = sshll.u32 %s512_s7, 6 }
   0xd   : > { %s474_s15 = scalar_lea.vmem %s510_s1, %s393_s12 }
   0xe   : > { %s435_s11 = scalar_lea.vmem %s509_s0, %s394_s8 }
   0xf   : > { %v117_v0 = vld [vmem:[%s435_s11] sm:$0xff]  ;;  %v118_v1 = vld [vmem:[%s435_s11 + $0x8] sm:$0x3]  ;;  %v119_v2 = vld [vmem:[%s435_s11 + $0x10] sm:$0xff] }
  0x10   : > { %v120_v3 = vld [vmem:[%s435_s11 + $0x18] sm:$0x3]  ;;  %v442_v4 = vld [vmem:[%s435_s11 + $0x20] sm:$0xff]  ;;  %v122_v5 = vld [vmem:[%s435_s11 + $0x28] sm:$0x3]  ;;  %v162_v6 = vrot.slane %v117_v0, 1 }
  0x11   : > { %v163_v7 = vrot.slane %v118_v1, 1  ;;  %v165_v8 = vrot.slane %v119_v2, 1  ;;  %v166_v9 = vrot.slane %v120_v3, 1  ;;  %v168_v10 = vrot.slane %v442_v4, 1  ;;  %v123_v11 = vld [vmem:[%s435_s11 + $0x30] sm:$0xff]  ;;  %v125_v25 = vld [vmem:[%s435_s11 + $0x40] sm:$0xff] }
  0x12   : > { %v169_v12 = vrot.slane %v122_v5, 1  ;;  %v203_v13 = vrot.slane %v117_v0, 2  ;;  %v204_v14 = vrot.slane %v118_v1, 2  ;;  %v206_v15 = vrot.slane %v119_v2, 2  ;;  %v124_v20 = vld [vmem:[%s435_s11 + $0x38] sm:$0x3] }
  0x13   : > { %v164_v16 = vsel %vm161_vm0, %v162_v6, %v163_v7  ;;  %v167_v17 = vsel %vm161_vm0, %v165_v8, %v166_v9  ;;  %v207_v18 = vrot.slane %v120_v3, 2  ;;  %v209_v19 = vrot.slane %v442_v4, 2  ;;  %v126_v26 = vld [vmem:[%s435_s11 + $0x48] sm:$0x3]  ;;  %v127_v43 = vld [vmem:[%s435_s11 + $0x50] sm:$0xff]  ;;  %v129_v60 = vld [vmem:[%s435_s11 + $0x60] sm:$0xff] }
  0x14   : > { %v170_v21 = vsel %vm161_vm0, %v168_v10, %v169_v12  ;;  %v194_v22 = vadd.f32 %v164_v16, %v117_v0  ;;  %v195_v23 = vadd.f32 %v167_v17, %v119_v2  ;;  %v205_v24 = vsel %vm202_vm1, %v203_v13, %v204_v14  ;;  %v128_v44 = vld [vmem:[%s435_s11 + $0x58] sm:$0x3]  ;;  %v130_v7 = vld [vmem:[%s435_s11 + $0x68] sm:$0x3] }
  0x15   : > { %v196_v27 = vadd.f32 %v170_v21, %v442_v4  ;;  %v208_v28 = vsel %vm202_vm1, %v206_v15, %v207_v18  ;;  %v210_v29 = vrot.slane %v122_v5, 2  ;;  %v171_v30 = vrot.slane %v123_v11, 1 }
  0x16   : > { %v235_v31 = vadd.f32 %v205_v24, %v194_v22  ;;  %v236_v32 = vadd.f32 %v208_v28, %v195_v23  ;;  %v172_v33 = vrot.slane %v124_v20, 1  ;;  %v212_v34 = vrot.slane %v123_v11, 2 }
  0x17   : > { %v211_v35 = vsel %vm202_vm1, %v209_v19, %v210_v29  ;;  %v213_v36 = vrot.slane %v124_v20, 2  ;;  %v174_v37 = vrot.slane %v125_v25, 1  ;;  %v175_v38 = vrot.slane %v126_v26, 1 }
  0x18   : > { %v237_v39 = vadd.f32 %v211_v35, %v196_v27  ;;  %v243_v40 = vadd.f32 %v235_v31, %v119_v2  ;;  %v244_v41 = vadd.f32 %v236_v32, %v442_v4  ;;  %v173_v42 = vsel %vm161_vm0, %v171_v30, %v172_v33 }
  0x19   : > { %v197_v45 = vadd.f32 %v173_v42, %v123_v11  ;;  %v214_v46 = vsel %vm202_vm1, %v212_v34, %v213_v36  ;;  %v176_v47 = vsel %vm161_vm0, %v174_v37, %v175_v38  ;;  %v215_v48 = vrot.slane %v125_v25, 2  ;;  %v133_v37 = vld [vmem:[%s435_s11 + $0x80] sm:$0xff] }
  0x1a   : > { %v245_v49 = vadd.f32 %v237_v39, %v123_v11  ;;  %v257_v50 = vadd.f32 %v243_v40, %v167_v17  ;;  %v258_v51 = vadd.f32 %v244_v41, %v170_v21  ;;  %v198_v52 = vadd.f32 %v176_v47, %v125_v25 }
  0x1b   : > { %v238_v53 = vadd.f32 %v214_v46, %v197_v45  ;;  %v216_v54 = vrot.slane %v126_v26, 2  ;;  %v177_v55 = vrot.slane %v127_v43, 1  ;;  %v178_v56 = vrot.slane %v128_v44, 1  ;;  %v131_v26 = vld [vmem:[%s435_s11 + $0x70] sm:$0xff] }
  0x1c   : > { %v269_v57 = vadd.f32 %v257_v50, %v208_v28  ;;  %v270_v58 = vadd.f32 %v258_v51, %v211_v35  ;;  %v259_v59 = vadd.f32 %v245_v49, %v173_v42  ;;  %v218_v61 = vrot.slane %v127_v43, 2  ;;  %v132_v28 = vld [vmem:[%s435_s11 + $0x78] sm:$0x3] }
  0x1d   : > { %v246_v62 = vadd.f32 %v238_v53, %v125_v25  ;;  %v217_v63 = vsel %vm202_vm1, %v215_v48, %v216_v54  ;;  %v179_v0 = vsel %vm161_vm0, %v177_v55, %v178_v56  ;;  %v219_v1 = vrot.slane %v128_v44, 2 }
  0x1e   : > { %v277_v2 = vadd.f32 %v269_v57, %v442_v4  ;;  %v271_v3 = vadd.f32 %v259_v59, %v214_v46  ;;  %v278_v5 = vadd.f32 %v270_v58, %v123_v11  ;;  %v239_v6 = vadd.f32 %v217_v63, %v198_v52 }
  0x1f   : > { %v260_v8 = vadd.f32 %v246_v62, %v176_v47  ;;  %v199_v9 = vadd.f32 %v179_v0, %v127_v43  ;;  %v220_v10 = vsel %vm202_vm1, %v218_v61, %v219_v1  ;;  %v180_v12 = vrot.slane %v129_v60, 1 }
  0x20   : > { %v291_v13 = vadd.f32 %v277_v2, %v170_v21  ;;  %v292_v14 = vadd.f32 %v278_v5, %v173_v42  ;;  %v247_v15 = vadd.f32 %v239_v6, %v127_v43  ;;  %v279_v16 = vadd.f32 %v271_v3, %v125_v25 }
  0x21   : > { %v272_v17 = vadd.f32 %v260_v8, %v217_v63  ;;  %v240_v18 = vadd.f32 %v220_v10, %v199_v9  ;;  %v181_v19 = vrot.slane %v130_v7, 1  ;;  %v221_v4 = vrot.slane %v129_v60, 2 }
  0x22   : > { %v303_v20 = vadd.f32 %v291_v13, %v211_v35  ;;  %v304_v11 = vadd.f32 %v292_v14, %v214_v46  ;;  %v293_v22 = vadd.f32 %v279_v16, %v176_v47  ;;  %v261_v23 = vadd.f32 %v247_v15, %v179_v0  ;;  %v134_v46 = vld [vmem:[%s435_s11 + $0x88] sm:$0x3] }
  0x23   : > { %v248_v21 = vadd.f32 %v240_v18, %v129_v60  ;;  %v280_v24 = vadd.f32 %v272_v17, %v127_v43  ;;  %v182_v25 = vsel %vm161_vm0, %v180_v12, %v181_v19  ;;  %v222_v27 = vrot.slane %v130_v7, 2 }
  0x24   : > { %v311_v29 = vmul.f32 0.11111111, %v303_v20  ;;  %v312_v30 = vmul.f32 0.11111111, %v304_v11  ;;  %v305_v31 = vadd.f32 %v293_v22, %v217_v63  ;;  %v273_v32 = vadd.f32 %v261_v23, %v220_v10  ;;  %v135_v63 = vld [vmem:[%s435_s11 + $0x90] sm:$0xff] }
  0x25   : > { %v294_v33 = vadd.f32 %v280_v24, %v179_v0  ;;  %v200_v34 = vadd.f32 %v182_v25, %v129_v60  ;;  %v223_v35 = vsel %vm202_vm1, %v221_v4, %v222_v27  ;;  %v262_v36 = vadd.f32 %v248_v21, %v182_v25  ;;  %v136_v0 = vld [vmem:[%s435_s11 + $0x98] sm:$0x3] }
  0x26   : > { %320 = vst.msk [vmem:[%s474_s15] sm:$0xff] %vm319_vm2, %v311_v29  ;;  %321 = vst.msk [vmem:[%s474_s15 + $0x8] sm:$0xff] %vm319_vm2, %v312_v30  ;;  %v313_v38 = vmul.f32 0.11111111, %v305_v31  ;;  %v281_v39 = vadd.f32 %v273_v32, %v129_v60  ;;  %v183_v40 = vrot.slane %v131_v26, 1  ;;  %v184_v41 = vrot.slane %v132_v28, 1 }
  0x27   : > { %v306_v42 = vadd.f32 %v294_v33, %v220_v10  ;;  %v241_v43 = vadd.f32 %v223_v35, %v200_v34  ;;  %v274_v44 = vadd.f32 %v262_v36, %v223_v35  ;;  %v224_v45 = vrot.slane %v131_v26, 2 }
  0x28   : > { %322 = vst.msk [vmem:[%s474_s15 + $0x10] sm:$0xff] %vm319_vm2, %v313_v38  ;;  %v295_v47 = vadd.f32 %v281_v39, %v182_v25  ;;  %v185_v48 = vsel %vm161_vm0, %v183_v40, %v184_v41  ;;  %v225_v49 = vrot.slane %v132_v28, 2  ;;  %v253_v50 = vrot.slane %v133_v37, 1 }
  0x29   : > { %v314_v51 = vmul.f32 0.11111111, %v306_v42  ;;  %v249_v52 = vadd.f32 %v241_v43, %v131_v26  ;;  %v201_v53 = vadd.f32 %v185_v48, %v131_v26  ;;  %v282_v54 = vadd.f32 %v274_v44, %v131_v26 }
  0x2a   : > { %v307_v55 = vadd.f32 %v295_v47, %v223_v35  ;;  %v226_v56 = vsel %vm202_vm1, %v224_v45, %v225_v49  ;;  %v254_v57 = vrot.slane %v134_v46, 1  ;;  %v265_v58 = vrot.slane %v133_v37, 2 }
  0x2b   : > { %323 = vst.msk [vmem:[%s474_s15 + $0x18] sm:$0xff] %vm319_vm2, %v314_v51  ;;  %v242_v59 = vadd.f32 %v226_v56, %v201_v53  ;;  %v263_v60 = vadd.f32 %v249_v52, %v185_v48  ;;  %v296_v61 = vadd.f32 %v282_v54, %v185_v48  ;;  %v266_v62 = vrot.slane %v134_v46, 2 }
  0x2c   : > { %v315_v1 = vmul.f32 0.11111111, %v307_v55  ;;  %v255_v2 = vsel %vm161_vm0, %v253_v50, %v254_v57  ;;  %v287_v8 = vrot.slane %v135_v63, 1  ;;  %v288_v9 = vrot.slane %v136_v0, 1 }
  0x2d   : > { %v275_v3 = vadd.f32 %v263_v60, %v226_v56  ;;  %v308_v5 = vadd.f32 %v296_v61, %v226_v56  ;;  %v250_v6 = vadd.f32 %v242_v59, %v133_v37  ;;  %v267_v7 = vsel %vm202_vm1, %v265_v58, %v266_v62 }
  0x2e   : > { %324 = vst.msk [vmem:[%s474_s15 + $0x20] sm:$0xff] %vm319_vm2, %v315_v1  ;;  %v299_v14 = vrot.slane %v135_v63, 2  ;;  %v300_v15 = vrot.slane %v136_v0, 2  ;;  %v289_v18 = vsel %vm161_vm0, %v287_v8, %v288_v9 }
  0x2f   : > { %v316_v10 = vmul.f32 0.11111111, %v308_v5  ;;  %v264_v12 = vadd.f32 %v255_v2, %v250_v6  ;;  %v283_v13 = vadd.f32 %v275_v3, %v133_v37 }
  0x30   : > { %v301_v20 = vsel %vm202_vm1, %v299_v14, %v300_v15 }
  0x31   : > { %325 = vst.msk [vmem:[%s474_s15 + $0x28] sm:$0xff] %vm319_vm2, %v316_v10  ;;  %v276_v16 = vadd.f32 %v267_v7, %v264_v12  ;;  %v297_v17 = vadd.f32 %v283_v13, %v255_v2 }
  0x33   : > { %v309_v19 = vadd.f32 %v297_v17, %v267_v7  ;;  %v284_v4 = vadd.f32 %v276_v16, %v135_v63 }
  0x35   : > { %v317_v11 = vmul.f32 0.11111111, %v309_v19  ;;  %v298_v22 = vadd.f32 %v289_v18, %v284_v4 }
  0x37   : > { %326 = vst.msk [vmem:[%s474_s15 + $0x30] sm:$0xff] %vm319_vm2, %v317_v11  ;;  %v310_v23 = vadd.f32 %v301_v20, %v298_v22 }
  0x39   : > { %v318_v21 = vmul.f32 0.11111111, %v310_v23 }
  0x3b   : > { %327 = vst.msk [vmem:[%s474_s15 + $0x38] sm:$0xff] %vm319_vm2, %v318_v21 }
  0x3c PF: > { %s11_s6 = sadd.s32 1, %s409_s6  }
  0x3d   : > { %p8_p4 = scmp.ge.s32.totalorder %s11_s6, 8  }
  0x3f   :  { %10 = sbr.rel (!%p8_p4) target bundleno = 1 (0x1), region = 54 }

// kernel: scnn_forward.34
= control target key start
LH: loop header
LB: loop body
LE: loop exit
PB: predicated region body
PF: predicated region fallthrough
CT: control target
= control target key end

     0   :  { %s1522_s12 = smov 0   ;;  %s1524_s13 = smov 0   ;;  %s1731_s0 = inlined_call_operand.vmem [shape: bf16[384,512], index: 0, kind: input, shape index: {}]   ;;  %s1732_s1 = inlined_call_operand.vmem [shape: bf16[512,128], index: 1, kind: input, shape index: {}]   ;;  %s1733_s2 = inlined_call_operand.vmem [shape: f32[1,128], index: 2, kind: input, shape index: {}]   ;;  %s1734_s3 = inlined_call_operand.vmem [shape: f32[384,128], index: 3, kind: output, shape index: {}]  }
   0x1   :  { %s1526_s14 = smov 0  }
   0x2 LB: > { %s32_s15 = sadd.s32 1, %s1496_s13  ;;  %p1172_p0 = scmp.ge.s32.totalorder %s1500_s14, 1  ;;  %s1500_s14 = sphi %s1526_s14, %s13_s14   ;;  %s1496_s13 = sphi %s1524_s13, %s1736_s13   ;;  %s1492_s12 = sphi %s1522_s12, %s1735_s12  }
   0x3   : > { %p34_p1 = scmp.ge.s32.totalorder %s32_s15, 3  ;;  %p191_p2 = scmp.lt.s32.totalorder %s1500_s14, 4 }
   0x5   : > { %s1738_s15 = smov (%p34_p1, %s32_s15), 0  ;;  %p192_p3 = pnand %p1172_p0, %p191_p2 }
   0x6   : > { %s1173_s25 = sshll.u32 (!%p192_p3), %s1492_s12, 4 }
   0x7   : > { %195 = sbr.rel (%p192_p3) target bundleno = 311 (0x137), region = 32  ;;  %p236_p4 = scmp.lt.s32.totalorder (!%p192_p3), %s1173_s25, 47 }
   0xc   : > { %v1398_v0 = vld [vmem:[%s1732_s1 + $0x78] sm:$0xff]   ;;  %v1402_v4 = vld [vmem:[%s1732_s1 + $0x70] sm:$0xff]   ;;  %v1406_v8 = vld [vmem:[%s1732_s1 + $0x68] sm:$0xff]   ;;  %s1740_s25 = smov (!%p236_p4, %s1173_s25), 47 }
   0xd   : > { %v1399_v1 = vld [vmem:[%s1732_s1 + $0xf8] sm:$0xff]   ;;  %1246 = vmatprep.subr.bf16.mxu0 %v1398_v0  ;;  %v1403_v5 = vld [vmem:[%s1732_s1 + $0xf0] sm:$0xff]   ;;  %v1407_v9 = vld [vmem:[%s1732_s1 + $0xe8] sm:$0xff]   ;;  %s1245_s24 = sshll.u32 %s1740_s25, 4  ;;  %s1177_s17 = sshll.u32 %s1740_s25, 3 }
   0xe   : > { %v1400_v2 = vld [vmem:[%s1732_s1 + $0x38] sm:$0xff]   ;;  %1310 = vmatprep.subr.bf16.mxu1 %v1399_v1  ;;  %v1404_v6 = vld [vmem:[%s1732_s1 + $0x30] sm:$0xff]   ;;  %v1408_v10 = vld [vmem:[%s1732_s1 + $0x28] sm:$0xff]   ;;  %s1639_s12 = scalar_lea.vmem %s1731_s0, %s1245_s24  ;;  %s1689_s20 = scalar_lea.vmem %s1734_s3, %s1177_s17 }
   0xf   : > { %v1401_v3 = vld [vmem:[%s1732_s1 + $0xb8] sm:$0xff]   ;;  %1247 = vmatpush3.bf16.msra.mxu0 %v1400_v2  ;;  %v1405_v7 = vld [vmem:[%s1732_s1 + $0xb0] sm:$0xff]   ;;  %v1409_v11 = vld [vmem:[%s1732_s1 + $0xa8] sm:$0xff]  }
  0x10   : > { %1311 = vmatpush3.bf16.msra.mxu1 %v1401_v3  ;;  %1248 = vmatprep.subr.bf16.mxu0 %v1402_v4  ;;  %v1410_v12 = vld [vmem:[%s1732_s1 + $0x60] sm:$0xff]   ;;  %v1414_v16 = vld [vmem:[%s1732_s1 + $0x58] sm:$0xff]   ;;  %v1418_v20 = vld [vmem:[%s1732_s1 + $0x50] sm:$0xff]  }
  0x11   : > { %1312 = vmatprep.subr.bf16.mxu1 %v1403_v5  ;;  %v1411_v13 = vld [vmem:[%s1732_s1 + $0xe0] sm:$0xff]   ;;  %v1415_v17 = vld [vmem:[%s1732_s1 + $0xd8] sm:$0xff]   ;;  %v1419_v21 = vld [vmem:[%s1732_s1 + $0xd0] sm:$0xff]  }
  0x12   : > { %v1412_v14 = vld [vmem:[%s1732_s1 + $0x20] sm:$0xff]   ;;  %v1416_v18 = vld [vmem:[%s1732_s1 + $0x18] sm:$0xff]   ;;  %v1420_v22 = vld [vmem:[%s1732_s1 + $0x10] sm:$0xff]  }
  0x13   : > { %1249 = vmatpush3.bf16.msra.mxu0 %v1404_v6  ;;  %v1413_v15 = vld [vmem:[%s1732_s1 + $0xa0] sm:$0xff]   ;;  %v1417_v19 = vld [vmem:[%s1732_s1 + $0x98] sm:$0xff]   ;;  %v1421_v23 = vld [vmem:[%s1732_s1 + $0x90] sm:$0xff]  }
  0x14   : > { %1313 = vmatpush3.bf16.msra.mxu1 %v1405_v7  ;;  %1250 = vmatprep.subr.bf16.mxu0 %v1406_v8  ;;  %v1422_v24 = vld [vmem:[%s1732_s1 + $0x48] sm:$0xff]   ;;  %v1426_v28 = vld [vmem:[%s1732_s1 + $0x40] sm:$0xff]  }
  0x15   : > { %1314 = vmatprep.subr.bf16.mxu1 %v1407_v9  ;;  %v1423_v25 = vld [vmem:[%s1732_s1 + $0xc8] sm:$0xff]   ;;  %v1427_v29 = vld [vmem:[%s1732_s1 + $0xc0] sm:$0xff]  }
  0x16   : > { %v1424_v26 = vld [vmem:[%s1732_s1 + $0x8] sm:$0xff]   ;;  %v1428_v30 = vld [vmem:[%s1732_s1] sm:$0xff]  }
  0x17   : > { %1251 = vmatpush3.bf16.msra.mxu0 %v1408_v10  ;;  %v1425_v27 = vld [vmem:[%s1732_s1 + $0x88] sm:$0xff]   ;;  %v1429_v31 = vld [vmem:[%s1732_s1 + $0x80] sm:$0xff]  }
  0x18   : > { %1315 = vmatpush3.bf16.msra.mxu1 %v1409_v11  ;;  %1252 = vmatprep.subr.bf16.mxu0 %v1410_v12  ;;  %v1430_v32 = vld [vmem:[%s1639_s12] ss:$16 sps:$4 sm:$0xff]   ;;  %v1432_v33 = vld [vmem:[%s1639_s12 + $0x4] ss:$16 sps:$4 sm:$0xff]   ;;  %v1433_v34 = vld [vmem:[%s1639_s12 + $0x8] ss:$16 sps:$4 sm:$0xff]  }
  0x19   : > { %1316 = vmatprep.subr.bf16.mxu1 %v1411_v13  ;;  %v1435_v35 = vld [vmem:[%s1639_s12 + $0xc] ss:$16 sps:$4 sm:$0xff]   ;;  %784 = vmatprep.mubr.bf16.mxu0 %v1432_v33  ;;  %v1436_v36 = vld [vmem:[%s1639_s12 + $0x24] ss:$16 sps:$4 sm:$0xff]   ;;  %v1440_v38 = vld [vmem:[%s1639_s12 + $0x20] ss:$16 sps:$4 sm:$0xff]  }
  0x1a   : > { %881 = vmatprep.mubr.bf16.mxu1 %v1435_v35  ;;  %v1438_v37 = vld [vmem:[%s1639_s12 + $0x2c] ss:$16 sps:$4 sm:$0xff]   ;;  %v1441_v39 = vld [vmem:[%s1639_s12 + $0x28] ss:$16 sps:$4 sm:$0xff]   ;;  %v1442_v40 = vld [vmem:[%s1639_s12 + $0x44] ss:$16 sps:$4 sm:$0xff]  }
  0x1b   : > { %1253 = vmatpush3.bf16.msra.mxu0 %v1412_v14  ;;  %v1444_v41 = vld [vmem:[%s1639_s12 + $0x4c] ss:$16 sps:$4 sm:$0xff]   ;;  %v1446_v42 = vld [vmem:[%s1639_s12 + $0x40] ss:$16 sps:$4 sm:$0xff]   ;;  %v1447_v43 = vld [vmem:[%s1639_s12 + $0x48] ss:$16 sps:$4 sm:$0xff]  }
  0x1c   : > { %1317 = vmatpush3.bf16.msra.mxu1 %v1413_v15  ;;  %1254 = vmatprep.subr.bf16.mxu0 %v1414_v16  ;;  %v1448_v44 = vld [vmem:[%s1639_s12 + $0x64] ss:$16 sps:$4 sm:$0xff]   ;;  %v1450_v45 = vld [vmem:[%s1639_s12 + $0x6c] ss:$16 sps:$4 sm:$0xff]   ;;  %v1452_v46 = vld [vmem:[%s1639_s12 + $0x60] ss:$16 sps:$4 sm:$0xff]  }
  0x1d   : > { %1318 = vmatprep.subr.bf16.mxu1 %v1415_v17  ;;  %v1453_v47 = vld [vmem:[%s1639_s12 + $0x68] ss:$16 sps:$4 sm:$0xff]   ;;  %v1454_v48 = vld [vmem:[%s1639_s12 + $0x84] ss:$16 sps:$4 sm:$0xff]   ;;  %v1456_v49 = vld [vmem:[%s1639_s12 + $0x8c] ss:$16 sps:$4 sm:$0xff]  }
  0x1e   : > { %v1458_v50 = vld [vmem:[%s1639_s12 + $0x80] ss:$16 sps:$4 sm:$0xff]   ;;  %v1459_v51 = vld [vmem:[%s1639_s12 + $0x88] ss:$16 sps:$4 sm:$0xff]   ;;  %v1460_v52 = vld [vmem:[%s1639_s12 + $0xa4] ss:$16 sps:$4 sm:$0xff]  }
  0x1f   : > { %1255 = vmatpush3.bf16.msra.mxu0 %v1416_v18  ;;  %v1462_v53 = vld [vmem:[%s1639_s12 + $0xac] ss:$16 sps:$4 sm:$0xff]   ;;  %v1464_v54 = vld [vmem:[%s1639_s12 + $0xa0] ss:$16 sps:$4 sm:$0xff]   ;;  %v1465_v55 = vld [vmem:[%s1639_s12 + $0xa8] ss:$16 sps:$4 sm:$0xff]  }
  0x20   : > { %1319 = vmatpush3.bf16.msra.mxu1 %v1417_v19  ;;  %1256 = vmatprep.subr.bf16.mxu0 %v1418_v20  ;;  %v1466_v56 = vld [vmem:[%s1639_s12 + $0xc4] ss:$16 sps:$4 sm:$0xff]   ;;  %v1468_v57 = vld [vmem:[%s1639_s12 + $0xcc] ss:$16 sps:$4 sm:$0xff]   ;;  %v1470_v58 = vld [vmem:[%s1639_s12 + $0xc0] ss:$16 sps:$4 sm:$0xff]  }
  0x21   : > { %1320 = vmatprep.subr.bf16.mxu1 %v1419_v21  ;;  %v1471_v59 = vld [vmem:[%s1639_s12 + $0xc8] ss:$16 sps:$4 sm:$0xff]   ;;  %v1472_v60 = vld [vmem:[%s1639_s12 + $0xe4] ss:$16 sps:$4 sm:$0xff]   ;;  %v1474_v61 = vld [vmem:[%s1639_s12 + $0xec] ss:$16 sps:$4 sm:$0xff]  }
  0x22   : > { %v1476_v62 = vld [vmem:[%s1639_s12 + $0xe0] ss:$16 sps:$4 sm:$0xff]   ;;  %v1477_v63 = vld [vmem:[%s1639_s12 + $0xe8] ss:$16 sps:$4 sm:$0xff]  }
  0x23   : > { %1257 = vmatpush3.bf16.msra.mxu0 %v1420_v22  ;;  %v1682_v7 = vld [vmem:[%s1733_s2] ss:$0 sm:$0xff] }
  0x24   : > { %1321 = vmatpush3.bf16.msra.mxu1 %v1421_v23  ;;  %1258 = vmatprep.subr.bf16.mxu0 %v1422_v24 }
  0x25   : > { %1322 = vmatprep.subr.bf16.mxu1 %v1423_v25 }
  0x27   : > { %1259 = vmatpush3.bf16.msra.mxu0 %v1424_v26 }
  0x28   : > { %1323 = vmatpush3.bf16.msra.mxu1 %v1425_v27  ;;  %1260 = vmatprep.subr.bf16.mxu0 %v1426_v28 }
  0x29   : > { %1324 = vmatprep.subr.bf16.mxu1 %v1427_v29 }
  0x2b   : > { %1261 = vmatpush3.bf16.msra.mxu0 %v1428_v30 }
  0x2c   : > { %1325 = vmatpush3.bf16.msra.mxu1 %v1429_v31 }
  0x2e   : > { %785 = vmatmul.mubr.bf16.vlgmr.msra.gmra.mxu0 %v1430_v32 }
  0x2f   : > { %882 = vmatmul.mubr.bf16.vlgmr.msra.gmra.mxu1 %v1433_v34  ;;  %792 = vmatprep.mubr.bf16.mxu0 %v1436_v36 }
  0x30   : > { %889 = vmatprep.mubr.bf16.mxu1 %v1438_v37 }
  0x36   : > { %793 = vmatmul.mubr.bf16.gmra.mxu0 %v1440_v38 }
  0x37   : > { %890 = vmatmul.mubr.bf16.gmra.mxu1 %v1441_v39  ;;  %800 = vmatprep.mubr.bf16.mxu0 %v1442_v40 }
  0x38   : > { %897 = vmatprep.mubr.bf16.mxu1 %v1444_v41 }
  0x3e   : > { %801 = vmatmul.mubr.bf16.gmra.mxu0 %v1446_v42 }
  0x3f   : > { %898 = vmatmul.mubr.bf16.gmra.mxu1 %v1447_v43  ;;  %808 = vmatprep.mubr.bf16.mxu0 %v1448_v44 }
  0x40   : > { %905 = vmatprep.mubr.bf16.mxu1 %v1450_v45 }
  0x46   : > { %809 = vmatmul.mubr.bf16.gmra.mxu0 %v1452_v46 }
  0x47   : > { %906 = vmatmul.mubr.bf16.gmra.mxu1 %v1453_v47  ;;  %816 = vmatprep.mubr.bf16.mxu0 %v1454_v48 }
  0x48   : > { %913 = vmatprep.mubr.bf16.mxu1 %v1456_v49 }
  0x4e   : > { %817 = vmatmul.mubr.bf16.gmra.mxu0 %v1458_v50 }
  0x4f   : > { %914 = vmatmul.mubr.bf16.gmra.mxu1 %v1459_v51  ;;  %824 = vmatprep.mubr.bf16.mxu0 %v1460_v52 }
  0x50   : > { %921 = vmatprep.mubr.bf16.mxu1 %v1462_v53 }
  0x56   : > { %825 = vmatmul.mubr.bf16.gmra.mxu0 %v1464_v54 }
  0x57   : > { %922 = vmatmul.mubr.bf16.gmra.mxu1 %v1465_v55  ;;  %832 = vmatprep.mubr.bf16.mxu0 %v1466_v56 }
  0x58   : > { %929 = vmatprep.mubr.bf16.mxu1 %v1468_v57 }
  0x5e   : > { %833 = vmatmul.mubr.bf16.gmra.mxu0 %v1470_v58 }
  0x5f   : > { %930 = vmatmul.mubr.bf16.gmra.mxu1 %v1471_v59  ;;  %840 = vmatprep.mubr.bf16.mxu0 %v1472_v60 }
  0x60   : > { %937 = vmatprep.mubr.bf16.mxu1 %v1474_v61 }
  0x66   : > { %841 = vmatmul.mubr.bf16.gmra.mxu0 %v1476_v62 }
  0x67   : > { %938 = vmatmul.mubr.bf16.gmra.mxu1 %v1477_v63 }
  0xee   : > { %v1262_v0 = vpop.f32.mrf.mxu0 }
  0xef   : > { %v1326_v1 = vpop.f32.mrf.mxu1 }
  0xf0   : > { %v1263_v2 = vpop.f32.mrf.mxu0 }
  0xf1   : > { %v1264_v3 = vadd.f32 %v1263_v2, %v1262_v0  ;;  %v1327_v4 = vpop.f32.mrf.mxu1 }
  0xf2   : > { %v1328_v5 = vadd.f32 %v1327_v4, %v1326_v1  ;;  %v1265_v6 = vpop.f32.mrf.mxu0 }
  0xf3   : > { %v1329_v8 = vpop.f32.mrf.mxu1 }
  0xf4   : > { %v884_v9 = vadd.f32 %v1328_v5, %v1264_v3  ;;  %v1266_v10 = vpop.f32.mrf.mxu0 }
  0xf5   : > { %v1267_v11 = vadd.f32 %v1266_v10, %v1265_v6  ;;  %v1330_v12 = vpop.f32.mrf.mxu1 }
  0xf6   : > { %v1004_v13 = vadd.f32 %v1682_v7, %v884_v9  ;;  %v1331_v14 = vadd.f32 %v1330_v12, %v1329_v8  ;;  %v1268_v15 = vpop.f32.mrf.mxu0 }
  0xf7   : > { %v1332_v16 = vpop.f32.mrf.mxu1 }
  0xf8   : > { %v1020_v17 = vmax.f32 %v1004_v13, 0.0  ;;  %v887_v18 = vadd.f32 %v1331_v14, %v1267_v11  ;;  %v1269_v19 = vpop.f32.mrf.mxu0 }
  0xf9   : > { %v1270_v20 = vadd.f32 %v1269_v19, %v1268_v15  ;;  %v1333_v21 = vpop.f32.mrf.mxu1 }
  0xfa   : > { %1036 = vst [vmem:[%s1689_s20] sm:$0xff] %v1020_v17  ;;  %v1005_v22 = vadd.f32 %v1682_v7, %v887_v18  ;;  %v1334_v23 = vadd.f32 %v1333_v21, %v1332_v16  ;;  %v1271_v24 = vpop.f32.mrf.mxu0 }
  0xfb   : > { %v1335_v25 = vpop.f32.mrf.mxu1 }
  0xfc   : > { %v1021_v26 = vmax.f32 %v1005_v22, 0.0  ;;  %v892_v27 = vadd.f32 %v1334_v23, %v1270_v20  ;;  %v1272_v28 = vpop.f32.mrf.mxu0 }
  0xfd   : > { %v1273_v29 = vadd.f32 %v1272_v28, %v1271_v24  ;;  %v1336_v30 = vpop.f32.mrf.mxu1 }
  0xfe   : > { %1037 = vst [vmem:[%s1689_s20 + $0x8] sm:$0xff] %v1021_v26  ;;  %v1006_v31 = vadd.f32 %v1682_v7, %v892_v27  ;;  %v1337_v32 = vadd.f32 %v1336_v30, %v1335_v25  ;;  %v1274_v33 = vpop.f32.mrf.mxu0 }
  0xff   : > { %v1338_v34 = vpop.f32.mrf.mxu1 }
 0x100   : > { %v1022_v35 = vmax.f32 %v1006_v31, 0.0  ;;  %v895_v36 = vadd.f32 %v1337_v32, %v1273_v29  ;;  %v1275_v37 = vpop.f32.mrf.mxu0 }
 0x101   : > { %v1276_v38 = vadd.f32 %v1275_v37, %v1274_v33  ;;  %v1339_v39 = vpop.f32.mrf.mxu1 }
 0x102   : > { %1038 = vst [vmem:[%s1689_s20 + $0x10] sm:$0xff] %v1022_v35  ;;  %v1007_v40 = vadd.f32 %v1682_v7, %v895_v36  ;;  %v1340_v41 = vadd.f32 %v1339_v39, %v1338_v34  ;;  %v1277_v42 = vpop.f32.mrf.mxu0 }
 0x103   : > { %v1341_v43 = vpop.f32.mrf.mxu1 }
 0x104   : > { %v1023_v44 = vmax.f32 %v1007_v40, 0.0  ;;  %v900_v45 = vadd.f32 %v1340_v41, %v1276_v38  ;;  %v1278_v46 = vpop.f32.mrf.mxu0 }
 0x105   : > { %v1279_v47 = vadd.f32 %v1278_v46, %v1277_v42  ;;  %v1342_v48 = vpop.f32.mrf.mxu1 }
 0x106   : > { %1039 = vst [vmem:[%s1689_s20 + $0x18] sm:$0xff] %v1023_v44  ;;  %v1008_v49 = vadd.f32 %v1682_v7, %v900_v45  ;;  %v1343_v50 = vadd.f32 %v1342_v48, %v1341_v43  ;;  %v1280_v51 = vpop.f32.mrf.mxu0 }
 0x107   : > { %v1344_v52 = vpop.f32.mrf.mxu1 }
 0x108   : > { %v1024_v53 = vmax.f32 %v1008_v49, 0.0  ;;  %v903_v54 = vadd.f32 %v1343_v50, %v1279_v47  ;;  %v1281_v55 = vpop.f32.mrf.mxu0 }
 0x109   : > { %v1282_v56 = vadd.f32 %v1281_v55, %v1280_v51  ;;  %v1345_v57 = vpop.f32.mrf.mxu1 }
 0x10a   : > { %1040 = vst [vmem:[%s1689_s20 + $0x20] sm:$0xff] %v1024_v53  ;;  %v1009_v58 = vadd.f32 %v1682_v7, %v903_v54  ;;  %v1346_v59 = vadd.f32 %v1345_v57, %v1344_v52  ;;  %v1283_v60 = vpop.f32.mrf.mxu0 }
 0x10b   : > { %v1347_v61 = vpop.f32.mrf.mxu1 }
 0x10c   : > { %v1025_v62 = vmax.f32 %v1009_v58, 0.0  ;;  %v908_v63 = vadd.f32 %v1346_v59, %v1282_v56  ;;  %v1284_v0 = vpop.f32.mrf.mxu0 }
 0x10d   : > { %v1285_v1 = vadd.f32 %v1284_v0, %v1283_v60  ;;  %v1348_v2 = vpop.f32.mrf.mxu1 }
 0x10e   : > { %1041 = vst [vmem:[%s1689_s20 + $0x28] sm:$0xff] %v1025_v62  ;;  %v1010_v3 = vadd.f32 %v1682_v7, %v908_v63  ;;  %v1349_v4 = vadd.f32 %v1348_v2, %v1347_v61  ;;  %v1286_v5 = vpop.f32.mrf.mxu0 }
 0x10f   : > { %v1350_v6 = vpop.f32.mrf.mxu1 }
 0x110   : > { %v1026_v8 = vmax.f32 %v1010_v3, 0.0  ;;  %v911_v9 = vadd.f32 %v1349_v4, %v1285_v1  ;;  %v1287_v10 = vpop.f32.mrf.mxu0 }
 0x111   : > { %v1288_v11 = vadd.f32 %v1287_v10, %v1286_v5  ;;  %v1351_v12 = vpop.f32.mrf.mxu1 }
 0x112   : > { %1042 = vst [vmem:[%s1689_s20 + $0x30] sm:$0xff] %v1026_v8  ;;  %v1011_v13 = vadd.f32 %v1682_v7, %v911_v9  ;;  %v1352_v14 = vadd.f32 %v1351_v12, %v1350_v6  ;;  %v1289_v15 = vpop.f32.mrf.mxu0 }
 0x113   : > { %v1353_v16 = vpop.f32.mrf.mxu1 }
 0x114   : > { %v1027_v17 = vmax.f32 %v1011_v13, 0.0  ;;  %v916_v18 = vadd.f32 %v1352_v14, %v1288_v11  ;;  %v1290_v19 = vpop.f32.mrf.mxu0 }
 0x115   : > { %v1291_v20 = vadd.f32 %v1290_v19, %v1289_v15  ;;  %v1354_v21 = vpop.f32.mrf.mxu1 }
 0x116   : > { %1043 = vst [vmem:[%s1689_s20 + $0x38] sm:$0xff] %v1027_v17  ;;  %v1012_v22 = vadd.f32 %v1682_v7, %v916_v18  ;;  %v1355_v23 = vadd.f32 %v1354_v21, %v1353_v16  ;;  %v1292_v24 = vpop.f32.mrf.mxu0 }
 0x117   : > { %v1356_v25 = vpop.f32.mrf.mxu1 }
 0x118   : > { %v1028_v26 = vmax.f32 %v1012_v22, 0.0  ;;  %v919_v27 = vadd.f32 %v1355_v23, %v1291_v20  ;;  %v1293_v28 = vpop.f32.mrf.mxu0 }
 0x119   : > { %v1294_v29 = vadd.f32 %v1293_v28, %v1292_v24  ;;  %v1357_v30 = vpop.f32.mrf.mxu1 }
 0x11a   : > { %1044 = vst [vmem:[%s1689_s20 + $0x40] sm:$0xff] %v1028_v26  ;;  %v1013_v31 = vadd.f32 %v1682_v7, %v919_v27  ;;  %v1358_v32 = vadd.f32 %v1357_v30, %v1356_v25  ;;  %v1295_v33 = vpop.f32.mrf.mxu0 }
 0x11b   : > { %v1359_v34 = vpop.f32.mrf.mxu1 }
 0x11c   : > { %v1029_v35 = vmax.f32 %v1013_v31, 0.0  ;;  %v924_v36 = vadd.f32 %v1358_v32, %v1294_v29  ;;  %v1296_v37 = vpop.f32.mrf.mxu0 }
 0x11d   : > { %v1297_v38 = vadd.f32 %v1296_v37, %v1295_v33  ;;  %v1360_v39 = vpop.f32.mrf.mxu1 }
 0x11e   : > { %1045 = vst [vmem:[%s1689_s20 + $0x48] sm:$0xff] %v1029_v35  ;;  %v1014_v40 = vadd.f32 %v1682_v7, %v924_v36  ;;  %v1361_v41 = vadd.f32 %v1360_v39, %v1359_v34  ;;  %v1298_v42 = vpop.f32.mrf.mxu0 }
 0x11f   : > { %v1362_v43 = vpop.f32.mrf.mxu1 }
 0x120   : > { %v1030_v44 = vmax.f32 %v1014_v40, 0.0  ;;  %v927_v45 = vadd.f32 %v1361_v41, %v1297_v38  ;;  %v1299_v46 = vpop.f32.mrf.mxu0 }
 0x121   : > { %v1300_v47 = vadd.f32 %v1299_v46, %v1298_v42  ;;  %v1363_v48 = vpop.f32.mrf.mxu1 }
 0x122   : > { %1046 = vst [vmem:[%s1689_s20 + $0x50] sm:$0xff] %v1030_v44  ;;  %v1015_v49 = vadd.f32 %v1682_v7, %v927_v45  ;;  %v1364_v50 = vadd.f32 %v1363_v48, %v1362_v43  ;;  %v1301_v51 = vpop.f32.mrf.mxu0 }
 0x123   : > { %v1365_v52 = vpop.f32.mrf.mxu1 }
 0x124   : > { %v1031_v53 = vmax.f32 %v1015_v49, 0.0  ;;  %v932_v54 = vadd.f32 %v1364_v50, %v1300_v47  ;;  %v1302_v55 = vpop.f32.mrf.mxu0 }
 0x125   : > { %v1303_v56 = vadd.f32 %v1302_v55, %v1301_v51  ;;  %v1366_v57 = vpop.f32.mrf.mxu1 }
 0x126   : > { %1047 = vst [vmem:[%s1689_s20 + $0x58] sm:$0xff] %v1031_v53  ;;  %v1016_v58 = vadd.f32 %v1682_v7, %v932_v54  ;;  %v1367_v59 = vadd.f32 %v1366_v57, %v1365_v52  ;;  %v1304_v60 = vpop.f32.mrf.mxu0 }
 0x127   : > { %v1368_v61 = vpop.f32.mrf.mxu1 }
 0x128   : > { %v1032_v62 = vmax.f32 %v1016_v58, 0.0  ;;  %v935_v63 = vadd.f32 %v1367_v59, %v1303_v56  ;;  %v1305_v0 = vpop.f32.mrf.mxu0 }
 0x129   : > { %v1306_v1 = vadd.f32 %v1305_v0, %v1304_v60  ;;  %v1369_v2 = vpop.f32.mrf.mxu1 }
 0x12a   : > { %1048 = vst [vmem:[%s1689_s20 + $0x60] sm:$0xff] %v1032_v62  ;;  %v1017_v3 = vadd.f32 %v1682_v7, %v935_v63  ;;  %v1370_v4 = vadd.f32 %v1369_v2, %v1368_v61  ;;  %v1307_v5 = vpop.f32.mrf.mxu0 }
 0x12b   : > { %v1371_v6 = vpop.f32.mrf.mxu1 }
 0x12c   : > { %v1033_v8 = vmax.f32 %v1017_v3, 0.0  ;;  %v940_v9 = vadd.f32 %v1370_v4, %v1306_v1  ;;  %v1308_v10 = vpop.f32.mrf.mxu0 }
 0x12d   : > { %v1309_v11 = vadd.f32 %v1308_v10, %v1307_v5  ;;  %v1372_v12 = vpop.f32.mrf.mxu1 }
 0x12e   : > { %1049 = vst [vmem:[%s1689_s20 + $0x68] sm:$0xff] %v1033_v8  ;;  %v1018_v13 = vadd.f32 %v1682_v7, %v940_v9  ;;  %v1373_v14 = vadd.f32 %v1372_v12, %v1371_v6 }
 0x130   : > { %v1034_v15 = vmax.f32 %v1018_v13, 0.0  ;;  %v943_v16 = vadd.f32 %v1373_v14, %v1309_v11 }
 0x132   : > { %1050 = vst [vmem:[%s1689_s20 + $0x70] sm:$0xff] %v1034_v15  ;;  %v1019_v17 = vadd.f32 %v1682_v7, %v943_v16 }
 0x134   : > { %v1035_v18 = vmax.f32 %v1019_v17, 0.0 }
 0x136   : > { %1051 = vst [vmem:[%s1689_s20 + $0x78] sm:$0xff] %v1035_v18 }
 0x137 PF: > { %s13_s14 = sadd.s32 1, %s1500_s14   ;;  %s1735_s12 = smov %s1496_s13 }
 0x138   : > { %p10_p5 = scmp.ge.s32.totalorder %s13_s14, 5   ;;  %s1736_s13 = smov %s1738_s15 }
 0x13a   :  { %12 = sbr.rel (!%p10_p5) target bundleno = 2 (0x2), region = 76 }

// kernel: scnn_forward.36
= control target key start
LH: loop header
LB: loop body
LE: loop exit
PB: predicated region body
PF: predicated region fallthrough
CT: control target
= control target key end

     0   :  { %s510_s1 = inlined_call_operand.vmem [shape: bf16[128,128], index: 1, kind: input, shape index: {}]   ;;  %s511_s0 = inlined_call_operand.vmem [shape: bf16[96,128], index: 0, kind: input, shape index: {}]   ;;  %s512_s2 = inlined_call_operand.vmem [shape: f32[1,128], index: 2, kind: input, shape index: {}]   ;;  %s513_s3 = inlined_call_operand.vmem [shape: f32[96,128], index: 3, kind: output, shape index: {}]  }
   0x1   :  { %v395_v0 = vld [vmem:[%s510_s1 + $0x38] sm:$0xff]   ;;  %v396_v1 = vld [vmem:[%s510_s1 + $0x30] sm:$0xff]   ;;  %v397_v2 = vld [vmem:[%s510_s1 + $0x28] sm:$0xff]  }
   0x2   :  { %379 = vmatprep.subr.bf16.mxu1 %v395_v0  ;;  %351 = vmatprep.subr.bf16.mxu0 %v395_v0  ;;  %v398_v3 = vld [vmem:[%s510_s1 + $0x20] sm:$0xff]   ;;  %v403_v4 = vld [vmem:[%s511_s0 + $0x10] sm:$0xff]   ;;  %v399_v6 = vld [vmem:[%s510_s1 + $0x18] sm:$0xff]  }
   0x3   :  { %387 = vmatpush3.bf16.msra.mxu1 %v395_v0  ;;  %352 = vmatpush3.bf16.msra.mxu0 %v395_v0  ;;  %v405_v5 = vld [vmem:[%s511_s0] sm:$0xff]   ;;  %v400_v7 = vld [vmem:[%s510_s1 + $0x10] sm:$0xff]   ;;  %v401_v8 = vld [vmem:[%s510_s1 + $0x8] sm:$0xff]  }
   0x4   :  { %380 = vmatprep.subr.bf16.mxu1 %v396_v1  ;;  %353 = vmatprep.subr.bf16.mxu0 %v396_v1  ;;  %v402_v9 = vld [vmem:[%s510_s1] sm:$0xff]   ;;  %v404_v10 = vld [vmem:[%s511_s0 + $0x18] sm:$0xff]   ;;  %v406_v11 = vld [vmem:[%s511_s0 + $0x8] sm:$0xff]  }
   0x5   :  { %371 = vmatprep.mubr.bf16.mxu1 %v403_v4  ;;  %367 = vmatprep.mubr.bf16.mxu0 %v405_v5  ;;  %v407_v12 = vld [vmem:[%s511_s0 + $0x20] sm:$0xff]   ;;  %v408_v13 = vld [vmem:[%s511_s0 + $0x28] sm:$0xff]  }
   0x6   :  { %v336_v14 = vld [vmem:[%s512_s2] ss:$0 sm:$0xff] }
   0x7   :  { %388 = vmatpush3.bf16.msra.mxu1 %v396_v1  ;;  %354 = vmatpush3.bf16.msra.mxu0 %v396_v1 }
   0x8   :  { %381 = vmatprep.subr.bf16.mxu1 %v397_v2  ;;  %355 = vmatprep.subr.bf16.mxu0 %v397_v2 }
   0xb   :  { %389 = vmatpush3.bf16.msra.mxu1 %v397_v2  ;;  %356 = vmatpush3.bf16.msra.mxu0 %v397_v2 }
   0xc   :  { %382 = vmatprep.subr.bf16.mxu1 %v398_v3  ;;  %357 = vmatprep.subr.bf16.mxu0 %v398_v3 }
   0xf   :  { %390 = vmatpush3.bf16.msra.mxu1 %v398_v3  ;;  %358 = vmatpush3.bf16.msra.mxu0 %v398_v3 }
  0x10   :  { %383 = vmatprep.subr.bf16.mxu1 %v399_v6  ;;  %359 = vmatprep.subr.bf16.mxu0 %v399_v6 }
  0x13   :  { %391 = vmatpush3.bf16.msra.mxu1 %v399_v6  ;;  %360 = vmatpush3.bf16.msra.mxu0 %v399_v6 }
  0x14   :  { %384 = vmatprep.subr.bf16.mxu1 %v400_v7  ;;  %361 = vmatprep.subr.bf16.mxu0 %v400_v7 }
  0x17   :  { %392 = vmatpush3.bf16.msra.mxu1 %v400_v7  ;;  %362 = vmatpush3.bf16.msra.mxu0 %v400_v7 }
  0x18   :  { %385 = vmatprep.subr.bf16.mxu1 %v401_v8  ;;  %363 = vmatprep.subr.bf16.mxu0 %v401_v8 }
  0x1b   :  { %393 = vmatpush3.bf16.msra.mxu1 %v401_v8  ;;  %364 = vmatpush3.bf16.msra.mxu0 %v401_v8 }
  0x1c   :  { %386 = vmatprep.subr.bf16.mxu1 %v402_v9  ;;  %365 = vmatprep.subr.bf16.mxu0 %v402_v9 }
  0x1f   :  { %394 = vmatpush3.bf16.msra.mxu1 %v402_v9  ;;  %366 = vmatpush3.bf16.msra.mxu0 %v402_v9 }
  0x22   :  { %372 = vmatmul.mubr.bf16.vlgmr.msra.gmra.mxu1 %v404_v10  ;;  %368 = vmatmul.mubr.bf16.vlgmr.msra.gmra.mxu0 %v406_v11 }
  0x23   :  { %375 = vmatprep.mubr.bf16.mxu1 %v407_v12 }
  0x2a   :  { %376 = vmatmul.mubr.bf16.gmra.mxu1 %v408_v13 }
  0xe2   :  { %v373_v15 = vpop.f32.mrf.mxu1  ;;  %v369_v16 = vpop.f32.mrf.mxu0 }
  0xe3   :  { %v288_v17 = vadd.f32 %v373_v15, %v336_v14  ;;  %v284_v18 = vadd.f32 %v369_v16, %v336_v14 }
  0xe4   :  { %v205_v19 = vpop.f32.mrf.mxu1  ;;  %v189_v20 = vpop.f32.mrf.mxu0 }
  0xe5   :  { %v300_v21 = vmax.f32 %v288_v17, 0.0  ;;  %v296_v22 = vmax.f32 %v284_v18, 0.0  ;;  %v286_v23 = vadd.f32 %v336_v14, %v205_v19  ;;  %v282_v24 = vadd.f32 %v336_v14, %v189_v20 }
  0xe6   :  { %v374_v25 = vpop.f32.mrf.mxu1  ;;  %v370_v26 = vpop.f32.mrf.mxu0 }
  0xe7   :  { %312 = vst [vmem:[%s513_s3 + $0x30] sm:$0xff] %v300_v21  ;;  %308 = vst [vmem:[%s513_s3 + $0x10] sm:$0xff] %v296_v22  ;;  %v298_v27 = vmax.f32 %v286_v23, 0.0  ;;  %v294_v28 = vmax.f32 %v282_v24, 0.0  ;;  %v289_v29 = vadd.f32 %v374_v25, %v336_v14  ;;  %v285_v30 = vadd.f32 %v370_v26, %v336_v14 }
  0xe8   :  { %v208_v31 = vpop.f32.mrf.mxu1  ;;  %v192_v32 = vpop.f32.mrf.mxu0 }
  0xe9   :  { %310 = vst [vmem:[%s513_s3 + $0x20] sm:$0xff] %v298_v27  ;;  %306 = vst [vmem:[%s513_s3] sm:$0xff] %v294_v28  ;;  %v301_v33 = vmax.f32 %v289_v29, 0.0  ;;  %v297_v34 = vmax.f32 %v285_v30, 0.0  ;;  %v287_v35 = vadd.f32 %v336_v14, %v208_v31  ;;  %v283_v36 = vadd.f32 %v336_v14, %v192_v32 }
  0xea   :  { %v377_v37 = vpop.f32.mrf.mxu1 }
  0xeb   :  { %313 = vst [vmem:[%s513_s3 + $0x38] sm:$0xff] %v301_v33  ;;  %309 = vst [vmem:[%s513_s3 + $0x18] sm:$0xff] %v297_v34  ;;  %v299_v38 = vmax.f32 %v287_v35, 0.0  ;;  %v295_v39 = vmax.f32 %v283_v36, 0.0  ;;  %v292_v40 = vadd.f32 %v377_v37, %v336_v14 }
  0xec   :  { %v221_v41 = vpop.f32.mrf.mxu1 }
  0xed   :  { %311 = vst [vmem:[%s513_s3 + $0x28] sm:$0xff] %v299_v38  ;;  %307 = vst [vmem:[%s513_s3 + $0x8] sm:$0xff] %v295_v39  ;;  %v304_v42 = vmax.f32 %v292_v40, 0.0  ;;  %v290_v43 = vadd.f32 %v336_v14, %v221_v41 }
  0xee   :  { %v378_v44 = vpop.f32.mrf.mxu1 }
  0xef   :  { %316 = vst [vmem:[%s513_s3 + $0x50] sm:$0xff] %v304_v42  ;;  %v302_v45 = vmax.f32 %v290_v43, 0.0  ;;  %v293_v46 = vadd.f32 %v378_v44, %v336_v14 }
  0xf0   :  { %v224_v47 = vpop.f32.mrf.mxu1 }
  0xf1   :  { %314 = vst [vmem:[%s513_s3 + $0x40] sm:$0xff] %v302_v45  ;;  %v305_v48 = vmax.f32 %v293_v46, 0.0  ;;  %v291_v49 = vadd.f32 %v336_v14, %v224_v47 }
  0xf3   :  { %317 = vst [vmem:[%s513_s3 + $0x58] sm:$0xff] %v305_v48  ;;  %v303_v50 = vmax.f32 %v291_v49, 0.0 }
  0xf5   :  { %315 = vst [vmem:[%s513_s3 + $0x48] sm:$0xff] %v303_v50 }

// kernel: scnn_forward.37
= control target key start
LH: loop header
LB: loop body
LE: loop exit
PB: predicated region body
PF: predicated region fallthrough
CT: control target
= control target key end

     0   :  { %s592_s1 = inlined_call_operand.vmem [shape: bf16[128,128], index: 1, kind: input, shape index: {}]   ;;  %s593_s0 = inlined_call_operand.vmem [shape: bf16[96,128], index: 0, kind: input, shape index: {}]   ;;  %s594_s2 = inlined_call_operand.vmem [shape: f32[1,128], index: 2, kind: input, shape index: {}]   ;;  %s595_s3 = inlined_call_operand.vmem [shape: f32[96,128], index: 3, kind: input, shape index: {}]   ;;  %s596_s4 = inlined_call_operand.vmem [shape: f32[96,128], index: 4, kind: output, shape index: {}]  }
   0x1   :  { %v422_v0 = vld [vmem:[%s592_s1 + $0x38] sm:$0xff]   ;;  %v423_v1 = vld [vmem:[%s592_s1 + $0x30] sm:$0xff]   ;;  %v424_v2 = vld [vmem:[%s592_s1 + $0x28] sm:$0xff]  }
   0x2   :  { %406 = vmatprep.subr.bf16.mxu1 %v422_v0  ;;  %378 = vmatprep.subr.bf16.mxu0 %v422_v0  ;;  %v425_v3 = vld [vmem:[%s592_s1 + $0x20] sm:$0xff]   ;;  %v430_v4 = vld [vmem:[%s593_s0 + $0x10] sm:$0xff]   ;;  %v426_v6 = vld [vmem:[%s592_s1 + $0x18] sm:$0xff]  }
   0x3   :  { %414 = vmatpush3.bf16.msra.mxu1 %v422_v0  ;;  %379 = vmatpush3.bf16.msra.mxu0 %v422_v0  ;;  %v432_v5 = vld [vmem:[%s593_s0] sm:$0xff]   ;;  %v427_v7 = vld [vmem:[%s592_s1 + $0x10] sm:$0xff]   ;;  %v428_v8 = vld [vmem:[%s592_s1 + $0x8] sm:$0xff]  }
   0x4   :  { %407 = vmatprep.subr.bf16.mxu1 %v423_v1  ;;  %380 = vmatprep.subr.bf16.mxu0 %v423_v1  ;;  %v429_v9 = vld [vmem:[%s592_s1] sm:$0xff]   ;;  %v431_v10 = vld [vmem:[%s593_s0 + $0x18] sm:$0xff]   ;;  %v433_v11 = vld [vmem:[%s593_s0 + $0x8] sm:$0xff]  }
   0x5   :  { %398 = vmatprep.mubr.bf16.mxu1 %v430_v4  ;;  %394 = vmatprep.mubr.bf16.mxu0 %v432_v5  ;;  %v434_v12 = vld [vmem:[%s593_s0 + $0x20] sm:$0xff]   ;;  %v435_v13 = vld [vmem:[%s593_s0 + $0x28] sm:$0xff]   ;;  %v303_v16 = vld [vmem:[%s595_s3 + $0x30] sm:$0xff] }
   0x6   :  { %v506_v14 = vld [vmem:[%s594_s2] ss:$0 sm:$0xff]  ;;  %v299_v18 = vld [vmem:[%s595_s3 + $0x10] sm:$0xff]  ;;  %v304_v35 = vld [vmem:[%s595_s3 + $0x38] sm:$0xff] }
   0x7   :  { %415 = vmatpush3.bf16.msra.mxu1 %v423_v1  ;;  %381 = vmatpush3.bf16.msra.mxu0 %v423_v1  ;;  %v301_v22 = vld [vmem:[%s595_s3 + $0x20] sm:$0xff]  ;;  %v300_v36 = vld [vmem:[%s595_s3 + $0x18] sm:$0xff]  ;;  %v302_v40 = vld [vmem:[%s595_s3 + $0x28] sm:$0xff] }
   0x8   :  { %408 = vmatprep.subr.bf16.mxu1 %v424_v2  ;;  %382 = vmatprep.subr.bf16.mxu0 %v424_v2  ;;  %v297_v24 = vld [vmem:[%s595_s3] sm:$0xff]  ;;  %v298_v42 = vld [vmem:[%s595_s3 + $0x8] sm:$0xff]  ;;  %v307_v50 = vld [vmem:[%s595_s3 + $0x50] sm:$0xff] }
   0x9   :  { %v305_v57 = vld [vmem:[%s595_s3 + $0x40] sm:$0xff]  ;;  %v308_v63 = vld [vmem:[%s595_s3 + $0x58] sm:$0xff]  ;;  %v306_v4 = vld [vmem:[%s595_s3 + $0x48] sm:$0xff] }
   0xb   :  { %416 = vmatpush3.bf16.msra.mxu1 %v424_v2  ;;  %383 = vmatpush3.bf16.msra.mxu0 %v424_v2 }
   0xc   :  { %409 = vmatprep.subr.bf16.mxu1 %v425_v3  ;;  %384 = vmatprep.subr.bf16.mxu0 %v425_v3 }
   0xf   :  { %417 = vmatpush3.bf16.msra.mxu1 %v425_v3  ;;  %385 = vmatpush3.bf16.msra.mxu0 %v425_v3 }
  0x10   :  { %410 = vmatprep.subr.bf16.mxu1 %v426_v6  ;;  %386 = vmatprep.subr.bf16.mxu0 %v426_v6 }
  0x13   :  { %418 = vmatpush3.bf16.msra.mxu1 %v426_v6  ;;  %387 = vmatpush3.bf16.msra.mxu0 %v426_v6 }
  0x14   :  { %411 = vmatprep.subr.bf16.mxu1 %v427_v7  ;;  %388 = vmatprep.subr.bf16.mxu0 %v427_v7 }
  0x17   :  { %419 = vmatpush3.bf16.msra.mxu1 %v427_v7  ;;  %389 = vmatpush3.bf16.msra.mxu0 %v427_v7 }
  0x18   :  { %412 = vmatprep.subr.bf16.mxu1 %v428_v8  ;;  %390 = vmatprep.subr.bf16.mxu0 %v428_v8 }
  0x1b   :  { %420 = vmatpush3.bf16.msra.mxu1 %v428_v8  ;;  %391 = vmatpush3.bf16.msra.mxu0 %v428_v8 }
  0x1c   :  { %413 = vmatprep.subr.bf16.mxu1 %v429_v9  ;;  %392 = vmatprep.subr.bf16.mxu0 %v429_v9 }
  0x1f   :  { %421 = vmatpush3.bf16.msra.mxu1 %v429_v9  ;;  %393 = vmatpush3.bf16.msra.mxu0 %v429_v9 }
  0x22   :  { %399 = vmatmul.mubr.bf16.vlgmr.msra.gmra.mxu1 %v431_v10  ;;  %395 = vmatmul.mubr.bf16.vlgmr.msra.gmra.mxu0 %v433_v11 }
  0x23   :  { %402 = vmatprep.mubr.bf16.mxu1 %v434_v12 }
  0x2a   :  { %403 = vmatmul.mubr.bf16.gmra.mxu1 %v435_v13 }
  0xe2   :  { %v400_v15 = vpop.f32.mrf.mxu1  ;;  %v396_v17 = vpop.f32.mrf.mxu0 }
  0xe3   :  { %v291_v19 = vadd.f32 %v400_v15, %v506_v14  ;;  %v287_v20 = vadd.f32 %v396_v17, %v506_v14 }
  0xe4   :  { %v208_v21 = vpop.f32.mrf.mxu1  ;;  %v192_v23 = vpop.f32.mrf.mxu0 }
  0xe5   :  { %v315_v25 = vadd.f32 %v303_v16, %v291_v19  ;;  %v311_v26 = vadd.f32 %v299_v18, %v287_v20  ;;  %v289_v27 = vadd.f32 %v506_v14, %v208_v21  ;;  %v285_v28 = vadd.f32 %v506_v14, %v192_v23 }
  0xe6   :  { %v401_v29 = vpop.f32.mrf.mxu1  ;;  %v397_v30 = vpop.f32.mrf.mxu0 }
  0xe7   :  { %v327_v31 = vmax.f32 %v315_v25, 0.0  ;;  %v323_v32 = vmax.f32 %v311_v26, 0.0  ;;  %v313_v33 = vadd.f32 %v301_v22, %v289_v27  ;;  %v309_v34 = vadd.f32 %v297_v24, %v285_v28 }
  0xe8   :  { %v292_v37 = vadd.f32 %v401_v29, %v506_v14  ;;  %v288_v38 = vadd.f32 %v397_v30, %v506_v14  ;;  %v211_v39 = vpop.f32.mrf.mxu1  ;;  %v195_v41 = vpop.f32.mrf.mxu0 }
  0xe9   :  { %339 = vst [vmem:[%s596_s4 + $0x30] sm:$0xff] %v327_v31  ;;  %335 = vst [vmem:[%s596_s4 + $0x10] sm:$0xff] %v323_v32  ;;  %v325_v43 = vmax.f32 %v313_v33, 0.0  ;;  %v321_v44 = vmax.f32 %v309_v34, 0.0  ;;  %v290_v45 = vadd.f32 %v506_v14, %v211_v39  ;;  %v286_v46 = vadd.f32 %v506_v14, %v195_v41 }
  0xea   :  { %v316_v47 = vadd.f32 %v304_v35, %v292_v37  ;;  %v312_v48 = vadd.f32 %v300_v36, %v288_v38  ;;  %v404_v49 = vpop.f32.mrf.mxu1 }
  0xeb   :  { %337 = vst [vmem:[%s596_s4 + $0x20] sm:$0xff] %v325_v43  ;;  %333 = vst [vmem:[%s596_s4] sm:$0xff] %v321_v44  ;;  %v314_v51 = vadd.f32 %v302_v40, %v290_v45  ;;  %v310_v52 = vadd.f32 %v298_v42, %v286_v46  ;;  %v295_v53 = vadd.f32 %v404_v49, %v506_v14 }
  0xec   :  { %v328_v54 = vmax.f32 %v316_v47, 0.0  ;;  %v324_v55 = vmax.f32 %v312_v48, 0.0  ;;  %v224_v56 = vpop.f32.mrf.mxu1 }
  0xed   :  { %v326_v58 = vmax.f32 %v314_v51, 0.0  ;;  %v322_v59 = vmax.f32 %v310_v52, 0.0  ;;  %v319_v60 = vadd.f32 %v307_v50, %v295_v53  ;;  %v293_v61 = vadd.f32 %v506_v14, %v224_v56 }
  0xee   :  { %340 = vst [vmem:[%s596_s4 + $0x38] sm:$0xff] %v328_v54  ;;  %336 = vst [vmem:[%s596_s4 + $0x18] sm:$0xff] %v324_v55  ;;  %v405_v62 = vpop.f32.mrf.mxu1 }
  0xef   :  { %338 = vst [vmem:[%s596_s4 + $0x28] sm:$0xff] %v326_v58  ;;  %334 = vst [vmem:[%s596_s4 + $0x8] sm:$0xff] %v322_v59  ;;  %v331_v0 = vmax.f32 %v319_v60, 0.0  ;;  %v317_v1 = vadd.f32 %v305_v57, %v293_v61  ;;  %v296_v2 = vadd.f32 %v405_v62, %v506_v14 }
  0xf0   :  { %v227_v3 = vpop.f32.mrf.mxu1 }
  0xf1   :  { %343 = vst [vmem:[%s596_s4 + $0x50] sm:$0xff] %v331_v0  ;;  %v329_v5 = vmax.f32 %v317_v1, 0.0  ;;  %v320_v6 = vadd.f32 %v308_v63, %v296_v2  ;;  %v294_v7 = vadd.f32 %v506_v14, %v227_v3 }
  0xf3   :  { %341 = vst [vmem:[%s596_s4 + $0x40] sm:$0xff] %v329_v5  ;;  %v332_v8 = vmax.f32 %v320_v6, 0.0  ;;  %v318_v9 = vadd.f32 %v306_v4, %v294_v7 }
  0xf5   :  { %344 = vst [vmem:[%s596_s4 + $0x58] sm:$0xff] %v332_v8  ;;  %v330_v10 = vmax.f32 %v318_v9, 0.0 }
  0xf7   :  { %342 = vst [vmem:[%s596_s4 + $0x48] sm:$0xff] %v330_v10 }

// kernel: scnn_forward.40
= control target key start
LH: loop header
LB: loop body
LE: loop exit
PB: predicated region body
PF: predicated region fallthrough
CT: control target
= control target key end

     0   :  { %s295_s1 = inlined_call_operand.vmem [shape: bf16[128,128], index: 1, kind: input, shape index: {}]   ;;  %s296_s0 = inlined_call_operand.vmem [shape: bf16[24,128], index: 0, kind: input, shape index: {}]   ;;  %s297_s2 = inlined_call_operand.vmem [shape: f32[1,128], index: 2, kind: input, shape index: {}]   ;;  %s298_s3 = inlined_call_operand.vmem [shape: f32[24,128], index: 3, kind: output, shape index: {}]  }
   0x1   :  { %v223_v0 = vld [vmem:[%s295_s1 + $0x38] sm:$0xff]   ;;  %v224_v1 = vld [vmem:[%s295_s1 + $0x30] sm:$0xff]   ;;  %v225_v2 = vld [vmem:[%s295_s1 + $0x28] sm:$0xff]  }
   0x2   :  { %203 = vmatprep.subr.bf16.mxu0 %v223_v0  ;;  %v226_v3 = vld [vmem:[%s295_s1 + $0x20] sm:$0xff]   ;;  %v227_v5 = vld [vmem:[%s295_s1 + $0x18] sm:$0xff]   ;;  %v228_v6 = vld [vmem:[%s295_s1 + $0x10] sm:$0xff]  }
   0x3   :  { %204 = vmatpush3.bf16.msra.mxu0 %v223_v0  ;;  %v231_v4 = vld [vmem:[%s296_s0] sm:$0xff]   ;;  %v229_v7 = vld [vmem:[%s295_s1 + $0x8] sm:$0xff]  }
   0x4   :  { %205 = vmatprep.subr.bf16.mxu0 %v224_v1  ;;  %219 = vmatprep.mubr.bf16.mxu0 %v231_v4  ;;  %v230_v8 = vld [vmem:[%s295_s1] sm:$0xff]   ;;  %v232_v9 = vld [vmem:[%s296_s0 + $0x8] ss:$0 sps:$4 sm:$0xff]  }
   0x5   :  { %v192_v10 = vld [vmem:[%s297_s2] ss:$0 sm:$0xff] }
   0x7   :  { %206 = vmatpush3.bf16.msra.mxu0 %v224_v1 }
   0x8   :  { %207 = vmatprep.subr.bf16.mxu0 %v225_v2 }
   0xb   :  { %208 = vmatpush3.bf16.msra.mxu0 %v225_v2 }
   0xc   :  { %209 = vmatprep.subr.bf16.mxu0 %v226_v3 }
   0xf   :  { %210 = vmatpush3.bf16.msra.mxu0 %v226_v3 }
  0x10   :  { %211 = vmatprep.subr.bf16.mxu0 %v227_v5 }
  0x13   :  { %212 = vmatpush3.bf16.msra.mxu0 %v227_v5 }
  0x14   :  { %213 = vmatprep.subr.bf16.mxu0 %v228_v6 }
  0x17   :  { %214 = vmatpush3.bf16.msra.mxu0 %v228_v6 }
  0x18   :  { %215 = vmatprep.subr.bf16.mxu0 %v229_v7 }
  0x1b   :  { %216 = vmatpush3.bf16.msra.mxu0 %v229_v7 }
  0x1c   :  { %217 = vmatprep.subr.bf16.mxu0 %v230_v8 }
  0x1f   :  { %218 = vmatpush3.bf16.msra.mxu0 %v230_v8 }
  0x22   :  { %220 = vmatmul.mubr.bf16.vlgmr.msra.gmra.mxu0 %v232_v9 }
  0xe2   :  { %v221_v11 = vpop.f32.mrf.mxu0 }
  0xe3   :  { %v171_v12 = vadd.f32 %v221_v11, %v192_v10 }
  0xe4   :  { %v136_v13 = vpop.f32.mrf.mxu0 }
  0xe5   :  { %v174_v14 = vmax.f32 %v171_v12, 0.0  ;;  %v169_v15 = vadd.f32 %v192_v10, %v136_v13 }
  0xe6   :  { %v222_v16 = vpop.f32.mrf.mxu0 }
  0xe7   :  { %177 = vst [vmem:[%s298_s3 + $0x10] sm:$0xff] %v174_v14  ;;  %v172_v17 = vmax.f32 %v169_v15, 0.0 }
  0xe8   :  { %v139_v18 = vpop.f32.mrf.mxu0 }
  0xe9   :  { %175 = vst [vmem:[%s298_s3] sm:$0xff] %v172_v17  ;;  %v170_v19 = vadd.f32 %v192_v10, %v139_v18 }
  0xeb   :  { %v173_v20 = vmax.f32 %v170_v19, 0.0 }
  0xed   :  { %176 = vst [vmem:[%s298_s3 + $0x8] sm:$0xff] %v173_v20 }

// kernel: scnn_forward.41
= control target key start
LH: loop header
LB: loop body
LE: loop exit
PB: predicated region body
PF: predicated region fallthrough
CT: control target
= control target key end

     0   :  { %s292_s1 = inlined_call_operand.vmem [shape: bf16[128,128], index: 1, kind: input, shape index: {}]   ;;  %s293_s0 = inlined_call_operand.vmem [shape: bf16[24,128], index: 0, kind: input, shape index: {}]   ;;  %s294_s2 = inlined_call_operand.vmem [shape: f32[1,128], index: 2, kind: input, shape index: {}]   ;;  %s295_s3 = inlined_call_operand.vmem [shape: f32[24,128], index: 3, kind: output, shape index: {}]  }
   0x1   :  { %v220_v0 = vld [vmem:[%s292_s1 + $0x38] sm:$0xff]   ;;  %v221_v1 = vld [vmem:[%s292_s1 + $0x30] sm:$0xff]   ;;  %v222_v2 = vld [vmem:[%s292_s1 + $0x28] sm:$0xff]  }
   0x2   :  { %200 = vmatprep.subr.bf16.mxu0 %v220_v0  ;;  %v223_v3 = vld [vmem:[%s292_s1 + $0x20] sm:$0xff]   ;;  %v224_v5 = vld [vmem:[%s292_s1 + $0x18] sm:$0xff]   ;;  %v225_v6 = vld [vmem:[%s292_s1 + $0x10] sm:$0xff]  }
   0x3   :  { %201 = vmatpush3.bf16.msra.mxu0 %v220_v0  ;;  %v228_v4 = vld [vmem:[%s293_s0] sm:$0xff]   ;;  %v226_v7 = vld [vmem:[%s292_s1 + $0x8] sm:$0xff]  }
   0x4   :  { %202 = vmatprep.subr.bf16.mxu0 %v221_v1  ;;  %216 = vmatprep.mubr.bf16.mxu0 %v228_v4  ;;  %v227_v8 = vld [vmem:[%s292_s1] sm:$0xff]   ;;  %v229_v9 = vld [vmem:[%s293_s0 + $0x8] ss:$0 sps:$4 sm:$0xff]  }
   0x5   :  { %v189_v10 = vld [vmem:[%s294_s2] ss:$0 sm:$0xff] }
   0x7   :  { %203 = vmatpush3.bf16.msra.mxu0 %v221_v1 }
   0x8   :  { %204 = vmatprep.subr.bf16.mxu0 %v222_v2 }
   0xb   :  { %205 = vmatpush3.bf16.msra.mxu0 %v222_v2 }
   0xc   :  { %206 = vmatprep.subr.bf16.mxu0 %v223_v3 }
   0xf   :  { %207 = vmatpush3.bf16.msra.mxu0 %v223_v3 }
  0x10   :  { %208 = vmatprep.subr.bf16.mxu0 %v224_v5 }
  0x13   :  { %209 = vmatpush3.bf16.msra.mxu0 %v224_v5 }
  0x14   :  { %210 = vmatprep.subr.bf16.mxu0 %v225_v6 }
  0x17   :  { %211 = vmatpush3.bf16.msra.mxu0 %v225_v6 }
  0x18   :  { %212 = vmatprep.subr.bf16.mxu0 %v226_v7 }
  0x1b   :  { %213 = vmatpush3.bf16.msra.mxu0 %v226_v7 }
  0x1c   :  { %214 = vmatprep.subr.bf16.mxu0 %v227_v8 }
  0x1f   :  { %215 = vmatpush3.bf16.msra.mxu0 %v227_v8 }
  0x22   :  { %217 = vmatmul.mubr.bf16.vlgmr.msra.gmra.mxu0 %v229_v9 }
  0xe2   :  { %v218_v11 = vpop.f32.mrf.mxu0 }
  0xe3   :  { %v171_v12 = vadd.f32 %v218_v11, %v189_v10 }
  0xe4   :  { %v136_v13 = vpop.f32.mrf.mxu0 }
  0xe5   :  { %174 = vst [vmem:[%s295_s3 + $0x10] sm:$0xff] %v171_v12  ;;  %v169_v14 = vadd.f32 %v189_v10, %v136_v13 }
  0xe6   :  { %v219_v15 = vpop.f32.mrf.mxu0 }
  0xe7   :  { %172 = vst [vmem:[%s295_s3] sm:$0xff] %v169_v14 }
  0xe8   :  { %v139_v16 = vpop.f32.mrf.mxu0 }
  0xe9   :  { %v170_v17 = vadd.f32 %v189_v10, %v139_v16 }
  0xeb   :  { %173 = vst [vmem:[%s295_s3 + $0x8] sm:$0xff] %v170_v17 }

// kernel: scnn_forward.42
= control target key start
LH: loop header
LB: loop body
LE: loop exit
PB: predicated region body
PF: predicated region fallthrough
CT: control target
= control target key end

     0   :  { %s451_s1 = inlined_call_operand.vmem [shape: bf16[256,128], index: 1, kind: input, shape index: {}]   ;;  %s452_s0 = inlined_call_operand.vmem [shape: bf16[24,256], index: 0, kind: input, shape index: {}]   ;;  %s453_s2 = inlined_call_operand.vmem [shape: f32[1,128], index: 2, kind: input, shape index: {}]   ;;  %s454_s3 = inlined_call_operand.vmem [shape: f32[24,128], index: 3, kind: input, shape index: {}]   ;;  %s455_s4 = inlined_call_operand.vmem [shape: f32[24,128], index: 4, kind: output, shape index: {}]  }
   0x1   :  { %v327_v0 = vld [vmem:[%s451_s1 + $0x78] sm:$0xff]   ;;  %v329_v2 = vld [vmem:[%s451_s1 + $0x70] sm:$0xff]   ;;  %v331_v4 = vld [vmem:[%s451_s1 + $0x68] sm:$0xff]  }
   0x2   :  { %v328_v1 = vld [vmem:[%s451_s1 + $0x38] sm:$0xff]   ;;  %283 = vmatprep.subr.bf16.mxu0 %v327_v0  ;;  %311 = vmatprep.subr.bf16.mxu1 %v327_v0  ;;  %v330_v3 = vld [vmem:[%s451_s1 + $0x30] sm:$0xff]   ;;  %v332_v5 = vld [vmem:[%s451_s1 + $0x28] sm:$0xff]  }
   0x3   :  { %284 = vmatpush3.bf16.msra.mxu0 %v328_v1  ;;  %319 = vmatpush3.bf16.msra.mxu1 %v328_v1  ;;  %v333_v6 = vld [vmem:[%s451_s1 + $0x60] sm:$0xff]   ;;  %v335_v8 = vld [vmem:[%s451_s1 + $0x58] sm:$0xff]   ;;  %v337_v10 = vld [vmem:[%s451_s1 + $0x50] sm:$0xff]  }
   0x4   :  { %285 = vmatprep.subr.bf16.mxu0 %v329_v2  ;;  %312 = vmatprep.subr.bf16.mxu1 %v329_v2  ;;  %v334_v7 = vld [vmem:[%s451_s1 + $0x20] sm:$0xff]   ;;  %v336_v9 = vld [vmem:[%s451_s1 + $0x18] sm:$0xff]   ;;  %v30_v12 = vld [vmem:[%s452_s0 + $0x10] sm:$0xff] }
   0x5   :  { %v345_v11 = vld [vmem:[%s452_s0 + $0x4] ss:$8 sps:$4 sm:$0xff]   ;;  %v265_v13 = vcombine.high %v30_v12, %v30_v12  ;;  %v338_v14 = vld [vmem:[%s451_s1 + $0x10] sm:$0xff]   ;;  %v343_v19 = vld [vmem:[%s452_s0] ss:$8 sps:$4 sm:$0xff]   ;;  %v264_v20 = vcombine.low %v30_v12, %v30_v12 }
   0x6   :  { %v339_v15 = vld [vmem:[%s451_s1 + $0x48] sm:$0xff]   ;;  %208 = vmatprep.mubr.bf16.mxu0 %v345_v11  ;;  %v341_v17 = vld [vmem:[%s451_s1 + $0x40] sm:$0xff]   ;;  %v248_v29 = vld [vmem:[%s454_s3 + $0x10] sm:$0xff] }
   0x7   :  { %286 = vmatpush3.bf16.msra.mxu0 %v330_v3  ;;  %320 = vmatpush3.bf16.msra.mxu1 %v330_v3  ;;  %v340_v16 = vld [vmem:[%s451_s1 + $0x8] sm:$0xff]   ;;  %v342_v18 = vld [vmem:[%s451_s1] sm:$0xff]  }
   0x8   :  { %287 = vmatprep.subr.bf16.mxu0 %v331_v4  ;;  %313 = vmatprep.subr.bf16.mxu1 %v331_v4  ;;  %v282_v24 = vld [vmem:[%s453_s2] ss:$0 sm:$0xff]  ;;  %v247_v39 = vld [vmem:[%s454_s3 + $0x8] sm:$0xff] }
   0x9   :  { %216 = vmatprep.mubr.bf16.mxu1 %v265_v13  ;;  %v246_v28 = vld [vmem:[%s454_s3] sm:$0xff] }
   0xb   :  { %288 = vmatpush3.bf16.msra.mxu0 %v332_v5  ;;  %321 = vmatpush3.bf16.msra.mxu1 %v332_v5 }
   0xc   :  { %289 = vmatprep.subr.bf16.mxu0 %v333_v6  ;;  %314 = vmatprep.subr.bf16.mxu1 %v333_v6 }
   0xf   :  { %290 = vmatpush3.bf16.msra.mxu0 %v334_v7  ;;  %322 = vmatpush3.bf16.msra.mxu1 %v334_v7 }
  0x10   :  { %291 = vmatprep.subr.bf16.mxu0 %v335_v8  ;;  %315 = vmatprep.subr.bf16.mxu1 %v335_v8 }
  0x13   :  { %292 = vmatpush3.bf16.msra.mxu0 %v336_v9  ;;  %323 = vmatpush3.bf16.msra.mxu1 %v336_v9 }
  0x14   :  { %293 = vmatprep.subr.bf16.mxu0 %v337_v10  ;;  %316 = vmatprep.subr.bf16.mxu1 %v337_v10 }
  0x17   :  { %294 = vmatpush3.bf16.msra.mxu0 %v338_v14  ;;  %324 = vmatpush3.bf16.msra.mxu1 %v338_v14 }
  0x18   :  { %295 = vmatprep.subr.bf16.mxu0 %v339_v15  ;;  %317 = vmatprep.subr.bf16.mxu1 %v339_v15 }
  0x1b   :  { %296 = vmatpush3.bf16.msra.mxu0 %v340_v16  ;;  %325 = vmatpush3.bf16.msra.mxu1 %v340_v16 }
  0x1c   :  { %297 = vmatprep.subr.bf16.mxu0 %v341_v17  ;;  %318 = vmatprep.subr.bf16.mxu1 %v341_v17 }
  0x1f   :  { %298 = vmatpush3.bf16.msra.mxu0 %v342_v18  ;;  %326 = vmatpush3.bf16.msra.mxu1 %v342_v18 }
  0x22   :  { %209 = vmatmul.mubr.bf16.vlgmr.msra.gmra.mxu0 %v343_v19  ;;  %217 = vmatmul.mubr.bf16.vlgmr.msra.gmra.mxu1 %v264_v20 }
  0xe2   :  { %v299_v21 = vpop.f32.mrf.mxu0  ;;  %v305_v22 = vpop.f32.mrf.mxu1 }
  0xe4   :  { %v300_v23 = vpop.f32.mrf.mxu0  ;;  %v306_v25 = vpop.f32.mrf.mxu1 }
  0xe5   :  { %v301_v26 = vadd.f32 %v300_v23, %v299_v21  ;;  %v307_v27 = vadd.f32 %v306_v25, %v305_v22 }
  0xe6   :  { %v302_v30 = vpop.f32.mrf.mxu0  ;;  %v308_v31 = vpop.f32.mrf.mxu1 }
  0xe7   :  { %v243_v32 = vadd.f32 %v301_v26, %v282_v24  ;;  %v245_v33 = vadd.f32 %v307_v27, %v282_v24 }
  0xe8   :  { %v303_v34 = vpop.f32.mrf.mxu0  ;;  %v309_v35 = vpop.f32.mrf.mxu1 }
  0xe9   :  { %v249_v36 = vadd.f32 %v246_v28, %v243_v32  ;;  %v251_v37 = vadd.f32 %v248_v29, %v245_v33  ;;  %v304_v38 = vadd.f32 %v303_v34, %v302_v30 }
  0xeb   :  { %v252_v40 = vmax.f32 %v249_v36, 0.0  ;;  %v254_v41 = vmax.f32 %v251_v37, 0.0  ;;  %v244_v42 = vadd.f32 %v304_v38, %v282_v24 }
  0xed   :  { %255 = vst [vmem:[%s455_s4] sm:$0xff] %v252_v40  ;;  %257 = vst [vmem:[%s455_s4 + $0x10] sm:$0xff] %v254_v41  ;;  %v250_v43 = vadd.f32 %v247_v39, %v244_v42 }
  0xef   :  { %v253_v44 = vmax.f32 %v250_v43, 0.0 }
  0xf1   :  { %256 = vst [vmem:[%s455_s4 + $0x8] sm:$0xff] %v253_v44 }

// kernel: scnn_forward.43
= control target key start
LH: loop header
LB: loop body
LE: loop exit
PB: predicated region body
PF: predicated region fallthrough
CT: control target
= control target key end

     0   :  { %s428_s1 = inlined_call_operand.vmem [shape: bf16[256,128], index: 1, kind: input, shape index: {}]   ;;  %s429_s0 = inlined_call_operand.vmem [shape: bf16[24,256], index: 0, kind: input, shape index: {}]   ;;  %s430_s2 = inlined_call_operand.vmem [shape: f32[1,128], index: 2, kind: input, shape index: {}]   ;;  %s431_s3 = inlined_call_operand.vmem [shape: f32[24,128], index: 3, kind: output, shape index: {}]  }
   0x1   :  { %v318_v0 = vld [vmem:[%s428_s1 + $0x78] sm:$0xff]   ;;  %v320_v2 = vld [vmem:[%s428_s1 + $0x70] sm:$0xff]   ;;  %v322_v4 = vld [vmem:[%s428_s1 + $0x68] sm:$0xff]  }
   0x2   :  { %v319_v1 = vld [vmem:[%s428_s1 + $0x38] sm:$0xff]   ;;  %274 = vmatprep.subr.bf16.mxu0 %v318_v0  ;;  %302 = vmatprep.subr.bf16.mxu1 %v318_v0  ;;  %v321_v3 = vld [vmem:[%s428_s1 + $0x30] sm:$0xff]   ;;  %v323_v5 = vld [vmem:[%s428_s1 + $0x28] sm:$0xff]  }
   0x3   :  { %275 = vmatpush3.bf16.msra.mxu0 %v319_v1  ;;  %310 = vmatpush3.bf16.msra.mxu1 %v319_v1  ;;  %v324_v6 = vld [vmem:[%s428_s1 + $0x60] sm:$0xff]   ;;  %v326_v8 = vld [vmem:[%s428_s1 + $0x58] sm:$0xff]   ;;  %v328_v10 = vld [vmem:[%s428_s1 + $0x50] sm:$0xff]  }
   0x4   :  { %276 = vmatprep.subr.bf16.mxu0 %v320_v2  ;;  %303 = vmatprep.subr.bf16.mxu1 %v320_v2  ;;  %v325_v7 = vld [vmem:[%s428_s1 + $0x20] sm:$0xff]   ;;  %v327_v9 = vld [vmem:[%s428_s1 + $0x18] sm:$0xff]   ;;  %v27_v12 = vld [vmem:[%s429_s0 + $0x10] sm:$0xff] }
   0x5   :  { %v336_v11 = vld [vmem:[%s429_s0 + $0x4] ss:$8 sps:$4 sm:$0xff]   ;;  %v256_v13 = vcombine.high %v27_v12, %v27_v12  ;;  %v329_v14 = vld [vmem:[%s428_s1 + $0x10] sm:$0xff]   ;;  %v334_v19 = vld [vmem:[%s429_s0] ss:$8 sps:$4 sm:$0xff]   ;;  %v255_v20 = vcombine.low %v27_v12, %v27_v12 }
   0x6   :  { %v330_v15 = vld [vmem:[%s428_s1 + $0x48] sm:$0xff]   ;;  %205 = vmatprep.mubr.bf16.mxu0 %v336_v11  ;;  %v332_v17 = vld [vmem:[%s428_s1 + $0x40] sm:$0xff]  }
   0x7   :  { %277 = vmatpush3.bf16.msra.mxu0 %v321_v3  ;;  %311 = vmatpush3.bf16.msra.mxu1 %v321_v3  ;;  %v331_v16 = vld [vmem:[%s428_s1 + $0x8] sm:$0xff]   ;;  %v333_v18 = vld [vmem:[%s428_s1] sm:$0xff]  }
   0x8   :  { %278 = vmatprep.subr.bf16.mxu0 %v322_v4  ;;  %304 = vmatprep.subr.bf16.mxu1 %v322_v4  ;;  %v273_v24 = vld [vmem:[%s430_s2] ss:$0 sm:$0xff] }
   0x9   :  { %213 = vmatprep.mubr.bf16.mxu1 %v256_v13 }
   0xb   :  { %279 = vmatpush3.bf16.msra.mxu0 %v323_v5  ;;  %312 = vmatpush3.bf16.msra.mxu1 %v323_v5 }
   0xc   :  { %280 = vmatprep.subr.bf16.mxu0 %v324_v6  ;;  %305 = vmatprep.subr.bf16.mxu1 %v324_v6 }
   0xf   :  { %281 = vmatpush3.bf16.msra.mxu0 %v325_v7  ;;  %313 = vmatpush3.bf16.msra.mxu1 %v325_v7 }
  0x10   :  { %282 = vmatprep.subr.bf16.mxu0 %v326_v8  ;;  %306 = vmatprep.subr.bf16.mxu1 %v326_v8 }
  0x13   :  { %283 = vmatpush3.bf16.msra.mxu0 %v327_v9  ;;  %314 = vmatpush3.bf16.msra.mxu1 %v327_v9 }
  0x14   :  { %284 = vmatprep.subr.bf16.mxu0 %v328_v10  ;;  %307 = vmatprep.subr.bf16.mxu1 %v328_v10 }
  0x17   :  { %285 = vmatpush3.bf16.msra.mxu0 %v329_v14  ;;  %315 = vmatpush3.bf16.msra.mxu1 %v329_v14 }
  0x18   :  { %286 = vmatprep.subr.bf16.mxu0 %v330_v15  ;;  %308 = vmatprep.subr.bf16.mxu1 %v330_v15 }
  0x1b   :  { %287 = vmatpush3.bf16.msra.mxu0 %v331_v16  ;;  %316 = vmatpush3.bf16.msra.mxu1 %v331_v16 }
  0x1c   :  { %288 = vmatprep.subr.bf16.mxu0 %v332_v17  ;;  %309 = vmatprep.subr.bf16.mxu1 %v332_v17 }
  0x1f   :  { %289 = vmatpush3.bf16.msra.mxu0 %v333_v18  ;;  %317 = vmatpush3.bf16.msra.mxu1 %v333_v18 }
  0x22   :  { %206 = vmatmul.mubr.bf16.vlgmr.msra.gmra.mxu0 %v334_v19  ;;  %214 = vmatmul.mubr.bf16.vlgmr.msra.gmra.mxu1 %v255_v20 }
  0xe2   :  { %v290_v21 = vpop.f32.mrf.mxu0  ;;  %v296_v22 = vpop.f32.mrf.mxu1 }
  0xe4   :  { %v291_v23 = vpop.f32.mrf.mxu0  ;;  %v297_v25 = vpop.f32.mrf.mxu1 }
  0xe5   :  { %v292_v26 = vadd.f32 %v291_v23, %v290_v21  ;;  %v298_v27 = vadd.f32 %v297_v25, %v296_v22 }
  0xe6   :  { %v293_v28 = vpop.f32.mrf.mxu0  ;;  %v299_v29 = vpop.f32.mrf.mxu1 }
  0xe7   :  { %v240_v30 = vadd.f32 %v292_v26, %v273_v24  ;;  %v242_v31 = vadd.f32 %v298_v27, %v273_v24 }
  0xe8   :  { %v294_v32 = vpop.f32.mrf.mxu0  ;;  %v300_v33 = vpop.f32.mrf.mxu1 }
  0xe9   :  { %v243_v34 = vmax.f32 %v240_v30, 0.0  ;;  %v245_v35 = vmax.f32 %v242_v31, 0.0  ;;  %v295_v36 = vadd.f32 %v294_v32, %v293_v28 }
  0xeb   :  { %246 = vst [vmem:[%s431_s3] sm:$0xff] %v243_v34  ;;  %248 = vst [vmem:[%s431_s3 + $0x10] sm:$0xff] %v245_v35  ;;  %v241_v37 = vadd.f32 %v295_v36, %v273_v24 }
  0xed   :  { %v244_v38 = vmax.f32 %v241_v37, 0.0 }
  0xef   :  { %247 = vst [vmem:[%s431_s3 + $0x8] sm:$0xff] %v244_v38 }

// kernel: scnn_forward.45
= control target key start
LH: loop header
LB: loop body
LE: loop exit
PB: predicated region body
PF: predicated region fallthrough
CT: control target
= control target key end

     0   :  { %s353_s1 = inlined_call_operand.vmem [shape: bf16[256,128], index: 1, kind: input, shape index: {}]   ;;  %s354_s0 = inlined_call_operand.vmem [shape: bf16[8,256], index: 0, kind: input, shape index: {}]   ;;  %s355_s2 = inlined_call_operand.vmem [shape: f32[1,128], index: 2, kind: input, shape index: {}]   ;;  %s356_s3 = inlined_call_operand.vmem [shape: f32[8,128], index: 3, kind: output, shape index: {}]  }
   0x1   :  { %v258_v0 = vld [vmem:[%s353_s1 + $0x78] sm:$0xff]   ;;  %v260_v2 = vld [vmem:[%s353_s1 + $0x70] sm:$0xff]   ;;  %v262_v4 = vld [vmem:[%s353_s1 + $0x68] sm:$0xff]  }
   0x2   :  { %v259_v1 = vld [vmem:[%s353_s1 + $0x38] sm:$0xff]   ;;  %236 = vmatprep.subr.bf16.mxu0 %v258_v0  ;;  %v261_v3 = vld [vmem:[%s353_s1 + $0x30] sm:$0xff]   ;;  %v263_v5 = vld [vmem:[%s353_s1 + $0x28] sm:$0xff]  }
   0x3   :  { %237 = vmatpush3.bf16.msra.mxu0 %v259_v1  ;;  %v264_v6 = vld [vmem:[%s353_s1 + $0x60] sm:$0xff]   ;;  %v266_v8 = vld [vmem:[%s353_s1 + $0x58] sm:$0xff]   ;;  %v268_v10 = vld [vmem:[%s353_s1 + $0x50] sm:$0xff]  }
   0x4   :  { %238 = vmatprep.subr.bf16.mxu0 %v260_v2  ;;  %v265_v7 = vld [vmem:[%s353_s1 + $0x20] sm:$0xff]   ;;  %v267_v9 = vld [vmem:[%s353_s1 + $0x18] sm:$0xff]   ;;  %v269_v13 = vld [vmem:[%s353_s1 + $0x10] sm:$0xff]  }
   0x5   :  { %v21_v11 = vld [vmem:[%s354_s0] sm:$0xff]  ;;  %v270_v14 = vld [vmem:[%s353_s1 + $0x48] sm:$0xff]  }
   0x6   :  { %v218_v12 = vcombine.high %v21_v11, %v21_v11  ;;  %v271_v15 = vld [vmem:[%s353_s1 + $0x8] sm:$0xff]   ;;  %v272_v16 = vld [vmem:[%s353_s1 + $0x40] sm:$0xff]   ;;  %v217_v18 = vcombine.low %v21_v11, %v21_v11 }
   0x7   :  { %239 = vmatpush3.bf16.msra.mxu0 %v261_v3  ;;  %v273_v17 = vld [vmem:[%s353_s1] sm:$0xff]  }
   0x8   :  { %240 = vmatprep.subr.bf16.mxu0 %v262_v4  ;;  %189 = vmatprep.mubr.bf16.mxu0 %v218_v12  ;;  %v235_v21 = vld [vmem:[%s355_s2] ss:$0 sm:$0xff] }
   0xb   :  { %241 = vmatpush3.bf16.msra.mxu0 %v263_v5 }
   0xc   :  { %242 = vmatprep.subr.bf16.mxu0 %v264_v6 }
   0xf   :  { %243 = vmatpush3.bf16.msra.mxu0 %v265_v7 }
  0x10   :  { %244 = vmatprep.subr.bf16.mxu0 %v266_v8 }
  0x13   :  { %245 = vmatpush3.bf16.msra.mxu0 %v267_v9 }
  0x14   :  { %246 = vmatprep.subr.bf16.mxu0 %v268_v10 }
  0x17   :  { %247 = vmatpush3.bf16.msra.mxu0 %v269_v13 }
  0x18   :  { %248 = vmatprep.subr.bf16.mxu0 %v270_v14 }
  0x1b   :  { %249 = vmatpush3.bf16.msra.mxu0 %v271_v15 }
  0x1c   :  { %250 = vmatprep.subr.bf16.mxu0 %v272_v16 }
  0x1f   :  { %251 = vmatpush3.bf16.msra.mxu0 %v273_v17 }
  0x22   :  { %190 = vmatmul.mubr.bf16.vlgmr.msra.gmra.mxu0 %v217_v18 }
  0xe2   :  { %v252_v19 = vpop.f32.mrf.mxu0 }
  0xe4   :  { %v253_v20 = vpop.f32.mrf.mxu0 }
  0xe5   :  { %v254_v22 = vadd.f32 %v253_v20, %v252_v19 }
  0xe6   :  { %v255_v23 = vpop.f32.mrf.mxu0 }
  0xe7   :  { %v210_v24 = vadd.f32 %v254_v22, %v235_v21 }
  0xe8   :  { %v256_v25 = vpop.f32.mrf.mxu0 }
  0xe9   :  { %v211_v26 = vmax.f32 %v210_v24, 0.0 }
  0xeb   :  { %212 = vst [vmem:[%s356_s3] sm:$0xff] %v211_v26 }

// kernel: scnn_forward.46
= control target key start
LH: loop header
LB: loop body
LE: loop exit
PB: predicated region body
PF: predicated region fallthrough
CT: control target
= control target key end

     0   :  { %v193_v0 = vmov 0.0   ;;  %vm194_vm0 = vmmov 0   ;;  %s248_s1 = inlined_call_operand.vmem [shape: bf16[128,128], index: 1, kind: input, shape index: {}]   ;;  %s249_s0 = inlined_call_operand.vmem [shape: bf16[8,128], index: 0, kind: input, shape index: {}]   ;;  %s250_s2 = inlined_call_operand.vmem [shape: f32[1,128], index: 2, kind: input, shape index: {}]   ;;  %s251_s3 = inlined_call_operand.vmem [shape: f32[8,128], index: 3, kind: output, shape index: {}]  }
   0x1   :  { %163 = vmatprep.subr.bf16.mxu0 %v193_v0  ;;  %v185_v1 = vld [vmem:[%s248_s1 + $0x38] sm:$0xff]   ;;  %179 = vmatprep.mubr.msk.bf16.mxu0 %vm194_vm0, %v193_v0  ;;  %v186_v2 = vld [vmem:[%s248_s1 + $0x30] sm:$0xff]   ;;  %v187_v3 = vld [vmem:[%s248_s1 + $0x28] sm:$0xff]  }
   0x2   :  { %164 = vmatpush3.bf16.msra.mxu0 %v185_v1  ;;  %v188_v4 = vld [vmem:[%s248_s1 + $0x20] sm:$0xff]   ;;  %v189_v5 = vld [vmem:[%s248_s1 + $0x18] sm:$0xff]   ;;  %v190_v6 = vld [vmem:[%s248_s1 + $0x10] sm:$0xff]  }
   0x3   :  { %165 = vmatprep.subr.bf16.mxu0 %v193_v0  ;;  %v191_v7 = vld [vmem:[%s248_s1 + $0x8] sm:$0xff]   ;;  %v192_v8 = vld [vmem:[%s248_s1] sm:$0xff]  }
   0x4   :  { %v21_v9 = vld [vmem:[%s249_s0] sm:$0xf] }
   0x5   :  { %v153_v10 = vld [vmem:[%s250_s2] ss:$0 sm:$0xff] }
   0x6   :  { %166 = vmatpush3.bf16.msra.mxu0 %v186_v2 }
   0x7   :  { %167 = vmatprep.subr.bf16.mxu0 %v193_v0 }
   0xa   :  { %168 = vmatpush3.bf16.msra.mxu0 %v187_v3 }
   0xb   :  { %169 = vmatprep.subr.bf16.mxu0 %v193_v0 }
   0xe   :  { %170 = vmatpush3.bf16.msra.mxu0 %v188_v4 }
   0xf   :  { %171 = vmatprep.subr.bf16.mxu0 %v193_v0 }
  0x12   :  { %172 = vmatpush3.bf16.msra.mxu0 %v189_v5 }
  0x13   :  { %173 = vmatprep.subr.bf16.mxu0 %v193_v0 }
  0x16   :  { %174 = vmatpush3.bf16.msra.mxu0 %v190_v6 }
  0x17   :  { %175 = vmatprep.subr.bf16.mxu0 %v193_v0 }
  0x1a   :  { %176 = vmatpush3.bf16.msra.mxu0 %v191_v7 }
  0x1b   :  { %177 = vmatprep.subr.bf16.mxu0 %v193_v0 }
  0x1e   :  { %178 = vmatpush3.bf16.msra.mxu0 %v192_v8 }
  0x21   :  { %180 = vmatmul.mubr.bf16.vlgmr.msra.gmra.mxu0 %v21_v9 }
  0xe1   :  { %v120_v11 = vpop.f32.mrf.mxu0 }
  0xe2   :  { %v139_v12 = vadd.f32 %v153_v10, %v120_v11 }
  0xe3   :  { %v181_v13 = vpop.f32.mrf.mxu0 }
  0xe4   :  { %140 = vst [vmem:[%s251_s3] sm:$0xff] %v139_v12 }
  0xe5   :  { %v123_v14 = vpop.f32.mrf.mxu0 }
  0xe7   :  { %v182_v15 = vpop.f32.mrf.mxu0 }

// kernel: scnn_forward.47
= control target key start
LH: loop header
LB: loop body
LE: loop exit
PB: predicated region body
PF: predicated region fallthrough
CT: control target
= control target key end

     0   :  { %v439_v0 = vmov 0.0   ;;  %vm440_vm0 = vmmov 0   ;;  %s553_s1 = inlined_call_operand.vmem [shape: bf16[384,128], index: 1, kind: input, shape index: {}]   ;;  %s554_s0 = inlined_call_operand.vmem [shape: bf16[8,384], index: 0, kind: input, shape index: {}]   ;;  %s555_s2 = inlined_call_operand.vmem [shape: f32[1,128], index: 2, kind: input, shape index: {}]   ;;  %s556_s3 = inlined_call_operand.vmem [shape: f32[8,128], index: 3, kind: input, shape index: {}]   ;;  %s557_s4 = inlined_call_operand.vmem [shape: f32[8,128], index: 4, kind: output, shape index: {}]  }
   0x1   :  { %390 = vmatprep.subr.bf16.mxu1 %v439_v0  ;;  %v412_v1 = vld [vmem:[%s553_s1 + $0x78] sm:$0xff]   ;;  %406 = vmatprep.mubr.msk.bf16.mxu1 %vm440_vm0, %v439_v0  ;;  %v415_v4 = vld [vmem:[%s553_s1 + $0x70] sm:$0xff]   ;;  %v418_v7 = vld [vmem:[%s553_s1 + $0x68] sm:$0xff]  }
   0x2   :  { %v413_v2 = vld [vmem:[%s553_s1 + $0xb8] sm:$0xff]   ;;  %359 = vmatprep.subr.bf16.mxu0 %v412_v1  ;;  %v416_v5 = vld [vmem:[%s553_s1 + $0xb0] sm:$0xff]   ;;  %v419_v8 = vld [vmem:[%s553_s1 + $0xa8] sm:$0xff]  }
   0x3   :  { %v414_v3 = vld [vmem:[%s553_s1 + $0x38] sm:$0xff]   ;;  %391 = vmatpush3.bf16.msra.mxu1 %v413_v2  ;;  %v417_v6 = vld [vmem:[%s553_s1 + $0x30] sm:$0xff]   ;;  %v420_v9 = vld [vmem:[%s553_s1 + $0x28] sm:$0xff]  }
   0x4   :  { %360 = vmatpush3.bf16.msra.mxu0 %v414_v3  ;;  %392 = vmatprep.subr.bf16.mxu1 %v439_v0  ;;  %v421_v10 = vld [vmem:[%s553_s1 + $0x60] sm:$0xff]   ;;  %v424_v13 = vld [vmem:[%s553_s1 + $0x58] sm:$0xff]   ;;  %v427_v16 = vld [vmem:[%s553_s1 + $0x50] sm:$0xff]  }
   0x5   :  { %361 = vmatprep.subr.bf16.mxu0 %v415_v4  ;;  %v422_v11 = vld [vmem:[%s553_s1 + $0xa0] sm:$0xff]   ;;  %v425_v14 = vld [vmem:[%s553_s1 + $0x98] sm:$0xff]   ;;  %v428_v17 = vld [vmem:[%s553_s1 + $0x90] sm:$0xff]  }
   0x6   :  { %v423_v12 = vld [vmem:[%s553_s1 + $0x20] sm:$0xff]   ;;  %v426_v15 = vld [vmem:[%s553_s1 + $0x18] sm:$0xff]   ;;  %v429_v18 = vld [vmem:[%s553_s1 + $0x10] sm:$0xff]  }
   0x7   :  { %393 = vmatpush3.bf16.msra.mxu1 %v416_v5  ;;  %v430_v19 = vld [vmem:[%s553_s1 + $0x48] sm:$0xff]   ;;  %v24_v22 = vld [vmem:[%s554_s0] sm:$0xff] }
   0x8   :  { %362 = vmatpush3.bf16.msra.mxu0 %v417_v6  ;;  %394 = vmatprep.subr.bf16.mxu1 %v439_v0  ;;  %v431_v20 = vld [vmem:[%s553_s1 + $0x88] sm:$0xff]   ;;  %v433_v23 = vld [vmem:[%s553_s1 + $0x40] sm:$0xff]   ;;  %v332_v24 = vcombine.high %v24_v22, %v24_v22  ;;  %v331_v28 = vcombine.low %v24_v22, %v24_v22 }
   0x9   :  { %363 = vmatprep.subr.bf16.mxu0 %v418_v7  ;;  %v432_v21 = vld [vmem:[%s553_s1 + $0x8] sm:$0xff]   ;;  %v434_v25 = vld [vmem:[%s553_s1 + $0x80] sm:$0xff]  }
   0xa   :  { %261 = vmatprep.mubr.bf16.mxu0 %v332_v24  ;;  %v435_v26 = vld [vmem:[%s553_s1] sm:$0xff]   ;;  %v438_v27 = vld [vmem:[%s554_s0 + $0x8] ss:$0 sps:$4 sm:$0xff]  }
   0xb   :  { %395 = vmatpush3.bf16.msra.mxu1 %v419_v8  ;;  %v358_v35 = vld [vmem:[%s555_s2] ss:$0 sm:$0xff] }
   0xc   :  { %364 = vmatpush3.bf16.msra.mxu0 %v420_v9  ;;  %396 = vmatprep.subr.bf16.mxu1 %v439_v0  ;;  %v323_v39 = vld [vmem:[%s556_s3] sm:$0xff] }
   0xd   :  { %365 = vmatprep.subr.bf16.mxu0 %v421_v10 }
   0xf   :  { %397 = vmatpush3.bf16.msra.mxu1 %v422_v11 }
  0x10   :  { %366 = vmatpush3.bf16.msra.mxu0 %v423_v12  ;;  %398 = vmatprep.subr.bf16.mxu1 %v439_v0 }
  0x11   :  { %367 = vmatprep.subr.bf16.mxu0 %v424_v13 }
  0x13   :  { %399 = vmatpush3.bf16.msra.mxu1 %v425_v14 }
  0x14   :  { %368 = vmatpush3.bf16.msra.mxu0 %v426_v15  ;;  %400 = vmatprep.subr.bf16.mxu1 %v439_v0 }
  0x15   :  { %369 = vmatprep.subr.bf16.mxu0 %v427_v16 }
  0x17   :  { %401 = vmatpush3.bf16.msra.mxu1 %v428_v17 }
  0x18   :  { %370 = vmatpush3.bf16.msra.mxu0 %v429_v18  ;;  %402 = vmatprep.subr.bf16.mxu1 %v439_v0 }
  0x19   :  { %371 = vmatprep.subr.bf16.mxu0 %v430_v19 }
  0x1b   :  { %403 = vmatpush3.bf16.msra.mxu1 %v431_v20 }
  0x1c   :  { %372 = vmatpush3.bf16.msra.mxu0 %v432_v21  ;;  %404 = vmatprep.subr.bf16.mxu1 %v439_v0 }
  0x1d   :  { %373 = vmatprep.subr.bf16.mxu0 %v433_v23 }
  0x1f   :  { %405 = vmatpush3.bf16.msra.mxu1 %v434_v25 }
  0x20   :  { %374 = vmatpush3.bf16.msra.mxu0 %v435_v26 }
  0x22   :  { %407 = vmatmul.mubr.bf16.vlgmr.msra.gmra.mxu1 %v438_v27 }
  0x23   :  { %262 = vmatmul.mubr.bf16.vlgmr.msra.gmra.mxu0 %v331_v28 }
  0xe2   :  { %v303_v29 = vpop.f32.mrf.mxu1 }
  0xe3   :  { %v375_v30 = vpop.f32.mrf.mxu0 }
  0xe4   :  { %v408_v31 = vpop.f32.mrf.mxu1 }
  0xe5   :  { %v376_v32 = vpop.f32.mrf.mxu0 }
  0xe6   :  { %v377_v33 = vadd.f32 %v376_v32, %v375_v30  ;;  %v306_v34 = vpop.f32.mrf.mxu1 }
  0xe7   :  { %v378_v36 = vpop.f32.mrf.mxu0 }
  0xe8   :  { %v304_v37 = vadd.f32 %v377_v33, %v303_v29  ;;  %v409_v38 = vpop.f32.mrf.mxu1 }
  0xe9   :  { %v379_v40 = vpop.f32.mrf.mxu0 }
  0xea   :  { %v322_v41 = vadd.f32 %v358_v35, %v304_v37 }
  0xec   :  { %v324_v42 = vadd.f32 %v323_v39, %v322_v41 }
  0xee   :  { %v325_v43 = vmax.f32 %v324_v42, 0.0 }
  0xf0   :  { %326 = vst [vmem:[%s557_s4] sm:$0xff] %v325_v43 }

// kernel: scnn_forward.48
= control target key start
LH: loop header
LB: loop body
LE: loop exit
PB: predicated region body
PF: predicated region fallthrough
CT: control target
= control target key end

     0   :  { %v434_v0 = vmov 0.0   ;;  %vm435_vm0 = vmmov 0   ;;  %s540_s1 = inlined_call_operand.vmem [shape: bf16[384,128], index: 1, kind: input, shape index: {}]   ;;  %s541_s0 = inlined_call_operand.vmem [shape: bf16[8,384], index: 0, kind: input, shape index: {}]   ;;  %s542_s2 = inlined_call_operand.vmem [shape: f32[1,128], index: 2, kind: input, shape index: {}]   ;;  %s543_s3 = inlined_call_operand.vmem [shape: f32[8,128], index: 3, kind: output, shape index: {}]  }
   0x1   :  { %385 = vmatprep.subr.bf16.mxu1 %v434_v0  ;;  %v407_v1 = vld [vmem:[%s540_s1 + $0x78] sm:$0xff]   ;;  %401 = vmatprep.mubr.msk.bf16.mxu1 %vm435_vm0, %v434_v0  ;;  %v410_v4 = vld [vmem:[%s540_s1 + $0x70] sm:$0xff]   ;;  %v413_v7 = vld [vmem:[%s540_s1 + $0x68] sm:$0xff]  }
   0x2   :  { %v408_v2 = vld [vmem:[%s540_s1 + $0xb8] sm:$0xff]   ;;  %354 = vmatprep.subr.bf16.mxu0 %v407_v1  ;;  %v411_v5 = vld [vmem:[%s540_s1 + $0xb0] sm:$0xff]   ;;  %v414_v8 = vld [vmem:[%s540_s1 + $0xa8] sm:$0xff]  }
   0x3   :  { %v409_v3 = vld [vmem:[%s540_s1 + $0x38] sm:$0xff]   ;;  %386 = vmatpush3.bf16.msra.mxu1 %v408_v2  ;;  %v412_v6 = vld [vmem:[%s540_s1 + $0x30] sm:$0xff]   ;;  %v415_v9 = vld [vmem:[%s540_s1 + $0x28] sm:$0xff]  }
   0x4   :  { %355 = vmatpush3.bf16.msra.mxu0 %v409_v3  ;;  %387 = vmatprep.subr.bf16.mxu1 %v434_v0  ;;  %v416_v10 = vld [vmem:[%s540_s1 + $0x60] sm:$0xff]   ;;  %v419_v13 = vld [vmem:[%s540_s1 + $0x58] sm:$0xff]   ;;  %v422_v16 = vld [vmem:[%s540_s1 + $0x50] sm:$0xff]  }
   0x5   :  { %356 = vmatprep.subr.bf16.mxu0 %v410_v4  ;;  %v417_v11 = vld [vmem:[%s540_s1 + $0xa0] sm:$0xff]   ;;  %v420_v14 = vld [vmem:[%s540_s1 + $0x98] sm:$0xff]   ;;  %v423_v17 = vld [vmem:[%s540_s1 + $0x90] sm:$0xff]  }
   0x6   :  { %v418_v12 = vld [vmem:[%s540_s1 + $0x20] sm:$0xff]   ;;  %v421_v15 = vld [vmem:[%s540_s1 + $0x18] sm:$0xff]   ;;  %v424_v18 = vld [vmem:[%s540_s1 + $0x10] sm:$0xff]  }
   0x7   :  { %388 = vmatpush3.bf16.msra.mxu1 %v411_v5  ;;  %v425_v19 = vld [vmem:[%s540_s1 + $0x48] sm:$0xff]   ;;  %v21_v22 = vld [vmem:[%s541_s0] sm:$0xff] }
   0x8   :  { %357 = vmatpush3.bf16.msra.mxu0 %v412_v6  ;;  %389 = vmatprep.subr.bf16.mxu1 %v434_v0  ;;  %v426_v20 = vld [vmem:[%s540_s1 + $0x88] sm:$0xff]   ;;  %v428_v23 = vld [vmem:[%s540_s1 + $0x40] sm:$0xff]   ;;  %v327_v24 = vcombine.high %v21_v22, %v21_v22  ;;  %v326_v28 = vcombine.low %v21_v22, %v21_v22 }
   0x9   :  { %358 = vmatprep.subr.bf16.mxu0 %v413_v7  ;;  %v427_v21 = vld [vmem:[%s540_s1 + $0x8] sm:$0xff]   ;;  %v429_v25 = vld [vmem:[%s540_s1 + $0x80] sm:$0xff]  }
   0xa   :  { %258 = vmatprep.mubr.bf16.mxu0 %v327_v24  ;;  %v430_v26 = vld [vmem:[%s540_s1] sm:$0xff]   ;;  %v433_v27 = vld [vmem:[%s541_s0 + $0x8] ss:$0 sps:$4 sm:$0xff]  }
   0xb   :  { %390 = vmatpush3.bf16.msra.mxu1 %v414_v8  ;;  %v353_v35 = vld [vmem:[%s542_s2] ss:$0 sm:$0xff] }
   0xc   :  { %359 = vmatpush3.bf16.msra.mxu0 %v415_v9  ;;  %391 = vmatprep.subr.bf16.mxu1 %v434_v0 }
   0xd   :  { %360 = vmatprep.subr.bf16.mxu0 %v416_v10 }
   0xf   :  { %392 = vmatpush3.bf16.msra.mxu1 %v417_v11 }
  0x10   :  { %361 = vmatpush3.bf16.msra.mxu0 %v418_v12  ;;  %393 = vmatprep.subr.bf16.mxu1 %v434_v0 }
  0x11   :  { %362 = vmatprep.subr.bf16.mxu0 %v419_v13 }
  0x13   :  { %394 = vmatpush3.bf16.msra.mxu1 %v420_v14 }
  0x14   :  { %363 = vmatpush3.bf16.msra.mxu0 %v421_v15  ;;  %395 = vmatprep.subr.bf16.mxu1 %v434_v0 }
  0x15   :  { %364 = vmatprep.subr.bf16.mxu0 %v422_v16 }
  0x17   :  { %396 = vmatpush3.bf16.msra.mxu1 %v423_v17 }
  0x18   :  { %365 = vmatpush3.bf16.msra.mxu0 %v424_v18  ;;  %397 = vmatprep.subr.bf16.mxu1 %v434_v0 }
  0x19   :  { %366 = vmatprep.subr.bf16.mxu0 %v425_v19 }
  0x1b   :  { %398 = vmatpush3.bf16.msra.mxu1 %v426_v20 }
  0x1c   :  { %367 = vmatpush3.bf16.msra.mxu0 %v427_v21  ;;  %399 = vmatprep.subr.bf16.mxu1 %v434_v0 }
  0x1d   :  { %368 = vmatprep.subr.bf16.mxu0 %v428_v23 }
  0x1f   :  { %400 = vmatpush3.bf16.msra.mxu1 %v429_v25 }
  0x20   :  { %369 = vmatpush3.bf16.msra.mxu0 %v430_v26 }
  0x22   :  { %402 = vmatmul.mubr.bf16.vlgmr.msra.gmra.mxu1 %v433_v27 }
  0x23   :  { %259 = vmatmul.mubr.bf16.vlgmr.msra.gmra.mxu0 %v326_v28 }
  0xe2   :  { %v300_v29 = vpop.f32.mrf.mxu1 }
  0xe3   :  { %v370_v30 = vpop.f32.mrf.mxu0 }
  0xe4   :  { %v403_v31 = vpop.f32.mrf.mxu1 }
  0xe5   :  { %v371_v32 = vpop.f32.mrf.mxu0 }
  0xe6   :  { %v372_v33 = vadd.f32 %v371_v32, %v370_v30  ;;  %v303_v34 = vpop.f32.mrf.mxu1 }
  0xe7   :  { %v373_v36 = vpop.f32.mrf.mxu0 }
  0xe8   :  { %v301_v37 = vadd.f32 %v372_v33, %v300_v29  ;;  %v404_v38 = vpop.f32.mrf.mxu1 }
  0xe9   :  { %v374_v39 = vpop.f32.mrf.mxu0 }
  0xea   :  { %v319_v40 = vadd.f32 %v353_v35, %v301_v37 }
  0xec   :  { %v320_v41 = vmax.f32 %v319_v40, 0.0 }
  0xee   :  { %321 = vst [vmem:[%s543_s3] sm:$0xff] %v320_v41 }

// kernel: reverse
= control target key start
LH: loop header
LB: loop body
LE: loop exit
PB: predicated region body
PF: predicated region fallthrough
CT: control target
= control target key end

     0   :  { %v76_v4 = vlaneseq  ;;  %v137_v11 = vmov 0.0   ;;  %s154_s0 = inlined_call_operand.vmem [shape: bf16[6,64], index: 0, kind: input, shape index: {}]   ;;  %s155_s1 = inlined_call_operand.vmem [shape: bf16[6,64], index: 1, kind: output, shape index: {}]  }
   0x1   :  { %v19_v0 = vld [vmem:[%s154_s0] sm:$0xf] }
   0x2   :  { %20 = vst [vmem:[#allocation1 + $0x4] sm:$0xf] %v19_v0  ;;  %v77_v5 = vshrl.u32 %v76_v4, 7 }
   0x4   :  { %vm78_vm0 = vcmp.lt.s32.totalorder %v77_v5, 6 }
   0x9   :  { %v133_v1 = vld [vmem:[#allocation1] sm:$0xff]  }
   0xa   :  { %v134_v2 = vunpack.c.l.bf16 %v133_v1  ;;  %v135_v3 = vunpack.c.h.bf16 %v133_v1 }
   0xc   :  { %54 = vst [vmem:[#allocation0 + $0x8] sm:$0xff] %v135_v3  ;;  %67 = vst [vmem:[#allocation0] sm:$0xff] %v134_v2 }
  0x13   :  { %v69_v6 = vld [vmem:[#allocation0 + $0x7] ss:$-1 sm:$0xff]  ;;  %v74_v7 = vld [vmem:[#allocation0 + $0xf] ss:$-1 sm:$0xff] }
  0x14   :  { %v70_v8 = vrot.slane %v69_v6, 2  ;;  %v75_v9 = vrot.slane %v74_v7, 2 }
  0x16   :  { %71 = vst [vmem:[#allocation2] sm:$0xff] %v70_v8 }
  0x17   :  { %79 = vst.msk [vmem:[#allocation2] sm:$0xff] %vm78_vm0, %v75_v9 }
  0x1e   :  { %v85_v10 = vld [vmem:[#allocation2] sm:$0xff] }
  0x1f   :  { %v86_v12 = vpack.c.bf16 %v137_v11, %v85_v10 }
  0x21   :  { %89 = vst [vmem:[#allocation3] sm:$0xf] %v86_v12 }
  0x28   :  { %v106_v13 = vld [vmem:[#allocation3] sm:$0xf] }
  0x29   :  { %107 = vst [vmem:[%s155_s1] sm:$0xf] %v106_v13 }

// kernel: scnn_forward.53
= control target key start
LH: loop header
LB: loop body
LE: loop exit
PB: predicated region body
PF: predicated region fallthrough
CT: control target
= control target key end

     0   :  { %s621_s12 = smov 0   ;;  %s623_s13 = smov 0   ;;  %s670_s0 = inlined_call_operand.vmem [shape: bf16[8,640], index: 0, kind: input, shape index: {}]   ;;  %s671_s1 = inlined_call_operand.vmem [shape: bf16[640,128], index: 1, kind: input, shape index: {}]   ;;  %s672_s2 = inlined_call_operand.vmem [shape: f32[1,128], index: 2, kind: input, shape index: {}]   ;;  %s673_s3 = inlined_call_operand.vmem [shape: f32[8,128], index: 3, kind: output, shape index: {}]  }
   0x1   :  { %s625_s14 = smov 0  }
   0x2 LB: > { %s25_s15 = sadd.s32 1, %s592_s13  ;;  %p492_p0 = scmp.ge.s32.totalorder %s596_s14, 1  ;;  %s596_s14 = sphi %s625_s14, %s13_s14   ;;  %s592_s13 = sphi %s623_s13, %s675_s13   ;;  %s588_s12 = sphi %s621_s12, %s674_s12  }
   0x3   : > { %p26_p1 = scmp.ge.s32.totalorder %s25_s15, 5  ;;  %p187_p2 = scmp.lt.s32.totalorder %s596_s14, 6 }
   0x5   : > { %s677_s15 = smov (%p26_p1, %s25_s15), 0  ;;  %p188_p3 = pnand %p492_p0, %p187_p2 }
   0x6   : > { %p229_p4 = scmp.lt.s32.totalorder (!%p188_p3), %s588_s12, 4  ;;  %s494_s16 = sshll.u32 (!%p188_p3), %s588_s12, 4 }
   0x7   : > { %191 = sbr.rel (%p188_p3) target bundleno = 261 (0x105), region = 32  ;;  %p236_p5 = scmp.lt.s32.totalorder (!%p188_p3), %s494_s16, 79 }
   0x8   : > { %p496_p6 = scmp.ne.s32.totalorder (!%p188_p3), %s588_s12, 0 }
   0xc   : > { %s230_s17 = scalar_select %p229_p4, %s588_s12, 4 }
   0xd   : > { %s679_s16 = smov (!%p236_p5, %s494_s16), 79  ;;  %258 = sbr.rel (%p496_p6) target bundleno = 20 (0x14), region = 36 }
   0xe   : > { %s493_s18 = sshll.u32 %s230_s17, 2  ;;  %s495_s22 = sshll.u32 %s679_s16, 2 }
   0xf   : > { %s647_s21 = scalar_lea.vmem %s670_s0, %s493_s18  ;;  %s242_s25 = scalar_lea.vmem %s671_s1, %s495_s22 }
  0x12   : > { %v598_v0 = vmov 0.0  }
  0x13   : > { %259 = vst [vmem:[#allocation2] sm:$0xff] %v598_v0 }
  0x14 PF: > { %v566_v1 = vld [vmem:[%s242_s25 + $0x38] sm:$0xff]   ;;  %v599_v2 = vmov 0.0   ;;  %v567_v3 = vld [vmem:[%s242_s25 + $0x30] sm:$0xff]   ;;  %vm600_vm0 = vmmov 0   ;;  %v568_v4 = vld [vmem:[%s242_s25 + $0x28] sm:$0xff]   ;;  %p505_p7 = scmp.ne.s32.totalorder %s588_s12, 4 }
  0x15   : > { %519 = vmatprep.subr.bf16.mxu0 %v599_v2  ;;  %535 = vmatprep.mubr.msk.bf16.mxu0 %vm600_vm0, %v599_v2  ;;  %v569_v5 = vld [vmem:[%s242_s25 + $0x20] sm:$0xff]   ;;  %v570_v6 = vld [vmem:[%s242_s25 + $0x18] sm:$0xff]   ;;  %v571_v7 = vld [vmem:[%s242_s25 + $0x10] sm:$0xff]  }
  0x16   : > { %520 = vmatpush3.bf16.msra.mxu0 %v566_v1  ;;  %v572_v8 = vld [vmem:[%s242_s25 + $0x8] sm:$0xff]   ;;  %v573_v9 = vld [vmem:[%s242_s25] sm:$0xff]  }
  0x17   : > { %521 = vmatprep.subr.bf16.mxu0 %v599_v2  ;;  %v261_v10 = vld [vmem:[%s647_s21] sm:$0xf] }
  0x1a   : > { %522 = vmatpush3.bf16.msra.mxu0 %v567_v3  ;;  %v260_v11 = vld [vmem:[#allocation2] sm:$0xff] }
  0x1b   : > { %523 = vmatprep.subr.bf16.mxu0 %v599_v2 }
  0x1e   : > { %524 = vmatpush3.bf16.msra.mxu0 %v568_v4 }
  0x1f   : > { %525 = vmatprep.subr.bf16.mxu0 %v599_v2 }
  0x22   : > { %526 = vmatpush3.bf16.msra.mxu0 %v569_v5 }
  0x23   : > { %527 = vmatprep.subr.bf16.mxu0 %v599_v2 }
  0x26   : > { %528 = vmatpush3.bf16.msra.mxu0 %v570_v6 }
  0x27   : > { %529 = vmatprep.subr.bf16.mxu0 %v599_v2 }
  0x2a   : > { %530 = vmatpush3.bf16.msra.mxu0 %v571_v7 }
  0x2b   : > { %531 = vmatprep.subr.bf16.mxu0 %v599_v2 }
  0x2e   : > { %532 = vmatpush3.bf16.msra.mxu0 %v572_v8 }
  0x2f   : > { %533 = vmatprep.subr.bf16.mxu0 %v599_v2 }
  0x32   : > { %534 = vmatpush3.bf16.msra.mxu0 %v573_v9 }
  0x35   : > { %536 = vmatmul.mubr.bf16.vlgmr.msra.gmra.mxu0 %v261_v10 }
  0xf5   : > { %v360_v12 = vpop.f32.mrf.mxu0 }
  0xf6   : > { %v366_v13 = vadd.f32 %v360_v12, %v260_v11 }
  0xf7   : > { %v537_v14 = vpop.f32.mrf.mxu0  ;;  %371 = sbr.rel (%p505_p7) target bundleno = 261 (0x105), region = 40 }
  0xf8   : > { %367 = vst [vmem:[#allocation2] sm:$0xff] %v366_v13 }
  0xf9   : > { %v363_v15 = vpop.f32.mrf.mxu0 }
  0xfb   : > { %v538_v16 = vpop.f32.mrf.mxu0 }
  0xfc   : > { %v506_v18 = vld [vmem:[%s672_s2] ss:$0 sm:$0xff] }
  0xff   : > { %v372_v17 = vld [vmem:[#allocation2] sm:$0xff] }
 0x100   : > { %v380_v19 = vadd.f32 %v506_v18, %v372_v17 }
 0x102   : > { %v381_v20 = vmax.f32 %v380_v19, 0.0 }
 0x104   : > { %382 = vst [vmem:[%s673_s3] sm:$0xff] %v381_v20 }
 0x105 PF: > { %s13_s14 = sadd.s32 1, %s596_s14   ;;  %s674_s12 = smov %s592_s13 }
 0x106   : > { %p10_p8 = scmp.ge.s32.totalorder %s13_s14, 7   ;;  %s675_s13 = smov %s677_s15 }
 0x108   :  { %12 = sbr.rel (!%p10_p8) target bundleno = 2 (0x2), region = 76 }

// kernel: scnn_forward.52
= control target key start
LH: loop header
LB: loop body
LE: loop exit
PB: predicated region body
PF: predicated region fallthrough
CT: control target
= control target key end

     0   :  { %s702_s15 = smov 0   ;;  %s704_s16 = smov 0   ;;  %s754_s0 = inlined_call_operand.vmem [shape: bf16[8,640], index: 0, kind: input, shape index: {}]   ;;  %s755_s1 = inlined_call_operand.vmem [shape: bf16[640,128], index: 1, kind: input, shape index: {}]   ;;  %s756_s2 = inlined_call_operand.vmem [shape: f32[1,128], index: 2, kind: input, shape index: {}]   ;;  %s757_s3 = inlined_call_operand.vmem [shape: f32[8,128], index: 3, kind: input, shape index: {}]   ;;  %s758_s4 = inlined_call_operand.vmem [shape: f32[8,128], index: 4, kind: output, shape index: {}]  }
   0x1   :  { %s706_s17 = smov 0  }
   0x2 LB: > { %s26_s18 = sadd.s32 1, %s668_s16  ;;  %p568_p0 = scmp.ge.s32.totalorder %s672_s17, 1  ;;  %s672_s17 = sphi %s706_s17, %s14_s17   ;;  %s668_s16 = sphi %s704_s16, %s760_s16   ;;  %s664_s15 = sphi %s702_s15, %s759_s15  }
   0x3   : > { %p27_p1 = scmp.ge.s32.totalorder %s26_s18, 5  ;;  %p226_p2 = scmp.lt.s32.totalorder %s672_s17, 6 }
   0x5   : > { %s762_s18 = smov (%p27_p1, %s26_s18), 0  ;;  %p227_p3 = pnand %p568_p0, %p226_p2 }
   0x6   : > { %p277_p4 = scmp.lt.s32.totalorder (!%p227_p3), %s664_s15, 4  ;;  %s570_s19 = sshll.u32 (!%p227_p3), %s664_s15, 4 }
   0x7   : > { %230 = sbr.rel (%p227_p3) target bundleno = 263 (0x107), region = 36  ;;  %p284_p5 = scmp.lt.s32.totalorder (!%p227_p3), %s570_s19, 79 }
   0x8   : > { %p572_p6 = scmp.ne.s32.totalorder (!%p227_p3), %s664_s15, 0 }
   0xc   : > { %s278_s20 = scalar_select %p277_p4, %s664_s15, 4 }
   0xd   : > { %s764_s19 = smov (!%p284_p5, %s570_s19), 79  ;;  %313 = sbr.rel (%p572_p6) target bundleno = 20 (0x14), region = 40 }
   0xe   : > { %s569_s21 = sshll.u32 %s278_s20, 2  ;;  %s571_s25 = sshll.u32 %s764_s19, 2 }
   0xf   : > { %s728_s24 = scalar_lea.vmem %s754_s0, %s569_s21  ;;  %s290_s28 = scalar_lea.vmem %s755_s1, %s571_s25 }
  0x12   : > { %v674_v0 = vmov 0.0  }
  0x13   : > { %314 = vst [vmem:[#allocation2] sm:$0xff] %v674_v0 }
  0x14 PF: > { %v642_v1 = vld [vmem:[%s290_s28 + $0x38] sm:$0xff]   ;;  %v675_v2 = vmov 0.0   ;;  %v643_v3 = vld [vmem:[%s290_s28 + $0x30] sm:$0xff]   ;;  %vm676_vm0 = vmmov 0   ;;  %v644_v4 = vld [vmem:[%s290_s28 + $0x28] sm:$0xff]   ;;  %p581_p7 = scmp.ne.s32.totalorder %s664_s15, 4 }
  0x15   : > { %595 = vmatprep.subr.bf16.mxu0 %v675_v2  ;;  %611 = vmatprep.mubr.msk.bf16.mxu0 %vm676_vm0, %v675_v2  ;;  %v645_v5 = vld [vmem:[%s290_s28 + $0x20] sm:$0xff]   ;;  %v646_v6 = vld [vmem:[%s290_s28 + $0x18] sm:$0xff]   ;;  %v647_v7 = vld [vmem:[%s290_s28 + $0x10] sm:$0xff]  }
  0x16   : > { %596 = vmatpush3.bf16.msra.mxu0 %v642_v1  ;;  %v648_v8 = vld [vmem:[%s290_s28 + $0x8] sm:$0xff]   ;;  %v649_v9 = vld [vmem:[%s290_s28] sm:$0xff]  }
  0x17   : > { %597 = vmatprep.subr.bf16.mxu0 %v675_v2  ;;  %v316_v10 = vld [vmem:[%s728_s24] sm:$0xf] }
  0x1a   : > { %598 = vmatpush3.bf16.msra.mxu0 %v643_v3  ;;  %v315_v11 = vld [vmem:[#allocation2] sm:$0xff] }
  0x1b   : > { %599 = vmatprep.subr.bf16.mxu0 %v675_v2 }
  0x1e   : > { %600 = vmatpush3.bf16.msra.mxu0 %v644_v4 }
  0x1f   : > { %601 = vmatprep.subr.bf16.mxu0 %v675_v2 }
  0x22   : > { %602 = vmatpush3.bf16.msra.mxu0 %v645_v5 }
  0x23   : > { %603 = vmatprep.subr.bf16.mxu0 %v675_v2 }
  0x26   : > { %604 = vmatpush3.bf16.msra.mxu0 %v646_v6 }
  0x27   : > { %605 = vmatprep.subr.bf16.mxu0 %v675_v2 }
  0x2a   : > { %606 = vmatpush3.bf16.msra.mxu0 %v647_v7 }
  0x2b   : > { %607 = vmatprep.subr.bf16.mxu0 %v675_v2 }
  0x2e   : > { %608 = vmatpush3.bf16.msra.mxu0 %v648_v8 }
  0x2f   : > { %609 = vmatprep.subr.bf16.mxu0 %v675_v2 }
  0x32   : > { %610 = vmatpush3.bf16.msra.mxu0 %v649_v9 }
  0x35   : > { %612 = vmatmul.mubr.bf16.vlgmr.msra.gmra.mxu0 %v316_v10 }
  0xf5   : > { %v415_v12 = vpop.f32.mrf.mxu0 }
  0xf6   : > { %v421_v13 = vadd.f32 %v415_v12, %v315_v11 }
  0xf7   : > { %v613_v14 = vpop.f32.mrf.mxu0  ;;  %426 = sbr.rel (%p581_p7) target bundleno = 263 (0x107), region = 44 }
  0xf8   : > { %422 = vst [vmem:[#allocation2] sm:$0xff] %v421_v13 }
  0xf9   : > { %v418_v15 = vpop.f32.mrf.mxu0 }
  0xfb   : > { %v614_v16 = vpop.f32.mrf.mxu0 }
  0xfc   : > { %v582_v18 = vld [vmem:[%s756_s2] ss:$0 sm:$0xff] }
  0xfd   : > { %v436_v19 = vld [vmem:[%s757_s3] sm:$0xff] }
  0xff   : > { %v427_v17 = vld [vmem:[#allocation2] sm:$0xff] }
 0x100   : > { %v435_v20 = vadd.f32 %v582_v18, %v427_v17 }
 0x102   : > { %v437_v21 = vadd.f32 %v436_v19, %v435_v20 }
 0x104   : > { %v438_v22 = vmax.f32 %v437_v21, 0.0 }
 0x106   : > { %439 = vst [vmem:[%s758_s4] sm:$0xff] %v438_v22 }
 0x107 PF: > { %s14_s17 = sadd.s32 1, %s672_s17   ;;  %s759_s15 = smov %s668_s16 }
 0x108   : > { %p11_p8 = scmp.ge.s32.totalorder %s14_s17, 7   ;;  %s760_s16 = smov %s762_s18 }
 0x10a   :  { %13 = sbr.rel (!%p11_p8) target bundleno = 2 (0x2), region = 83 }

// kernel: scnn_forward.58
= control target key start
LH: loop header
LB: loop body
LE: loop exit
PB: predicated region body
PF: predicated region fallthrough
CT: control target
= control target key end

     0   :  { %s430_s12 = smov 0   ;;  %s471_s0 = inlined_call_operand.vmem [shape: f32[6,8,96], index: 0, kind: input, shape index: {}]   ;;  %s472_s1 = inlined_call_operand.vmem [shape: f32[32,96], index: 1, kind: input, shape index: {}]   ;;  %s473_s2 = inlined_call_operand.vmem [shape: f32[1,96], index: 2, kind: input, shape index: {}]   ;;  %s474_s3 = inlined_call_operand.vmem [shape: f32[6,8,32], index: 3, kind: output, shape index: {}]  }
   0x1 LB: > { %s347_s13 = sadd.s32 4294967295, %s402_s12   ;;  %p351_p0 = scmp.ge.s32.totalorder %s402_s12, 1  ;;  %s402_s12 = sphi %s430_s12, %s13_s12  }
   0x2   : > { %p136_p1 = scmp.lt.s32.totalorder %s402_s12, 7 }
   0x4   : > { %p137_p2 = pnand %p351_p0, %p136_p1 }
   0x5   : > { %p158_p3 = scmp.lt.s32.totalorder (!%p137_p2), %s347_s13, 5  ;;  %p354_p4 = scmp.ne.s32.totalorder (!%p137_p2), %s347_s13, 0 }
   0x6   : > { %140 = sbr.rel (%p137_p2) target bundleno = 710 (0x2c6), region = 32 }
   0xb   : > { %s159_s14 = scalar_select %p158_p3, %s347_s13, 5 }
   0xc   : > { %169 = sbr.rel (%p354_p4) target bundleno = 19 (0x13), region = 36 }
   0xd   : > { %s352_s15 = sshll.u32 %s159_s14, 3 }
   0xe   : > { %s441_s18 = scalar_lea.vmem %s471_s0, %s352_s15  ;;  %s446_s21 = scalar_lea.vmem %s474_s3, %s352_s15 }
  0x11   : > { %vm170_vm0 = vcmask 261120   ;;  %v404_v0 = vmov 0.0  }
  0x12   : > { %171 = vst.msk [vmem:[#allocation2] sm:$0xff] %vm170_vm0, %v404_v0 }
  0x13 PF: > { %v176_v1 = vld [vmem:[%s472_s1 + $0x18] sm:$0xff]  ;;  %v405_v2 = vmov 0.0   ;;  %v175_v3 = vld [vmem:[%s472_s1 + $0x10] sm:$0xff]  ;;  %vm406_vm1 = vmmov 0   ;;  %v174_v4 = vld [vmem:[%s472_s1 + $0x8] sm:$0xff]  ;;  %vm184_vm2 = vcmask 261120  }
  0x14   : > { %365 = vmatprep.subr.mxu0 %v405_v2  ;;  %373 = vmatprep.mubr.msk.f32.mxu0 %vm406_vm1, %v405_v2  ;;  %v173_v5 = vld [vmem:[%s472_s1] sm:$0xff]  ;;  %s407_s5 = smov 64   ;;  %s408_s6 = smov 96  }
  0x15   : > { %366 = vmatpush3.msra.mxu0 %v176_v1  ;;  %v355_v7 = vld [vmem:[%s473_s2] ss:$0 sm:$0xff]  ;;  %s409_s7 = smov 32  }
  0x16   : > { %367 = vmatprep.subr.mxu0 %v405_v2  ;;  %v258_v11 = vld [vmem:[%s441_s18] sm:$0xff] }
  0x17   : > { %368 = vmatpush3.msra.mxu0 %v175_v3 }
  0x18   : > { %369 = vmatprep.subr.mxu0 %v405_v2 }
  0x19   : > { %370 = vmatpush3.msra.mxu0 %v174_v4  ;;  %v172_v6 = vld [vmem:[#allocation2] sm:$0xff] }
  0x1a   : > { %371 = vmatprep.subr.mxu0 %v405_v2 }
  0x1b   : > { %372 = vmatpush3.msra.mxu0 %v173_v5 }
  0x1c   : > { %374 = vmatmul.mubr.msk.f32.vlgmr.msra.gmra.mxu0 %vm184_vm2, %v172_v6 }
  0xdc   : > { %v254_v8 = vpop.f32.mrf.mxu0 }
  0xdd   : > { %v255_v9 = vadd.f32 %v355_v7, %v254_v8 }
  0xde   : > { %v375_v10 = vpop.f32.mrf.mxu0 }
  0xdf   : > { %267 = vrot.lane.b32.xlu0 %v255_v9, %s407_s5  ;;  %v259_v12 = vadd.f32 %v258_v11, %v255_v9 }
  0xe1   : > { %v357_v13 = vmul.f32 -1.442695, %v259_v12 }
  0xe3   : > { %390 = vpow2.f32 %v357_v13 }
  0xf0   : > { %v391_v14 = vpop.eup %390 }
  0xf1   : > { %v263_v15 = vadd.f32 1.0, %v391_v14 }
  0xf3   : > { %392 = vrcp.f32 %v263_v15 }
 0x100   : > { %v393_v16 = vpop.eup %392 }
 0x101   : > { %v277_v23 = vsub.f32 1.0, %v393_v16 }
 0x151   : > { %v268_v17 = vpop.permute.xlu0 %267 }
 0x152   : > { %v270_v18 = vmul.f32 %v393_v16, %v268_v17 }
 0x154   : > { %272 = vrot.lane.b32.xlu0 %v270_v18, %s407_s5 }
 0x1c6   : > { %v273_v19 = vpop.permute.xlu0 %272 }
 0x1c7   : > { %v275_v20 = vadd.f32 %v273_v19, %v258_v11 }
 0x1c9   : > { %394 = vtanh.f32 %v275_v20 }
 0x1d6   : > { %v395_v21 = vpop.eup %394 }
 0x1d7   : > { %279 = vrot.lane.b32.xlu1 %v395_v21, %s408_s6 }
 0x1db   : > { %283 = vrot.lane.b32.xlu1 %v172_v6, %s409_s7 }
 0x249   : > { %v280_v22 = vpop.permute.xlu1 %279 }
 0x24a   : > { %v282_v25 = vmul.f32 %v280_v22, %v277_v23 }
 0x24d   : > { %v284_v24 = vpop.permute.xlu1 %283 }
 0x24e   : > { %v286_v26 = vmul.f32 %v393_v16, %v284_v24 }
 0x250   : > { %v287_v27 = vadd.f32 %v286_v26, %v282_v25 }
 0x252   : > { %289 = vrot.lane.b32.xlu0 %v287_v27, %s408_s6 }
 0x2c4   : > { %v290_v28 = vpop.permute.xlu0 %289 }
 0x2c5   : > { %292 = vst.msk [vmem:[#allocation2] sm:$0xff] %vm184_vm2, %v290_v28  ;;  %293 = vst.msk [vmem:[%s446_s21] sm:$0xff] %vm184_vm2, %v290_v28 }
 0x2c6 PF: > { %s13_s12 = sadd.s32 1, %s402_s12  }
 0x2c7   : > { %p10_p5 = scmp.ge.s32.totalorder %s13_s12, 8  }
 0x2c9   :  { %12 = sbr.rel (!%p10_p5) target bundleno = 1 (0x1), region = 66 }

</bundles_post_ra>
